<compile_context>
chip_gen: v7x
topology: tpu7x:2x2x1
jax: 0.10.0
libtpu: 0.0.40
codegen_flags: <defaults>
</compile_context>

<pallas_src>
import math

import jax
import jax.numpy as jnp
from jax.experimental import pallas as pl
from jax.experimental.pallas import tpu as pltpu

# bf16 operands for every matmul (f32 accumulation kept via preferred_element_type).
# Flip to jnp.float32 for bit-closeness to the PyTorch f32 reference.
MATMUL_DTYPE = jnp.bfloat16

_VMEM_SPEC = pl.BlockSpec(memory_space=pltpu.MemorySpace.VMEM)  # whole array in VMEM


# ------------------------- Pallas kernels -------------------------

def _conv_kernel(x_ref, w_ref, b_ref, o_ref):
    """o = relu(x @ w + b).

    BatchNorm (eval) scale/shift — and for conv1 also the 1x1 input-adapter
    conv — are folded into (w, b) at parameter-prep time, and the two parallel
    streams are merged block-diagonally, so one matmul covers both streams.
    """
    y = jnp.dot(x_ref[...], w_ref[...], preferred_element_type=jnp.float32)
    o_ref[...] = jnp.maximum(y + b_ref[...], 0.0)


def conv_block(patches, w, b):
    """One fused conv(+BN)+ReLU layer for BOTH streams as a single matmul."""
    M = patches.shape[0]
    OC = w.shape[1]
    return pl.pallas_call(
        _conv_kernel,
        out_shape=jax.ShapeDtypeStruct((M, OC), jnp.float32),
        in_specs=[_VMEM_SPEC, _VMEM_SPEC, _VMEM_SPEC],
        out_specs=_VMEM_SPEC,
    )(patches.astype(MATMUL_DTYPE), w, b)


def _head_kernel(x_ref, w3_ref, b3_ref, w1_ref, b1_ref, wf_ref, bf_ref, o_ref):
    # conv3(+BN)+ReLU -> (adaptive-pool fold) fc1_pCNN + ReLU -> dropout -> fc3_2.
    h = jnp.dot(x_ref[...], w3_ref[...], preferred_element_type=jnp.float32)
    h = jnp.maximum(h + b3_ref[...], 0.0)            # (N, 64) = concat of both streams
    h = jnp.dot(h.astype(MATMUL_DTYPE), w1_ref[...],
                preferred_element_type=jnp.float32)
    h = jnp.maximum(h + b1_ref[...], 0.0)            # (N, 2048) hidden, stays in VMEM
    # TODO(synk): nn.Dropout(p=0.5) is identity in eval mode; train-mode random masking not implemented.
    o_ref[...] = jnp.dot(h.astype(MATMUL_DTYPE), wf_ref[...],
                         preferred_element_type=jnp.float32) + bf_ref[...]


def head(feat, c3_w, c3_b, fc1_w, fc1_b, fc3_w, fc3_b):
    """conv3 + stream concat + fc1_pCNN + ReLU + fc3_2 in a single pallas_call."""
    N = feat.shape[0]
    C = fc3_w.shape[1]
    return pl.pallas_call(
        _head_kernel,
        out_shape=jax.ShapeDtypeStruct((N, C), jnp.float32),
        in_specs=[_VMEM_SPEC] * 7,
        out_specs=_VMEM_SPEC,
    )(feat.astype(MATMUL_DTYPE), c3_w, c3_b, fc1_w, fc1_b, fc3_w, fc3_b)


# ------------------------- XLA glue (layout / data movement only) -------------------------

def _im2col(x, k):
    """x: (N, H, W, C) -> (N, oh, ow, k*k*C); feature ordering (kh, kw, C)."""
    H, W = x.shape[1], x.shape[2]
    oh, ow = H - k + 1, W - k + 1
    cols = [x[:, i:i + oh, j:j + ow, :] for i in range(k) for j in range(k)]
    return jnp.concatenate(cols, axis=-1)


def _avg_pool_2x2(x):
    """AvgPool2d(kernel=2, stride=2) on (N, H, W, C)."""
    N, H, W, C = x.shape
    return x.reshape(N, H // 2, 2, W // 2, 2, C).mean(axis=(2, 4))


def bilinear_resize(x, out_h, out_w):
    """nn.Upsample(mode='bilinear', align_corners=False) on NHWC."""
    N, H, W, C = x.shape

    def axis_coords(out_size, in_size):
        scale = in_size / out_size
        c = (jnp.arange(out_size, dtype=jnp.float32) + 0.5) * scale - 0.5
        c = jnp.clip(c, 0.0, in_size - 1)
        lo = jnp.floor(c).astype(jnp.int32)
        hi = jnp.minimum(lo + 1, in_size - 1)
        frac = c - lo.astype(jnp.float32)
        return lo, hi, frac

    ylo, yhi, yf = axis_coords(out_h, H)
    xlo, xhi, xf = axis_coords(out_w, W)
    rows = x[:, ylo] * (1.0 - yf)[None, :, None, None] \
         + x[:, yhi] * yf[None, :, None, None]
    out = rows[:, :, xlo] * (1.0 - xf)[None, None, :, None] \
        + rows[:, :, xhi] * xf[None, None, :, None]
    return out


# ------------------------- parameters -------------------------

def _uniform(key, shape, fan_in):
    bound = 1.0 / math.sqrt(float(fan_in))
    return jax.random.uniform(key, shape, jnp.float32, -bound, bound)


def init_params(key, class_number):
    """Raw PyTorch-layout parameters (eval-mode BatchNorm buffers)."""
    keys = iter(jax.random.split(key, 24))

    def conv(oc, ic, k):
        fan = ic * k * k
        return _uniform(next(keys), (oc, ic, k, k), fan), _uniform(next(keys), (oc,), fan)

    def linear(out_f, in_f):   # PyTorch nn.Linear layout: (out_features, in_features)
        return _uniform(next(keys), (out_f, in_f), in_f), _uniform(next(keys), (out_f,), in_f)

    def bn(c):                 # fresh BatchNorm2d (eval): gamma=1, beta=0, mean=0, var=1
        return (jnp.ones((c,), jnp.float32), jnp.zeros((c,), jnp.float32),
                jnp.zeros((c,), jnp.float32), jnp.ones((c,), jnp.float32), 1e-5)

    def stream():
        w1, b1 = conv(8, 3, 5)
        w2, b2 = conv(16, 8, 5)
        w3, b3 = conv(32, 16, 5)
        return dict(w1=w1, b1=b1, bn1=bn(8), w2=w2, b2=b2, bn2=bn(16),
                    w3=w3, b3=b3, bn3=bn(32))

    aw, ab = conv(3, 1, 1)     # input_adapter Conv2d(1, 3, kernel_size=1)
    fc1_w, fc1_b = linear(2 * 1024, 2 * 32 * 4 * 4)
    fc3_w, fc3_b = linear(class_number, 2 * 1024)
    return dict(adapt_w=aw, adapt_b=ab, s1=stream(), s2=stream(),
                fc1_w=fc1_w, fc1_b=fc1_b, fc3_w=fc3_w, fc3_b=fc3_b)


def prepare_params(raw):
    """One-time inference-side weight folding (all exact algebra)."""
    a_w = raw["adapt_w"].reshape(3)   # Conv2d(1,3,1): (3,1,1,1) -> (3,)
    a_b = raw["adapt_b"]

    def bn_fold(bn):
        gamma, beta, mean, var, eps = bn
        scale = gamma / jnp.sqrt(var + eps)
        return scale, beta - mean * scale

    def fold_conv(w, b, bn):   # (oc, ic, kh, kw) -> (kh*kw*ic, oc) matching im2col order
        oc = w.shape[0]
        s, t = bn_fold(bn)
        wm = jnp.transpose(w, (2, 3, 1, 0)).reshape(-1, oc) * s
        return wm, b * s + t

    def fold_conv1(p):
        # Fold the shared 1x1 adapter (a per-pixel channel affine commutes with
        # the bilinear upsample) and BN1 into a Conv(1->8, 5x5)-as-matmul.
        w1, b1 = p["w1"], p["b1"]                             # (8, 3, 5, 5)
        w1f = jnp.einsum("ochw,c->ohw", w1, a_w)[:, None]     # (8, 1, 5, 5)
        b1f = b1 + jnp.einsum("ochw,c->o", w1, a_b)
        return fold_conv(w1f, b1f, p["bn1"])

    def merge(wa, ba, wb, bb, ic):
        """Block-diagonal merge of the two streams: K=(tap, stream, ic), OC=(stream, oc)."""
        oc = wa.shape[1]
        wa3 = wa.reshape(25, ic, oc)
        wb3 = wb.reshape(25, ic, oc)
        z = jnp.zeros_like(wa3)
        w = jnp.concatenate([jnp.concatenate([wa3, z], axis=-1),
                             jnp.concatenate([z, wb3], axis=-1)], axis=1)
        return (w.reshape(25 * 2 * ic, 2 * oc).astype(MATMUL_DTYPE),
                jnp.concatenate([ba, bb])[None, :])

    s1, s2 = raw["s1"], raw["s2"]
    c1_w, c1_b = merge(*fold_conv1(s1), *fold_conv1(s2), ic=1)
    c2_w, c2_b = merge(*fold_conv(s1["w2"], s1["b2"], s1["bn2"]),
                       *fold_conv(s2["w2"], s2["b2"], s2["bn2"]), ic=8)
    c3_w, c3_b = merge(*fold_conv(s1["w3"], s1["b3"], s1["bn3"]),
                       *fold_conv(s2["w3"], s2["b3"], s2["bn3"]), ic=16)

    # fc1_pCNN: PyTorch (out=2048, in=1024) -> transpose to (in, out); fold
    # AdaptiveAvgPool2d((4,4)) on the 1x1 conv3 map (= each of the 64 concat
    # features repeated 16x in NCHW-flatten order) by summing weight rows in
    # consecutive groups of 16 -> (64, 2048).
    fc1_w = raw["fc1_w"].T.reshape(64, 16, -1).sum(axis=1)
    fc3_w = raw["fc3_w"].T
    return dict(
        c1_w=c1_w, c1_b=c1_b, c2_w=c2_w, c2_b=c2_b, c3_w=c3_w, c3_b=c3_b,
        fc1_w=fc1_w.astype(MATMUL_DTYPE), fc1_b=raw["fc1_b"][None, :],
        fc3_w=fc3_w.astype(MATMUL_DTYPE), fc3_b=raw["fc3_b"][None, :],
    )


# ------------------------- forward (nn_number == 2 path) -------------------------

def c_lenet_pcnn_forward(params, x1_nchw, x2_nchw):
    N = x1_nchw.shape[0]

    # Both streams stacked on the channel (lane) axis, single upsample call.
    # The 1x1 input adapter is folded into conv1's weights (exact).
    g = jnp.stack([x1_nchw[:, 0], x2_nchw[:, 0]], axis=-1)    # (N, 16, 16, 2)
    x = bilinear_resize(g, 32, 32)                            # (N, 32, 32, 2)

    # conv1 (+adapter+BN+ReLU): 32 -> 28, 2x8 ch ; AvgPool2d(2,2): 28 -> 14
    p1 = _im2col(x, 5)                                        # (N, 28, 28, 50)
    oh, ow = p1.shape[1], p1.shape[2]
    a1 = conv_block(p1.reshape(N * oh * ow, -1), params["c1_w"], params["c1_b"])
    a1 = _avg_pool_2x2(a1.reshape(N, oh, ow, -1))             # (N, 14, 14, 16)

    # conv2 (+BN+ReLU): 14 -> 10, 2x16 ch ; AvgPool2d(2,2): 10 -> 5
    p2 = _im2col(a1, 5)                                       # (N, 10, 10, 400)
    oh, ow = p2.shape[1], p2.shape[2]
    a2 = conv_block(p2.reshape(N * oh * ow, -1), params["c2_w"], params["c2_b"])
    a2 = _avg_pool_2x2(a2.reshape(N, oh, ow, -1))             # (N, 5, 5, 32)

    # conv3's 5x5 window exactly covers the 5x5 map, so its patch matrix is the
    # flattened map; the adaptive-pool/flatten fold into fc1 requires this.
    assert a2.shape[1:3] == (5, 5), "adaptive-pool fold assumes conv3 sees a 5x5 map"
    feat = a2.reshape(N, 5 * 5 * 32)                          # (N, 800)

    # conv3(+BN+ReLU) + stream concat + fc1_pCNN + ReLU + dropout(id) + fc3_2,
    # all fused into one pallas_call.
    return head(feat, params["c3_w"], params["c3_b"],
                params["fc1_w"], params["fc1_b"],
                params["fc3_w"], params["fc3_b"])


if __name__ == "__main__":
    key = jax.random.PRNGKey(0)
    k1, k2, kp = jax.random.split(key, 3)
    x1 = jax.random.normal(k1, (2, 1, 16, 16), jnp.float32)   # NCHW, 1 channel
    x2 = jax.random.normal(k2, (2, 1, 16, 16), jnp.float32)

    params = prepare_params(init_params(kp, class_number=10))
    fwd = jax.jit(c_lenet_pcnn_forward)

    out = jax.block_until_ready(fwd(params, x1, x2))
    assert out.shape == (2, 10), out.shape
    print("KERNEL_OK")
</pallas_src>

<mosaic_0001>
module attributes {stable_mosaic.version = 11 : i64} {
  func.func @_conv_kernel(%arg0: memref<1568x50xbf16, #tpu.memory_space<vmem>>, %arg1: memref<50x16xbf16, #tpu.memory_space<vmem>>, %arg2: memref<1x16xf32, #tpu.memory_space<vmem>>, %arg3: memref<1568x16xf32, #tpu.memory_space<vmem>>) attributes {dimension_semantics = [], scalar_prefetch = 0 : i64, scratch_operands = 0 : i64, tpu.core_type = #tpu.core_type<tc>} {
    %c0 = arith.constant 0 : index
    %c0_0 = arith.constant 0 : index
    %0 = vector.load %arg0[%c0, %c0_0] : memref<1568x50xbf16, #tpu.memory_space<vmem>>, vector<1568x50xbf16>
    %c0_1 = arith.constant 0 : index
    %c0_2 = arith.constant 0 : index
    %1 = vector.load %arg1[%c0_1, %c0_2] : memref<50x16xbf16, #tpu.memory_space<vmem>>, vector<50x16xbf16>
    %cst = arith.constant dense<0.000000e+00> : vector<1568x16xf32>
    %2 = tpu.matmul %0, %1, %cst {dimension_numbers = #tpu.dot_dimension_numbers<[1], [0], [0], [1], [0, 0, 1, 1], [], []>} : vector<1568x50xbf16>, vector<50x16xbf16>, vector<1568x16xf32> -> vector<1568x16xf32>
    %c0_3 = arith.constant 0 : index
    %c0_4 = arith.constant 0 : index
    %3 = vector.load %arg2[%c0_3, %c0_4] : memref<1x16xf32, #tpu.memory_space<vmem>>, vector<1x16xf32>
    %4 = vector.broadcast %3 : vector<1x16xf32> to vector<1568x16xf32>
    %5 = arith.addf %2, %4 : vector<1568x16xf32>
    %cst_5 = arith.constant 0.000000e+00 : f32
    %6 = vector.broadcast %cst_5 : f32 to vector<1568x16xf32>
    %7 = arith.maximumf %5, %6 : vector<1568x16xf32>
    %c0_6 = arith.constant 0 : index
    %c0_7 = arith.constant 0 : index
    %8 = vector.load %arg3[%c0_6, %c0_7] : memref<1568x16xf32, #tpu.memory_space<vmem>>, vector<1568x16xf32>
    tpu.vector_store %arg3[%c0_6, %c0_7], %7 {strides = array<i32>} : memref<1568x16xf32, #tpu.memory_space<vmem>>, vector<1568x16xf32>,
    return
  }
}

module attributes {stable_mosaic.version = 11 : i64} {
  func.func @_conv_kernel(%arg0: memref<200x400xbf16, #tpu.memory_space<vmem>>, %arg1: memref<400x32xbf16, #tpu.memory_space<vmem>>, %arg2: memref<1x32xf32, #tpu.memory_space<vmem>>, %arg3: memref<200x32xf32, #tpu.memory_space<vmem>>) attributes {dimension_semantics = [], scalar_prefetch = 0 : i64, scratch_operands = 0 : i64, tpu.core_type = #tpu.core_type<tc>} {
    %c0 = arith.constant 0 : index
    %c0_0 = arith.constant 0 : index
    %0 = vector.load %arg0[%c0, %c0_0] : memref<200x400xbf16, #tpu.memory_space<vmem>>, vector<200x400xbf16>
    %c0_1 = arith.constant 0 : index
    %c0_2 = arith.constant 0 : index
    %1 = vector.load %arg1[%c0_1, %c0_2] : memref<400x32xbf16, #tpu.memory_space<vmem>>, vector<400x32xbf16>
    %cst = arith.constant dense<0.000000e+00> : vector<200x32xf32>
    %2 = tpu.matmul %0, %1, %cst {dimension_numbers = #tpu.dot_dimension_numbers<[1], [0], [0], [1], [0, 0, 1, 1], [], []>} : vector<200x400xbf16>, vector<400x32xbf16>, vector<200x32xf32> -> vector<200x32xf32>
    %c0_3 = arith.constant 0 : index
    %c0_4 = arith.constant 0 : index
    %3 = vector.load %arg2[%c0_3, %c0_4] : memref<1x32xf32, #tpu.memory_space<vmem>>, vector<1x32xf32>
    %4 = vector.broadcast %3 : vector<1x32xf32> to vector<200x32xf32>
    %5 = arith.addf %2, %4 : vector<200x32xf32>
    %cst_5 = arith.constant 0.000000e+00 : f32
    %6 = vector.broadcast %cst_5 : f32 to vector<200x32xf32>
    %7 = arith.maximumf %5, %6 : vector<200x32xf32>
    %c0_6 = arith.constant 0 : index
    %c0_7 = arith.constant 0 : index
    %8 = vector.load %arg3[%c0_6, %c0_7] : memref<200x32xf32, #tpu.memory_space<vmem>>, vector<200x32xf32>
    tpu.vector_store %arg3[%c0_6, %c0_7], %7 {strides = array<i32>} : memref<200x32xf32, #tpu.memory_space<vmem>>, vector<200x32xf32>,
    return
  }
}

module attributes {stable_mosaic.version = 11 : i64} {
  func.func @_head_kernel(%arg0: memref<2x800xbf16, #tpu.memory_space<vmem>>, %arg1: memref<800x64xbf16, #tpu.memory_space<vmem>>, %arg2: memref<1x64xf32, #tpu.memory_space<vmem>>, %arg3: memref<64x2048xbf16, #tpu.memory_space<vmem>>, %arg4: memref<1x2048xf32, #tpu.memory_space<vmem>>, %arg5: memref<2048x10xbf16, #tpu.memory_space<vmem>>, %arg6: memref<1x10xf32, #tpu.memory_space<vmem>>, %arg7: memref<2x10xf32, #tpu.memory_space<vmem>>) attributes {dimension_semantics = [], scalar_prefetch = 0 : i64, scratch_operands = 0 : i64, tpu.core_type = #tpu.core_type<tc>} {
    %c0 = arith.constant 0 : index
    %c0_0 = arith.constant 0 : index
    %0 = vector.load %arg0[%c0, %c0_0] : memref<2x800xbf16, #tpu.memory_space<vmem>>, vector<2x800xbf16>
    %c0_1 = arith.constant 0 : index
    %c0_2 = arith.constant 0 : index
    %1 = vector.load %arg1[%c0_1, %c0_2] : memref<800x64xbf16, #tpu.memory_space<vmem>>, vector<800x64xbf16>
    %cst = arith.constant dense<0.000000e+00> : vector<2x64xf32>
    %2 = tpu.matmul %0, %1, %cst {dimension_numbers = #tpu.dot_dimension_numbers<[1], [0], [0], [1], [0, 0, 1, 1], [], []>} : vector<2x800xbf16>, vector<800x64xbf16>, vector<2x64xf32> -> vector<2x64xf32>
    %c0_3 = arith.constant 0 : index
    %c0_4 = arith.constant 0 : index
    %3 = vector.load %arg2[%c0_3, %c0_4] : memref<1x64xf32, #tpu.memory_space<vmem>>, vector<1x64xf32>
    %4 = vector.broadcast %3 : vector<1x64xf32> to vector<2x64xf32>
    %5 = arith.addf %2, %4 : vector<2x64xf32>
    %cst_5 = arith.constant 0.000000e+00 : f32
    %6 = vector.broadcast %cst_5 : f32 to vector<2x64xf32>
    %7 = arith.maximumf %5, %6 : vector<2x64xf32>
    %8 = arith.truncf %7 : vector<2x64xf32> to vector<2x64xbf16>
    %c0_6 = arith.constant 0 : index
    %c0_7 = arith.constant 0 : index
    %9 = vector.load %arg3[%c0_6, %c0_7] : memref<64x2048xbf16, #tpu.memory_space<vmem>>, vector<64x2048xbf16>
    %cst_8 = arith.constant dense<0.000000e+00> : vector<2x2048xf32>
    %10 = tpu.matmul %8, %9, %cst_8 {dimension_numbers = #tpu.dot_dimension_numbers<[1], [0], [0], [1], [0, 0, 1, 1], [], []>} : vector<2x64xbf16>, vector<64x2048xbf16>, vector<2x2048xf32> -> vector<2x2048xf32>
    %c0_9 = arith.constant 0 : index
    %c0_10 = arith.constant 0 : index
    %11 = vector.load %arg4[%c0_9, %c0_10] : memref<1x2048xf32, #tpu.memory_space<vmem>>, vector<1x2048xf32>
    %12 = vector.broadcast %11 : vector<1x2048xf32> to vector<2x2048xf32>
    %13 = arith.addf %10, %12 : vector<2x2048xf32>
    %cst_11 = arith.constant 0.000000e+00 : f32
    %14 = vector.broadcast %cst_11 : f32 to vector<2x2048xf32>
    %15 = arith.maximumf %13, %14 : vector<2x2048xf32>
    %16 = arith.truncf %15 : vector<2x2048xf32> to vector<2x2048xbf16>
    %c0_12 = arith.constant 0 : index
    %c0_13 = arith.constant 0 : index
    %17 = vector.load %arg5[%c0_12, %c0_13] : memref<2048x10xbf16, #tpu.memory_space<vmem>>, vector<2048x10xbf16>
    %cst_14 = arith.constant dense<0.000000e+00> : vector<2x10xf32>
    %18 = tpu.matmul %16, %17, %cst_14 {dimension_numbers = #tpu.dot_dimension_numbers<[1], [0], [0], [1], [0, 0, 1, 1], [], []>} : vector<2x2048xbf16>, vector<2048x10xbf16>, vector<2x10xf32> -> vector<2x10xf32>
    %c0_15 = arith.constant 0 : index
    %c0_16 = arith.constant 0 : index
    %19 = vector.load %arg6[%c0_15, %c0_16] : memref<1x10xf32, #tpu.memory_space<vmem>>, vector<1x10xf32>
    %20 = vector.broadcast %19 : vector<1x10xf32> to vector<2x10xf32>
    %21 = arith.addf %18, %20 : vector<2x10xf32>
    %c0_17 = arith.constant 0 : index
    %c0_18 = arith.constant 0 : index
    %22 = vector.load %arg7[%c0_17, %c0_18] : memref<2x10xf32, #tpu.memory_space<vmem>>, vector<2x10xf32>
    tpu.vector_store %arg7[%c0_17, %c0_18], %21 {strides = array<i32>} : memref<2x10xf32, #tpu.memory_space<vmem>>, vector<2x10xf32>,
    return
  }
}

</mosaic_0001>

<bundles_post_ra>
// kernel: c_lenet_pcnn_forward.3
= control target key start
LH: loop header
LB: loop body
LE: loop exit
PB: predicated region body
PF: predicated region fallthrough
CT: control target
= control target key end

     0   :  { %vm736_vm0 = vcmask 408576   ;;  %vm1031_vm1 = vcmask 1040384   ;;  %vm2048_vm2 = vcmask 130048   ;;  %s4283_s1 = inlined_call_operand.vmem [shape: bf16[50,16], index: 1, kind: input, shape index: {}]   ;;  %s4284_s0 = inlined_call_operand.vmem [shape: bf16[1568,50], index: 0, kind: input, shape index: {}]   ;;  %s4285_s2 = inlined_call_operand.vmem [shape: f32[1,16], index: 2, kind: input, shape index: {}]   ;;  %s4286_s3 = inlined_call_operand.vmem [shape: f32[1568,16], index: 3, kind: output, shape index: {}]  }
   0x1   :  { %v2766_v0 = vld [vmem:[%s4283_s1] sm:$0xff]   ;;  %v2767_v1 = vld [vmem:[%s4283_s1 + $0x8] sm:$0xff]   ;;  %v2768_v2 = vld [vmem:[%s4283_s1 + $0x10] sm:$0xff]  }
   0x2   :  { %2552 = vmatprep.subr.bf16.mxu0 %v2766_v0  ;;  %2756 = vmatprep.subr.bf16.mxu1 %v2766_v0  ;;  %v2770_v3 = vld [vmem:[%s4284_s0] sm:$0xff]   ;;  %v2769_v4 = vld [vmem:[%s4283_s1 + $0x18] ss:$0 sps:$4 sm:$0x11]   ;;  %v2772_v5 = vld [vmem:[%s4284_s0 + $0x190] sm:$0xff]  }
   0x3   :  { %2553 = vmatpush3.bf16.msra.mxu0 %v2766_v0  ;;  %2760 = vmatpush3.bf16.msra.mxu1 %v2766_v0  ;;  %v1033_v6 = vsel %vm1031_vm1, %v2769_v4, 0  ;;  %v2771_v7 = vld [vmem:[%s4284_s0 + $0x8] sm:$0xff]   ;;  %v2773_v8 = vld [vmem:[%s4284_s0 + $0x198] sm:$0xff]   ;;  %v2774_v9 = vld [vmem:[%s4284_s0 + $0x10] sm:$0xff]  }
   0x4   :  { %2554 = vmatprep.subr.bf16.mxu0 %v2767_v1  ;;  %2757 = vmatprep.subr.bf16.mxu1 %v2767_v1  ;;  %v2776_v10 = vld [vmem:[%s4284_s0 + $0x1a0] sm:$0xff]   ;;  %v2775_v11 = vld [vmem:[%s4284_s0 + $0x18] sm:$0xff]   ;;  %v2777_v12 = vld [vmem:[%s4284_s0 + $0x1a8] sm:$0xff]  }
   0x5   :  { %2560 = vmatprep.mubr.msk.bf16.mxu0 %vm736_vm0, %v2770_v3  ;;  %2660 = vmatprep.mubr.msk.bf16.mxu1 %vm736_vm0, %v2772_v5  ;;  %v2778_v13 = vld [vmem:[%s4284_s0 + $0x20] sm:$0xff]   ;;  %v2780_v14 = vld [vmem:[%s4284_s0 + $0x1b0] sm:$0xff]   ;;  %v2779_v15 = vld [vmem:[%s4284_s0 + $0x28] sm:$0xff]  }
   0x6   :  { %v2781_v16 = vld [vmem:[%s4284_s0 + $0x1b8] sm:$0xff]   ;;  %v2782_v17 = vld [vmem:[%s4284_s0 + $0x30] sm:$0xff]   ;;  %v2784_v18 = vld [vmem:[%s4284_s0 + $0x1c0] sm:$0xff]  }
   0x7   :  { %2555 = vmatpush3.bf16.msra.mxu0 %v2767_v1  ;;  %2761 = vmatpush3.bf16.msra.mxu1 %v2767_v1  ;;  %v2783_v19 = vld [vmem:[%s4284_s0 + $0x38] sm:$0xff]   ;;  %v2785_v20 = vld [vmem:[%s4284_s0 + $0x1c8] sm:$0xff]   ;;  %v2786_v21 = vld [vmem:[%s4284_s0 + $0x40] sm:$0xff]  }
   0x8   :  { %2556 = vmatprep.subr.bf16.mxu0 %v2768_v2  ;;  %2758 = vmatprep.subr.bf16.mxu1 %v2768_v2  ;;  %v2788_v22 = vld [vmem:[%s4284_s0 + $0x1d0] sm:$0xff]   ;;  %v2787_v23 = vld [vmem:[%s4284_s0 + $0x48] sm:$0xff]   ;;  %v2789_v24 = vld [vmem:[%s4284_s0 + $0x1d8] sm:$0xff]  }
   0x9   :  { %v2790_v25 = vld [vmem:[%s4284_s0 + $0x50] sm:$0xff]   ;;  %v2792_v26 = vld [vmem:[%s4284_s0 + $0x1e0] sm:$0xff]   ;;  %v2791_v27 = vld [vmem:[%s4284_s0 + $0x58] sm:$0xff]  }
   0xa   :  { %v2793_v28 = vld [vmem:[%s4284_s0 + $0x1e8] sm:$0xff]   ;;  %v2794_v29 = vld [vmem:[%s4284_s0 + $0x60] sm:$0xff]   ;;  %v2796_v30 = vld [vmem:[%s4284_s0 + $0x1f0] sm:$0xff]  }
   0xb   :  { %2557 = vmatpush3.bf16.msra.mxu0 %v2768_v2  ;;  %2762 = vmatpush3.bf16.msra.mxu1 %v2768_v2  ;;  %v2795_v31 = vld [vmem:[%s4284_s0 + $0x68] sm:$0xff]   ;;  %v2797_v32 = vld [vmem:[%s4284_s0 + $0x1f8] sm:$0xff]   ;;  %v2798_v33 = vld [vmem:[%s4284_s0 + $0x70] sm:$0xff]  }
   0xc   :  { %2764 = vmatprep.subr.msk.bf16.mxu0 %vm1031_vm1, %v2769_v4  ;;  %2765 = vmatprep.subr.msk.bf16.mxu1 %vm1031_vm1, %v2769_v4  ;;  %v2800_v34 = vld [vmem:[%s4284_s0 + $0x200] sm:$0xff]   ;;  %v2799_v35 = vld [vmem:[%s4284_s0 + $0x78] sm:$0xff]   ;;  %v2801_v36 = vld [vmem:[%s4284_s0 + $0x208] sm:$0xff]  }
   0xd   :  { %v2802_v37 = vld [vmem:[%s4284_s0 + $0x80] sm:$0xff]   ;;  %v2804_v38 = vld [vmem:[%s4284_s0 + $0x210] sm:$0xff]   ;;  %v2803_v39 = vld [vmem:[%s4284_s0 + $0x88] sm:$0xff]  }
   0xe   :  { %v2805_v40 = vld [vmem:[%s4284_s0 + $0x218] sm:$0xff]   ;;  %v2806_v41 = vld [vmem:[%s4284_s0 + $0x90] sm:$0xff]   ;;  %v2808_v42 = vld [vmem:[%s4284_s0 + $0x220] sm:$0xff]  }
   0xf   :  { %2559 = vmatpush3.bf16.msra.mxu0 %v1033_v6  ;;  %2763 = vmatpush3.bf16.msra.mxu1 %v1033_v6  ;;  %v2807_v43 = vld [vmem:[%s4284_s0 + $0x98] sm:$0xff]   ;;  %v2809_v44 = vld [vmem:[%s4284_s0 + $0x228] sm:$0xff]   ;;  %v2810_v45 = vld [vmem:[%s4284_s0 + $0xa0] sm:$0xff]  }
  0x10   :  { %v2812_v46 = vld [vmem:[%s4284_s0 + $0x230] sm:$0xff]   ;;  %v2811_v47 = vld [vmem:[%s4284_s0 + $0xa8] sm:$0xff]   ;;  %v2813_v48 = vld [vmem:[%s4284_s0 + $0x238] sm:$0xff]  }
  0x11   :  { %v2814_v49 = vld [vmem:[%s4284_s0 + $0xb0] sm:$0xff]   ;;  %v2816_v50 = vld [vmem:[%s4284_s0 + $0x240] sm:$0xff]   ;;  %v2815_v51 = vld [vmem:[%s4284_s0 + $0xb8] sm:$0xff]  }
  0x12   :  { %2561 = vmatmul.mubr.msk.bf16.vlgmr.msra.gmra.mrb[0].mxu0 %vm736_vm0, %v2771_v7  ;;  %2661 = vmatmul.mubr.msk.bf16.vlgmr.msra.gmra.mrb[0].mxu1 %vm736_vm0, %v2773_v8  ;;  %v2817_v52 = vld [vmem:[%s4284_s0 + $0x248] sm:$0xff]   ;;  %v2818_v53 = vld [vmem:[%s4284_s0 + $0xc0] sm:$0xff]   ;;  %v2820_v54 = vld [vmem:[%s4284_s0 + $0x250] sm:$0xff]  }
  0x13   :  { %2564 = vmatprep.mubr.msk.bf16.mxu0 %vm736_vm0, %v2774_v9  ;;  %2664 = vmatprep.mubr.msk.bf16.mxu1 %vm736_vm0, %v2776_v10  ;;  %v2819_v55 = vld [vmem:[%s4284_s0 + $0xc8] sm:$0xff]   ;;  %v2821_v56 = vld [vmem:[%s4284_s0 + $0x258] sm:$0xff]   ;;  %v2822_v57 = vld [vmem:[%s4284_s0 + $0xd0] sm:$0xff]  }
  0x14   :  { %v2824_v58 = vld [vmem:[%s4284_s0 + $0x260] sm:$0xff]   ;;  %v2823_v59 = vld [vmem:[%s4284_s0 + $0xd8] sm:$0xff]   ;;  %v2825_v60 = vld [vmem:[%s4284_s0 + $0x268] sm:$0xff]  }
  0x15   :  { %v2826_v61 = vld [vmem:[%s4284_s0 + $0xe0] sm:$0xff]   ;;  %v2828_v62 = vld [vmem:[%s4284_s0 + $0x270] sm:$0xff]   ;;  %v2827_v63 = vld [vmem:[%s4284_s0 + $0xe8] sm:$0xff]  }
  0x16   :  { %v2829_v0 = vld [vmem:[%s4284_s0 + $0x278] sm:$0xff]   ;;  %v2830_v1 = vld [vmem:[%s4284_s0 + $0xf0] sm:$0xff]   ;;  %v2832_v2 = vld [vmem:[%s4284_s0 + $0x280] sm:$0xff]  }
  0x17   :  { %v2831_v3 = vld [vmem:[%s4284_s0 + $0xf8] sm:$0xff]   ;;  %v2833_v4 = vld [vmem:[%s4284_s0 + $0x288] sm:$0xff]   ;;  %v2834_v5 = vld [vmem:[%s4284_s0 + $0x100] sm:$0xff]  }
  0x18   :  { %v2836_v6 = vld [vmem:[%s4284_s0 + $0x290] sm:$0xff]   ;;  %v2835_v7 = vld [vmem:[%s4284_s0 + $0x108] sm:$0xff]   ;;  %v2837_v8 = vld [vmem:[%s4284_s0 + $0x298] sm:$0xff]  }
  0x19   :  { %v2838_v9 = vld [vmem:[%s4284_s0 + $0x110] sm:$0xff]   ;;  %v2840_v10 = vld [vmem:[%s4284_s0 + $0x2a0] sm:$0xff]  }
  0x1a   :  { %2565 = vmatmul.mubr.msk.bf16.gmra.mrb[4].mxu0 %vm736_vm0, %v2775_v11  ;;  %2665 = vmatmul.mubr.msk.bf16.gmra.mrb[4].mxu1 %vm736_vm0, %v2777_v12  ;;  %v2839_v11 = vld [vmem:[%s4284_s0 + $0x118] sm:$0xff]   ;;  %v2841_v12 = vld [vmem:[%s4284_s0 + $0x2a8] sm:$0xff]  }
  0x1b   :  { %2568 = vmatprep.mubr.msk.bf16.mxu0 %vm736_vm0, %v2778_v13  ;;  %2668 = vmatprep.mubr.msk.bf16.mxu1 %vm736_vm0, %v2780_v14  ;;  %v2842_v13 = vld [vmem:[%s4284_s0 + $0x120] sm:$0xff]   ;;  %v2844_v14 = vld [vmem:[%s4284_s0 + $0x2b0] sm:$0xff]  }
  0x22   :  { %2569 = vmatmul.mubr.msk.bf16.gmra.mrb[8].mxu0 %vm736_vm0, %v2779_v15  ;;  %2669 = vmatmul.mubr.msk.bf16.gmra.mrb[8].mxu1 %vm736_vm0, %v2781_v16  ;;  %v2843_v15 = vld [vmem:[%s4284_s0 + $0x128] sm:$0xff]   ;;  %v2845_v16 = vld [vmem:[%s4284_s0 + $0x2b8] sm:$0xff]  }
  0x23   :  { %2572 = vmatprep.mubr.msk.bf16.mxu0 %vm736_vm0, %v2782_v17  ;;  %2672 = vmatprep.mubr.msk.bf16.mxu1 %vm736_vm0, %v2784_v18  ;;  %v2846_v17 = vld [vmem:[%s4284_s0 + $0x130] sm:$0xff]   ;;  %v2848_v18 = vld [vmem:[%s4284_s0 + $0x2c0] sm:$0xff]  }
  0x2a   :  { %2573 = vmatmul.mubr.msk.bf16.gmra.mrb[12].mxu0 %vm736_vm0, %v2783_v19  ;;  %2673 = vmatmul.mubr.msk.bf16.gmra.mrb[12].mxu1 %vm736_vm0, %v2785_v20  ;;  %v2847_v19 = vld [vmem:[%s4284_s0 + $0x138] sm:$0xff]   ;;  %v2849_v20 = vld [vmem:[%s4284_s0 + $0x2c8] sm:$0xff]  }
  0x2b   :  { %2576 = vmatprep.mubr.msk.bf16.mxu0 %vm736_vm0, %v2786_v21  ;;  %2676 = vmatprep.mubr.msk.bf16.mxu1 %vm736_vm0, %v2788_v22  ;;  %v2850_v21 = vld [vmem:[%s4284_s0 + $0x140] sm:$0xff]   ;;  %v2852_v22 = vld [vmem:[%s4284_s0 + $0x2d0] sm:$0xff]  }
  0x32   :  { %2577 = vmatmul.mubr.msk.bf16.gmra.mrb[16].mxu0 %vm736_vm0, %v2787_v23  ;;  %2677 = vmatmul.mubr.msk.bf16.gmra.mrb[16].mxu1 %vm736_vm0, %v2789_v24  ;;  %v2851_v23 = vld [vmem:[%s4284_s0 + $0x148] sm:$0xff]   ;;  %v2853_v24 = vld [vmem:[%s4284_s0 + $0x2d8] sm:$0xff]  }
  0x33   :  { %2580 = vmatprep.mubr.msk.bf16.mxu0 %vm736_vm0, %v2790_v25  ;;  %2680 = vmatprep.mubr.msk.bf16.mxu1 %vm736_vm0, %v2792_v26  ;;  %v2854_v25 = vld [vmem:[%s4284_s0 + $0x150] sm:$0xff]   ;;  %v2856_v26 = vld [vmem:[%s4284_s0 + $0x2e0] sm:$0xff]  }
  0x3a   :  { %2581 = vmatmul.mubr.msk.bf16.gmra.mrb[20].mxu0 %vm736_vm0, %v2791_v27  ;;  %2681 = vmatmul.mubr.msk.bf16.gmra.mrb[20].mxu1 %vm736_vm0, %v2793_v28  ;;  %v2855_v27 = vld [vmem:[%s4284_s0 + $0x158] sm:$0xff]   ;;  %v2857_v28 = vld [vmem:[%s4284_s0 + $0x2e8] sm:$0xff]  }
  0x3b   :  { %2584 = vmatprep.mubr.msk.bf16.mxu0 %vm736_vm0, %v2794_v29  ;;  %2684 = vmatprep.mubr.msk.bf16.mxu1 %vm736_vm0, %v2796_v30  ;;  %v2858_v29 = vld [vmem:[%s4284_s0 + $0x160] sm:$0xff]   ;;  %v2860_v30 = vld [vmem:[%s4284_s0 + $0x2f0] sm:$0xff]  }
  0x42   :  { %2585 = vmatmul.mubr.msk.bf16.gmra.mrb[24].mxu0 %vm736_vm0, %v2795_v31  ;;  %2685 = vmatmul.mubr.msk.bf16.gmra.mrb[24].mxu1 %vm736_vm0, %v2797_v32  ;;  %v2859_v31 = vld [vmem:[%s4284_s0 + $0x168] sm:$0xff]   ;;  %v2861_v32 = vld [vmem:[%s4284_s0 + $0x2f8] sm:$0xff]  }
  0x43   :  { %2588 = vmatprep.mubr.msk.bf16.mxu0 %vm736_vm0, %v2798_v33  ;;  %2688 = vmatprep.mubr.msk.bf16.mxu1 %vm736_vm0, %v2800_v34  ;;  %v2862_v33 = vld [vmem:[%s4284_s0 + $0x170] sm:$0xff]   ;;  %v2864_v34 = vld [vmem:[%s4284_s0 + $0x300] sm:$0xff]  }
  0x4a   :  { %2589 = vmatmul.mubr.msk.bf16.gmra.mrb[28].mxu0 %vm736_vm0, %v2799_v35  ;;  %2689 = vmatmul.mubr.msk.bf16.gmra.mrb[28].mxu1 %vm736_vm0, %v2801_v36  ;;  %v2863_v35 = vld [vmem:[%s4284_s0 + $0x178] sm:$0xff]   ;;  %v2865_v36 = vld [vmem:[%s4284_s0 + $0x308] sm:$0xff]  }
  0x4b   :  { %2592 = vmatprep.mubr.msk.bf16.mxu0 %vm736_vm0, %v2802_v37  ;;  %2692 = vmatprep.mubr.msk.bf16.mxu1 %vm736_vm0, %v2804_v38  ;;  %v2866_v37 = vld [vmem:[%s4284_s0 + $0x180] sm:$0xff]   ;;  %v2867_v38 = vld [vmem:[%s4284_s0 + $0x188] sm:$0xff]  }
  0x52   :  { %2593 = vmatmul.mubr.msk.bf16.gmra.mrb[32].mxu0 %vm736_vm0, %v2803_v39  ;;  %2693 = vmatmul.mubr.msk.bf16.gmra.mrb[32].mxu1 %vm736_vm0, %v2805_v40  ;;  %v3296_v39 = vld [vmem:[%s4285_s2] ss:$0 sm:$0xff] }
  0x53   :  { %2596 = vmatprep.mubr.msk.bf16.mxu0 %vm736_vm0, %v2806_v41  ;;  %2696 = vmatprep.mubr.msk.bf16.mxu1 %vm736_vm0, %v2808_v42 }
  0x5a   :  { %2597 = vmatmul.mubr.msk.bf16.gmra.mrb[36].mxu0 %vm736_vm0, %v2807_v43  ;;  %2697 = vmatmul.mubr.msk.bf16.gmra.mrb[36].mxu1 %vm736_vm0, %v2809_v44 }
  0x5b   :  { %2600 = vmatprep.mubr.msk.bf16.mxu0 %vm736_vm0, %v2810_v45  ;;  %2700 = vmatprep.mubr.msk.bf16.mxu1 %vm736_vm0, %v2812_v46 }
  0x62   :  { %2601 = vmatmul.mubr.msk.bf16.gmra.mrb[40].mxu0 %vm736_vm0, %v2811_v47  ;;  %2701 = vmatmul.mubr.msk.bf16.gmra.mrb[40].mxu1 %vm736_vm0, %v2813_v48 }
  0x63   :  { %2604 = vmatprep.mubr.msk.bf16.mxu0 %vm736_vm0, %v2814_v49  ;;  %2704 = vmatprep.mubr.msk.bf16.mxu1 %vm736_vm0, %v2816_v50 }
  0x6a   :  { %2605 = vmatmul.mubr.msk.bf16.gmra.mrb[44].mxu0 %vm736_vm0, %v2815_v51  ;;  %2705 = vmatmul.mubr.msk.bf16.gmra.mrb[44].mxu1 %vm736_vm0, %v2817_v52 }
  0x6b   :  { %2608 = vmatprep.mubr.msk.bf16.mxu0 %vm736_vm0, %v2818_v53  ;;  %2708 = vmatprep.mubr.msk.bf16.mxu1 %vm736_vm0, %v2820_v54 }
  0x72   :  { %2609 = vmatmul.mubr.msk.bf16.gmra.mrb[48].mxu0 %vm736_vm0, %v2819_v55  ;;  %2709 = vmatmul.mubr.msk.bf16.gmra.mrb[48].mxu1 %vm736_vm0, %v2821_v56 }
  0x73   :  { %2612 = vmatprep.mubr.msk.bf16.mxu0 %vm736_vm0, %v2822_v57  ;;  %2712 = vmatprep.mubr.msk.bf16.mxu1 %vm736_vm0, %v2824_v58 }
  0x7a   :  { %2613 = vmatmul.mubr.msk.bf16.gmra.mrb[52].mxu0 %vm736_vm0, %v2823_v59  ;;  %2713 = vmatmul.mubr.msk.bf16.gmra.mrb[52].mxu1 %vm736_vm0, %v2825_v60 }
  0x7b   :  { %2616 = vmatprep.mubr.msk.bf16.mxu0 %vm736_vm0, %v2826_v61  ;;  %2716 = vmatprep.mubr.msk.bf16.mxu1 %vm736_vm0, %v2828_v62 }
  0x82   :  { %2617 = vmatmul.mubr.msk.bf16.gmra.mrb[56].mxu0 %vm736_vm0, %v2827_v63  ;;  %2717 = vmatmul.mubr.msk.bf16.gmra.mrb[56].mxu1 %vm736_vm0, %v2829_v0 }
  0x83   :  { %2620 = vmatprep.mubr.msk.bf16.mxu0 %vm736_vm0, %v2830_v1  ;;  %2720 = vmatprep.mubr.msk.bf16.mxu1 %vm736_vm0, %v2832_v2 }
  0x8a   :  { %2621 = vmatmul.mubr.msk.bf16.gmra.mrb[60].mxu0 %vm736_vm0, %v2831_v3  ;;  %2721 = vmatmul.mubr.msk.bf16.gmra.mrb[60].mxu1 %vm736_vm0, %v2833_v4 }
  0x8b   :  { %2624 = vmatprep.mubr.msk.bf16.mxu0 %vm736_vm0, %v2834_v5  ;;  %2724 = vmatprep.mubr.msk.bf16.mxu1 %vm736_vm0, %v2836_v6 }
  0x92   :  { %2625 = vmatmul.mubr.msk.bf16.gmra.mrb[64].mxu0 %vm736_vm0, %v2835_v7  ;;  %2725 = vmatmul.mubr.msk.bf16.gmra.mrb[64].mxu1 %vm736_vm0, %v2837_v8 }
  0x93   :  { %2628 = vmatprep.mubr.msk.bf16.mxu0 %vm736_vm0, %v2838_v9  ;;  %2728 = vmatprep.mubr.msk.bf16.mxu1 %vm736_vm0, %v2840_v10 }
  0x9a   :  { %2629 = vmatmul.mubr.msk.bf16.gmra.mrb[68].mxu0 %vm736_vm0, %v2839_v11  ;;  %2729 = vmatmul.mubr.msk.bf16.gmra.mrb[68].mxu1 %vm736_vm0, %v2841_v12 }
  0x9b   :  { %2632 = vmatprep.mubr.msk.bf16.mxu0 %vm736_vm0, %v2842_v13  ;;  %2732 = vmatprep.mubr.msk.bf16.mxu1 %vm736_vm0, %v2844_v14 }
  0xa2   :  { %2633 = vmatmul.mubr.msk.bf16.gmra.mrb[72].mxu0 %vm736_vm0, %v2843_v15  ;;  %2733 = vmatmul.mubr.msk.bf16.gmra.mrb[72].mxu1 %vm736_vm0, %v2845_v16 }
  0xa3   :  { %2636 = vmatprep.mubr.msk.bf16.mxu0 %vm736_vm0, %v2846_v17  ;;  %2736 = vmatprep.mubr.msk.bf16.mxu1 %vm736_vm0, %v2848_v18 }
  0xaa   :  { %2637 = vmatmul.mubr.msk.bf16.gmra.mrb[76].mxu0 %vm736_vm0, %v2847_v19  ;;  %2737 = vmatmul.mubr.msk.bf16.gmra.mrb[76].mxu1 %vm736_vm0, %v2849_v20 }
  0xab   :  { %2640 = vmatprep.mubr.msk.bf16.mxu0 %vm736_vm0, %v2850_v21  ;;  %2740 = vmatprep.mubr.msk.bf16.mxu1 %vm736_vm0, %v2852_v22 }
  0xb2   :  { %2641 = vmatmul.mubr.msk.bf16.gmra.mrb[80].mxu0 %vm736_vm0, %v2851_v23  ;;  %2741 = vmatmul.mubr.msk.bf16.gmra.mrb[80].mxu1 %vm736_vm0, %v2853_v24 }
  0xb3   :  { %2644 = vmatprep.mubr.msk.bf16.mxu0 %vm736_vm0, %v2854_v25  ;;  %2744 = vmatprep.mubr.msk.bf16.mxu1 %vm736_vm0, %v2856_v26 }
  0xba   :  { %2645 = vmatmul.mubr.msk.bf16.gmra.mrb[84].mxu0 %vm736_vm0, %v2855_v27  ;;  %2745 = vmatmul.mubr.msk.bf16.gmra.mrb[84].mxu1 %vm736_vm0, %v2857_v28 }
  0xbb   :  { %2648 = vmatprep.mubr.msk.bf16.mxu0 %vm736_vm0, %v2858_v29  ;;  %2748 = vmatprep.mubr.msk.bf16.mxu1 %vm736_vm0, %v2860_v30 }
  0xc2   :  { %2649 = vmatmul.mubr.msk.bf16.gmra.mrb[88].mxu0 %vm736_vm0, %v2859_v31  ;;  %2749 = vmatmul.mubr.msk.bf16.gmra.mrb[88].mxu1 %vm736_vm0, %v2861_v32 }
  0xc3   :  { %2652 = vmatprep.mubr.msk.bf16.mxu0 %vm736_vm0, %v2862_v33  ;;  %2752 = vmatprep.mubr.msk.bf16.mxu1 %vm736_vm0, %v2864_v34 }
  0xca   :  { %2653 = vmatmul.mubr.msk.bf16.gmra.mrb[92].mxu0 %vm736_vm0, %v2863_v35  ;;  %2753 = vmatmul.mubr.msk.bf16.gmra.mrb[92].mxu1 %vm736_vm0, %v2865_v36 }
  0xcb   :  { %2656 = vmatprep.mubr.msk.bf16.mxu0 %vm736_vm0, %v2866_v37 }
  0xd2   :  { %2657 = vmatmul.mubr.msk.bf16.gmra.mrb[96].mxu0 %vm736_vm0, %v2867_v38 }
  0xe5   :  { %v2562_v40 = vpop.f32.mrb[0].mxu0  ;;  %v2662_v41 = vpop.f32.mrb[0].mxu1 }
  0xe6   :  { %v1078_v42 = vadd.f32 %v2562_v40, %v3296_v39  ;;  %v1069_v43 = vpop.f32.mrb[1].mxu0  ;;  %v1478_v44 = vadd.f32 %v2662_v41, %v3296_v39  ;;  %v1469_v45 = vpop.f32.mrb[1].mxu1 }
  0xe7   :  { %v1070_v46 = vadd.f32 %v3296_v39, %v1069_v43  ;;  %v2563_v47 = vpop.f32.mrb[2].mxu0  ;;  %v1470_v48 = vadd.f32 %v3296_v39, %v1469_v45  ;;  %v2663_v49 = vpop.f32.mrb[2].mxu1 }
  0xe8   :  { %v1854_v50 = vmax.f32 %v1078_v42, 0.0  ;;  %v1081_v51 = vadd.f32 %v2563_v47, %v3296_v39  ;;  %v1072_v52 = vpop.f32.mrb[3].mxu0  ;;  %v1954_v53 = vmax.f32 %v1478_v44, 0.0  ;;  %v1481_v54 = vadd.f32 %v2663_v49, %v3296_v39  ;;  %v1472_v55 = vpop.f32.mrb[3].mxu1 }
  0xe9   :  { %v1852_v56 = vmax.f32 %v1070_v46, 0.0  ;;  %v1073_v57 = vadd.f32 %v3296_v39, %v1072_v52  ;;  %v1952_v58 = vmax.f32 %v1470_v48, 0.0  ;;  %v1473_v59 = vadd.f32 %v3296_v39, %v1472_v55 }
  0xea   :  { %2051 = vst.msk [vmem:[%s4286_s3 + $0x10] sm:$0xff] %vm2048_vm2, %v1854_v50  ;;  %v1855_v60 = vmax.f32 %v1081_v51, 0.0  ;;  %2151 = vst.msk [vmem:[%s4286_s3 + $0x330] sm:$0xff] %vm2048_vm2, %v1954_v53  ;;  %v1955_v61 = vmax.f32 %v1481_v54, 0.0 }
  0xeb   :  { %2049 = vst.msk [vmem:[%s4286_s3] sm:$0xff] %vm2048_vm2, %v1852_v56  ;;  %v1853_v62 = vmax.f32 %v1073_v57, 0.0  ;;  %2149 = vst.msk [vmem:[%s4286_s3 + $0x320] sm:$0xff] %vm2048_vm2, %v1952_v58  ;;  %v1953_v63 = vmax.f32 %v1473_v59, 0.0 }
  0xec   :  { %2052 = vst.msk [vmem:[%s4286_s3 + $0x18] sm:$0xff] %vm2048_vm2, %v1855_v60  ;;  %2152 = vst.msk [vmem:[%s4286_s3 + $0x338] sm:$0xff] %vm2048_vm2, %v1955_v61 }
  0xed   :  { %2050 = vst.msk [vmem:[%s4286_s3 + $0x8] sm:$0xff] %vm2048_vm2, %v1853_v62  ;;  %v2566_v0 = vpop.f32.mrb[4].mxu0  ;;  %2150 = vst.msk [vmem:[%s4286_s3 + $0x328] sm:$0xff] %vm2048_vm2, %v1953_v63  ;;  %v2666_v1 = vpop.f32.mrb[4].mxu1 }
  0xee   :  { %v1094_v2 = vadd.f32 %v2566_v0, %v3296_v39  ;;  %v1085_v3 = vpop.f32.mrb[5].mxu0  ;;  %v1494_v4 = vadd.f32 %v2666_v1, %v3296_v39  ;;  %v1485_v5 = vpop.f32.mrb[5].mxu1 }
  0xef   :  { %v1086_v6 = vadd.f32 %v3296_v39, %v1085_v3  ;;  %v2567_v7 = vpop.f32.mrb[6].mxu0  ;;  %v1486_v8 = vadd.f32 %v3296_v39, %v1485_v5  ;;  %v2667_v9 = vpop.f32.mrb[6].mxu1 }
  0xf0   :  { %v1858_v10 = vmax.f32 %v1094_v2, 0.0  ;;  %v1097_v11 = vadd.f32 %v2567_v7, %v3296_v39  ;;  %v1088_v12 = vpop.f32.mrb[7].mxu0  ;;  %v1958_v13 = vmax.f32 %v1494_v4, 0.0  ;;  %v1497_v14 = vadd.f32 %v2667_v9, %v3296_v39  ;;  %v1488_v15 = vpop.f32.mrb[7].mxu1 }
  0xf1   :  { %v1856_v16 = vmax.f32 %v1086_v6, 0.0  ;;  %v1089_v17 = vadd.f32 %v3296_v39, %v1088_v12  ;;  %v1956_v18 = vmax.f32 %v1486_v8, 0.0  ;;  %v1489_v19 = vadd.f32 %v3296_v39, %v1488_v15 }
  0xf2   :  { %2055 = vst.msk [vmem:[%s4286_s3 + $0x30] sm:$0xff] %vm2048_vm2, %v1858_v10  ;;  %v1859_v20 = vmax.f32 %v1097_v11, 0.0  ;;  %2155 = vst.msk [vmem:[%s4286_s3 + $0x350] sm:$0xff] %vm2048_vm2, %v1958_v13  ;;  %v1959_v21 = vmax.f32 %v1497_v14, 0.0 }
  0xf3   :  { %2053 = vst.msk [vmem:[%s4286_s3 + $0x20] sm:$0xff] %vm2048_vm2, %v1856_v16  ;;  %v1857_v22 = vmax.f32 %v1089_v17, 0.0  ;;  %2153 = vst.msk [vmem:[%s4286_s3 + $0x340] sm:$0xff] %vm2048_vm2, %v1956_v18  ;;  %v1957_v23 = vmax.f32 %v1489_v19, 0.0 }
  0xf4   :  { %2056 = vst.msk [vmem:[%s4286_s3 + $0x38] sm:$0xff] %vm2048_vm2, %v1859_v20  ;;  %2156 = vst.msk [vmem:[%s4286_s3 + $0x358] sm:$0xff] %vm2048_vm2, %v1959_v21 }
  0xf5   :  { %2054 = vst.msk [vmem:[%s4286_s3 + $0x28] sm:$0xff] %vm2048_vm2, %v1857_v22  ;;  %v2570_v24 = vpop.f32.mrb[8].mxu0  ;;  %2154 = vst.msk [vmem:[%s4286_s3 + $0x348] sm:$0xff] %vm2048_vm2, %v1957_v23  ;;  %v2670_v25 = vpop.f32.mrb[8].mxu1 }
  0xf6   :  { %v1110_v26 = vadd.f32 %v2570_v24, %v3296_v39  ;;  %v1101_v27 = vpop.f32.mrb[9].mxu0  ;;  %v1510_v28 = vadd.f32 %v2670_v25, %v3296_v39  ;;  %v1501_v29 = vpop.f32.mrb[9].mxu1 }
  0xf7   :  { %v1102_v30 = vadd.f32 %v3296_v39, %v1101_v27  ;;  %v2571_v31 = vpop.f32.mrb[10].mxu0  ;;  %v1502_v32 = vadd.f32 %v3296_v39, %v1501_v29  ;;  %v2671_v33 = vpop.f32.mrb[10].mxu1 }
  0xf8   :  { %v1862_v34 = vmax.f32 %v1110_v26, 0.0  ;;  %v1113_v35 = vadd.f32 %v2571_v31, %v3296_v39  ;;  %v1104_v36 = vpop.f32.mrb[11].mxu0  ;;  %v1962_v37 = vmax.f32 %v1510_v28, 0.0  ;;  %v1513_v38 = vadd.f32 %v2671_v33, %v3296_v39  ;;  %v1504_v40 = vpop.f32.mrb[11].mxu1 }
  0xf9   :  { %v1860_v41 = vmax.f32 %v1102_v30, 0.0  ;;  %v1105_v42 = vadd.f32 %v3296_v39, %v1104_v36  ;;  %v1960_v43 = vmax.f32 %v1502_v32, 0.0  ;;  %v1505_v44 = vadd.f32 %v3296_v39, %v1504_v40 }
  0xfa   :  { %2059 = vst.msk [vmem:[%s4286_s3 + $0x50] sm:$0xff] %vm2048_vm2, %v1862_v34  ;;  %v1863_v45 = vmax.f32 %v1113_v35, 0.0  ;;  %2159 = vst.msk [vmem:[%s4286_s3 + $0x370] sm:$0xff] %vm2048_vm2, %v1962_v37  ;;  %v1963_v46 = vmax.f32 %v1513_v38, 0.0 }
  0xfb   :  { %2057 = vst.msk [vmem:[%s4286_s3 + $0x40] sm:$0xff] %vm2048_vm2, %v1860_v41  ;;  %v1861_v47 = vmax.f32 %v1105_v42, 0.0  ;;  %2157 = vst.msk [vmem:[%s4286_s3 + $0x360] sm:$0xff] %vm2048_vm2, %v1960_v43  ;;  %v1961_v48 = vmax.f32 %v1505_v44, 0.0 }
  0xfc   :  { %2060 = vst.msk [vmem:[%s4286_s3 + $0x58] sm:$0xff] %vm2048_vm2, %v1863_v45  ;;  %2160 = vst.msk [vmem:[%s4286_s3 + $0x378] sm:$0xff] %vm2048_vm2, %v1963_v46 }
  0xfd   :  { %2058 = vst.msk [vmem:[%s4286_s3 + $0x48] sm:$0xff] %vm2048_vm2, %v1861_v47  ;;  %v2574_v49 = vpop.f32.mrb[12].mxu0  ;;  %2158 = vst.msk [vmem:[%s4286_s3 + $0x368] sm:$0xff] %vm2048_vm2, %v1961_v48  ;;  %v2674_v50 = vpop.f32.mrb[12].mxu1 }
  0xfe   :  { %v1126_v51 = vadd.f32 %v2574_v49, %v3296_v39  ;;  %v1117_v52 = vpop.f32.mrb[13].mxu0  ;;  %v1526_v53 = vadd.f32 %v2674_v50, %v3296_v39  ;;  %v1517_v54 = vpop.f32.mrb[13].mxu1 }
  0xff   :  { %v1118_v55 = vadd.f32 %v3296_v39, %v1117_v52  ;;  %v2575_v56 = vpop.f32.mrb[14].mxu0  ;;  %v1518_v57 = vadd.f32 %v3296_v39, %v1517_v54  ;;  %v2675_v58 = vpop.f32.mrb[14].mxu1 }
 0x100   :  { %v1866_v59 = vmax.f32 %v1126_v51, 0.0  ;;  %v1129_v60 = vadd.f32 %v2575_v56, %v3296_v39  ;;  %v1120_v61 = vpop.f32.mrb[15].mxu0  ;;  %v1966_v62 = vmax.f32 %v1526_v53, 0.0  ;;  %v1529_v63 = vadd.f32 %v2675_v58, %v3296_v39  ;;  %v1520_v0 = vpop.f32.mrb[15].mxu1 }
 0x101   :  { %v1864_v1 = vmax.f32 %v1118_v55, 0.0  ;;  %v1121_v2 = vadd.f32 %v3296_v39, %v1120_v61  ;;  %v1964_v3 = vmax.f32 %v1518_v57, 0.0  ;;  %v1521_v4 = vadd.f32 %v3296_v39, %v1520_v0 }
 0x102   :  { %2063 = vst.msk [vmem:[%s4286_s3 + $0x70] sm:$0xff] %vm2048_vm2, %v1866_v59  ;;  %v1867_v5 = vmax.f32 %v1129_v60, 0.0  ;;  %2163 = vst.msk [vmem:[%s4286_s3 + $0x390] sm:$0xff] %vm2048_vm2, %v1966_v62  ;;  %v1967_v6 = vmax.f32 %v1529_v63, 0.0 }
 0x103   :  { %2061 = vst.msk [vmem:[%s4286_s3 + $0x60] sm:$0xff] %vm2048_vm2, %v1864_v1  ;;  %v1865_v7 = vmax.f32 %v1121_v2, 0.0  ;;  %2161 = vst.msk [vmem:[%s4286_s3 + $0x380] sm:$0xff] %vm2048_vm2, %v1964_v3  ;;  %v1965_v8 = vmax.f32 %v1521_v4, 0.0 }
 0x104   :  { %2064 = vst.msk [vmem:[%s4286_s3 + $0x78] sm:$0xff] %vm2048_vm2, %v1867_v5  ;;  %2164 = vst.msk [vmem:[%s4286_s3 + $0x398] sm:$0xff] %vm2048_vm2, %v1967_v6 }
 0x105   :  { %2062 = vst.msk [vmem:[%s4286_s3 + $0x68] sm:$0xff] %vm2048_vm2, %v1865_v7  ;;  %v2578_v9 = vpop.f32.mrb[16].mxu0  ;;  %2162 = vst.msk [vmem:[%s4286_s3 + $0x388] sm:$0xff] %vm2048_vm2, %v1965_v8  ;;  %v2678_v10 = vpop.f32.mrb[16].mxu1 }
 0x106   :  { %v1142_v11 = vadd.f32 %v2578_v9, %v3296_v39  ;;  %v1133_v12 = vpop.f32.mrb[17].mxu0  ;;  %v1542_v13 = vadd.f32 %v2678_v10, %v3296_v39  ;;  %v1533_v14 = vpop.f32.mrb[17].mxu1 }
 0x107   :  { %v1134_v15 = vadd.f32 %v3296_v39, %v1133_v12  ;;  %v2579_v16 = vpop.f32.mrb[18].mxu0  ;;  %v1534_v17 = vadd.f32 %v3296_v39, %v1533_v14  ;;  %v2679_v18 = vpop.f32.mrb[18].mxu1 }
 0x108   :  { %v1870_v19 = vmax.f32 %v1142_v11, 0.0  ;;  %v1145_v20 = vadd.f32 %v2579_v16, %v3296_v39  ;;  %v1136_v21 = vpop.f32.mrb[19].mxu0  ;;  %v1970_v22 = vmax.f32 %v1542_v13, 0.0  ;;  %v1545_v23 = vadd.f32 %v2679_v18, %v3296_v39  ;;  %v1536_v24 = vpop.f32.mrb[19].mxu1 }
 0x109   :  { %v1868_v25 = vmax.f32 %v1134_v15, 0.0  ;;  %v1137_v26 = vadd.f32 %v3296_v39, %v1136_v21  ;;  %v1968_v27 = vmax.f32 %v1534_v17, 0.0  ;;  %v1537_v28 = vadd.f32 %v3296_v39, %v1536_v24 }
 0x10a   :  { %2067 = vst.msk [vmem:[%s4286_s3 + $0x90] sm:$0xff] %vm2048_vm2, %v1870_v19  ;;  %v1871_v29 = vmax.f32 %v1145_v20, 0.0  ;;  %2167 = vst.msk [vmem:[%s4286_s3 + $0x3b0] sm:$0xff] %vm2048_vm2, %v1970_v22  ;;  %v1971_v30 = vmax.f32 %v1545_v23, 0.0 }
 0x10b   :  { %2065 = vst.msk [vmem:[%s4286_s3 + $0x80] sm:$0xff] %vm2048_vm2, %v1868_v25  ;;  %v1869_v31 = vmax.f32 %v1137_v26, 0.0  ;;  %2165 = vst.msk [vmem:[%s4286_s3 + $0x3a0] sm:$0xff] %vm2048_vm2, %v1968_v27  ;;  %v1969_v32 = vmax.f32 %v1537_v28, 0.0 }
 0x10c   :  { %2068 = vst.msk [vmem:[%s4286_s3 + $0x98] sm:$0xff] %vm2048_vm2, %v1871_v29  ;;  %2168 = vst.msk [vmem:[%s4286_s3 + $0x3b8] sm:$0xff] %vm2048_vm2, %v1971_v30 }
 0x10d   :  { %2066 = vst.msk [vmem:[%s4286_s3 + $0x88] sm:$0xff] %vm2048_vm2, %v1869_v31  ;;  %v2582_v33 = vpop.f32.mrb[20].mxu0  ;;  %2166 = vst.msk [vmem:[%s4286_s3 + $0x3a8] sm:$0xff] %vm2048_vm2, %v1969_v32  ;;  %v2682_v34 = vpop.f32.mrb[20].mxu1 }
 0x10e   :  { %v1158_v35 = vadd.f32 %v2582_v33, %v3296_v39  ;;  %v1149_v36 = vpop.f32.mrb[21].mxu0  ;;  %v1558_v37 = vadd.f32 %v2682_v34, %v3296_v39  ;;  %v1549_v38 = vpop.f32.mrb[21].mxu1 }
 0x10f   :  { %v1150_v40 = vadd.f32 %v3296_v39, %v1149_v36  ;;  %v2583_v41 = vpop.f32.mrb[22].mxu0  ;;  %v1550_v42 = vadd.f32 %v3296_v39, %v1549_v38  ;;  %v2683_v43 = vpop.f32.mrb[22].mxu1 }
 0x110   :  { %v1874_v44 = vmax.f32 %v1158_v35, 0.0  ;;  %v1161_v45 = vadd.f32 %v2583_v41, %v3296_v39  ;;  %v1152_v46 = vpop.f32.mrb[23].mxu0  ;;  %v1974_v47 = vmax.f32 %v1558_v37, 0.0  ;;  %v1561_v48 = vadd.f32 %v2683_v43, %v3296_v39  ;;  %v1552_v49 = vpop.f32.mrb[23].mxu1 }
 0x111   :  { %v1872_v50 = vmax.f32 %v1150_v40, 0.0  ;;  %v1153_v51 = vadd.f32 %v3296_v39, %v1152_v46  ;;  %v1972_v52 = vmax.f32 %v1550_v42, 0.0  ;;  %v1553_v53 = vadd.f32 %v3296_v39, %v1552_v49 }
 0x112   :  { %2071 = vst.msk [vmem:[%s4286_s3 + $0xb0] sm:$0xff] %vm2048_vm2, %v1874_v44  ;;  %v1875_v54 = vmax.f32 %v1161_v45, 0.0  ;;  %2171 = vst.msk [vmem:[%s4286_s3 + $0x3d0] sm:$0xff] %vm2048_vm2, %v1974_v47  ;;  %v1975_v55 = vmax.f32 %v1561_v48, 0.0 }
 0x113   :  { %2069 = vst.msk [vmem:[%s4286_s3 + $0xa0] sm:$0xff] %vm2048_vm2, %v1872_v50  ;;  %v1873_v56 = vmax.f32 %v1153_v51, 0.0  ;;  %2169 = vst.msk [vmem:[%s4286_s3 + $0x3c0] sm:$0xff] %vm2048_vm2, %v1972_v52  ;;  %v1973_v57 = vmax.f32 %v1553_v53, 0.0 }
 0x114   :  { %2072 = vst.msk [vmem:[%s4286_s3 + $0xb8] sm:$0xff] %vm2048_vm2, %v1875_v54  ;;  %2172 = vst.msk [vmem:[%s4286_s3 + $0x3d8] sm:$0xff] %vm2048_vm2, %v1975_v55 }
 0x115   :  { %2070 = vst.msk [vmem:[%s4286_s3 + $0xa8] sm:$0xff] %vm2048_vm2, %v1873_v56  ;;  %v2586_v58 = vpop.f32.mrb[24].mxu0  ;;  %2170 = vst.msk [vmem:[%s4286_s3 + $0x3c8] sm:$0xff] %vm2048_vm2, %v1973_v57  ;;  %v2686_v59 = vpop.f32.mrb[24].mxu1 }
 0x116   :  { %v1174_v60 = vadd.f32 %v2586_v58, %v3296_v39  ;;  %v1165_v61 = vpop.f32.mrb[25].mxu0  ;;  %v1574_v62 = vadd.f32 %v2686_v59, %v3296_v39  ;;  %v1565_v63 = vpop.f32.mrb[25].mxu1 }
 0x117   :  { %v1166_v0 = vadd.f32 %v3296_v39, %v1165_v61  ;;  %v2587_v1 = vpop.f32.mrb[26].mxu0  ;;  %v1566_v2 = vadd.f32 %v3296_v39, %v1565_v63  ;;  %v2687_v3 = vpop.f32.mrb[26].mxu1 }
 0x118   :  { %v1878_v4 = vmax.f32 %v1174_v60, 0.0  ;;  %v1177_v5 = vadd.f32 %v2587_v1, %v3296_v39  ;;  %v1168_v6 = vpop.f32.mrb[27].mxu0  ;;  %v1978_v7 = vmax.f32 %v1574_v62, 0.0  ;;  %v1577_v8 = vadd.f32 %v2687_v3, %v3296_v39  ;;  %v1568_v9 = vpop.f32.mrb[27].mxu1 }
 0x119   :  { %v1876_v10 = vmax.f32 %v1166_v0, 0.0  ;;  %v1169_v11 = vadd.f32 %v3296_v39, %v1168_v6  ;;  %v1976_v12 = vmax.f32 %v1566_v2, 0.0  ;;  %v1569_v13 = vadd.f32 %v3296_v39, %v1568_v9 }
 0x11a   :  { %2075 = vst.msk [vmem:[%s4286_s3 + $0xd0] sm:$0xff] %vm2048_vm2, %v1878_v4  ;;  %v1879_v14 = vmax.f32 %v1177_v5, 0.0  ;;  %2175 = vst.msk [vmem:[%s4286_s3 + $0x3f0] sm:$0xff] %vm2048_vm2, %v1978_v7  ;;  %v1979_v15 = vmax.f32 %v1577_v8, 0.0 }
 0x11b   :  { %2073 = vst.msk [vmem:[%s4286_s3 + $0xc0] sm:$0xff] %vm2048_vm2, %v1876_v10  ;;  %v1877_v16 = vmax.f32 %v1169_v11, 0.0  ;;  %2173 = vst.msk [vmem:[%s4286_s3 + $0x3e0] sm:$0xff] %vm2048_vm2, %v1976_v12  ;;  %v1977_v17 = vmax.f32 %v1569_v13, 0.0 }
 0x11c   :  { %2076 = vst.msk [vmem:[%s4286_s3 + $0xd8] sm:$0xff] %vm2048_vm2, %v1879_v14  ;;  %2176 = vst.msk [vmem:[%s4286_s3 + $0x3f8] sm:$0xff] %vm2048_vm2, %v1979_v15 }
 0x11d   :  { %2074 = vst.msk [vmem:[%s4286_s3 + $0xc8] sm:$0xff] %vm2048_vm2, %v1877_v16  ;;  %v2590_v18 = vpop.f32.mrb[28].mxu0  ;;  %2174 = vst.msk [vmem:[%s4286_s3 + $0x3e8] sm:$0xff] %vm2048_vm2, %v1977_v17  ;;  %v2690_v19 = vpop.f32.mrb[28].mxu1 }
 0x11e   :  { %v1190_v20 = vadd.f32 %v2590_v18, %v3296_v39  ;;  %v1181_v21 = vpop.f32.mrb[29].mxu0  ;;  %v1590_v22 = vadd.f32 %v2690_v19, %v3296_v39  ;;  %v1581_v23 = vpop.f32.mrb[29].mxu1 }
 0x11f   :  { %v1182_v24 = vadd.f32 %v3296_v39, %v1181_v21  ;;  %v2591_v25 = vpop.f32.mrb[30].mxu0  ;;  %v1582_v26 = vadd.f32 %v3296_v39, %v1581_v23  ;;  %v2691_v27 = vpop.f32.mrb[30].mxu1 }
 0x120   :  { %v1882_v28 = vmax.f32 %v1190_v20, 0.0  ;;  %v1193_v29 = vadd.f32 %v2591_v25, %v3296_v39  ;;  %v1184_v30 = vpop.f32.mrb[31].mxu0  ;;  %v1982_v31 = vmax.f32 %v1590_v22, 0.0  ;;  %v1593_v32 = vadd.f32 %v2691_v27, %v3296_v39  ;;  %v1584_v33 = vpop.f32.mrb[31].mxu1 }
 0x121   :  { %v1880_v34 = vmax.f32 %v1182_v24, 0.0  ;;  %v1185_v35 = vadd.f32 %v3296_v39, %v1184_v30  ;;  %v1980_v36 = vmax.f32 %v1582_v26, 0.0  ;;  %v1585_v37 = vadd.f32 %v3296_v39, %v1584_v33 }
 0x122   :  { %2079 = vst.msk [vmem:[%s4286_s3 + $0xf0] sm:$0xff] %vm2048_vm2, %v1882_v28  ;;  %v1883_v38 = vmax.f32 %v1193_v29, 0.0  ;;  %2179 = vst.msk [vmem:[%s4286_s3 + $0x410] sm:$0xff] %vm2048_vm2, %v1982_v31  ;;  %v1983_v40 = vmax.f32 %v1593_v32, 0.0 }
 0x123   :  { %2077 = vst.msk [vmem:[%s4286_s3 + $0xe0] sm:$0xff] %vm2048_vm2, %v1880_v34  ;;  %v1881_v41 = vmax.f32 %v1185_v35, 0.0  ;;  %2177 = vst.msk [vmem:[%s4286_s3 + $0x400] sm:$0xff] %vm2048_vm2, %v1980_v36  ;;  %v1981_v42 = vmax.f32 %v1585_v37, 0.0 }
 0x124   :  { %2080 = vst.msk [vmem:[%s4286_s3 + $0xf8] sm:$0xff] %vm2048_vm2, %v1883_v38  ;;  %2180 = vst.msk [vmem:[%s4286_s3 + $0x418] sm:$0xff] %vm2048_vm2, %v1983_v40 }
 0x125   :  { %2078 = vst.msk [vmem:[%s4286_s3 + $0xe8] sm:$0xff] %vm2048_vm2, %v1881_v41  ;;  %v2594_v43 = vpop.f32.mrb[32].mxu0  ;;  %2178 = vst.msk [vmem:[%s4286_s3 + $0x408] sm:$0xff] %vm2048_vm2, %v1981_v42  ;;  %v2694_v44 = vpop.f32.mrb[32].mxu1 }
 0x126   :  { %v1206_v45 = vadd.f32 %v2594_v43, %v3296_v39  ;;  %v1197_v46 = vpop.f32.mrb[33].mxu0  ;;  %v1606_v47 = vadd.f32 %v2694_v44, %v3296_v39  ;;  %v1597_v48 = vpop.f32.mrb[33].mxu1 }
 0x127   :  { %v1198_v49 = vadd.f32 %v3296_v39, %v1197_v46  ;;  %v2595_v50 = vpop.f32.mrb[34].mxu0  ;;  %v1598_v51 = vadd.f32 %v3296_v39, %v1597_v48  ;;  %v2695_v52 = vpop.f32.mrb[34].mxu1 }
 0x128   :  { %v1886_v53 = vmax.f32 %v1206_v45, 0.0  ;;  %v1209_v54 = vadd.f32 %v2595_v50, %v3296_v39  ;;  %v1200_v55 = vpop.f32.mrb[35].mxu0  ;;  %v1986_v56 = vmax.f32 %v1606_v47, 0.0  ;;  %v1609_v57 = vadd.f32 %v2695_v52, %v3296_v39  ;;  %v1600_v58 = vpop.f32.mrb[35].mxu1 }
 0x129   :  { %v1884_v59 = vmax.f32 %v1198_v49, 0.0  ;;  %v1201_v60 = vadd.f32 %v3296_v39, %v1200_v55  ;;  %v1984_v61 = vmax.f32 %v1598_v51, 0.0  ;;  %v1601_v62 = vadd.f32 %v3296_v39, %v1600_v58 }
 0x12a   :  { %2083 = vst.msk [vmem:[%s4286_s3 + $0x110] sm:$0xff] %vm2048_vm2, %v1886_v53  ;;  %v1887_v63 = vmax.f32 %v1209_v54, 0.0  ;;  %2183 = vst.msk [vmem:[%s4286_s3 + $0x430] sm:$0xff] %vm2048_vm2, %v1986_v56  ;;  %v1987_v0 = vmax.f32 %v1609_v57, 0.0 }
 0x12b   :  { %2081 = vst.msk [vmem:[%s4286_s3 + $0x100] sm:$0xff] %vm2048_vm2, %v1884_v59  ;;  %v1885_v1 = vmax.f32 %v1201_v60, 0.0  ;;  %2181 = vst.msk [vmem:[%s4286_s3 + $0x420] sm:$0xff] %vm2048_vm2, %v1984_v61  ;;  %v1985_v2 = vmax.f32 %v1601_v62, 0.0 }
 0x12c   :  { %2084 = vst.msk [vmem:[%s4286_s3 + $0x118] sm:$0xff] %vm2048_vm2, %v1887_v63  ;;  %2184 = vst.msk [vmem:[%s4286_s3 + $0x438] sm:$0xff] %vm2048_vm2, %v1987_v0 }
 0x12d   :  { %2082 = vst.msk [vmem:[%s4286_s3 + $0x108] sm:$0xff] %vm2048_vm2, %v1885_v1  ;;  %v2598_v3 = vpop.f32.mrb[36].mxu0  ;;  %2182 = vst.msk [vmem:[%s4286_s3 + $0x428] sm:$0xff] %vm2048_vm2, %v1985_v2  ;;  %v2698_v4 = vpop.f32.mrb[36].mxu1 }
 0x12e   :  { %v1222_v5 = vadd.f32 %v2598_v3, %v3296_v39  ;;  %v1213_v6 = vpop.f32.mrb[37].mxu0  ;;  %v1622_v7 = vadd.f32 %v2698_v4, %v3296_v39  ;;  %v1613_v8 = vpop.f32.mrb[37].mxu1 }
 0x12f   :  { %v1214_v9 = vadd.f32 %v3296_v39, %v1213_v6  ;;  %v2599_v10 = vpop.f32.mrb[38].mxu0  ;;  %v1614_v11 = vadd.f32 %v3296_v39, %v1613_v8  ;;  %v2699_v12 = vpop.f32.mrb[38].mxu1 }
 0x130   :  { %v1890_v13 = vmax.f32 %v1222_v5, 0.0  ;;  %v1225_v14 = vadd.f32 %v2599_v10, %v3296_v39  ;;  %v1216_v15 = vpop.f32.mrb[39].mxu0  ;;  %v1990_v16 = vmax.f32 %v1622_v7, 0.0  ;;  %v1625_v17 = vadd.f32 %v2699_v12, %v3296_v39  ;;  %v1616_v18 = vpop.f32.mrb[39].mxu1 }
 0x131   :  { %v1888_v19 = vmax.f32 %v1214_v9, 0.0  ;;  %v1217_v20 = vadd.f32 %v3296_v39, %v1216_v15  ;;  %v1988_v21 = vmax.f32 %v1614_v11, 0.0  ;;  %v1617_v22 = vadd.f32 %v3296_v39, %v1616_v18 }
 0x132   :  { %2087 = vst.msk [vmem:[%s4286_s3 + $0x130] sm:$0xff] %vm2048_vm2, %v1890_v13  ;;  %v1891_v23 = vmax.f32 %v1225_v14, 0.0  ;;  %2187 = vst.msk [vmem:[%s4286_s3 + $0x450] sm:$0xff] %vm2048_vm2, %v1990_v16  ;;  %v1991_v24 = vmax.f32 %v1625_v17, 0.0 }
 0x133   :  { %2085 = vst.msk [vmem:[%s4286_s3 + $0x120] sm:$0xff] %vm2048_vm2, %v1888_v19  ;;  %v1889_v25 = vmax.f32 %v1217_v20, 0.0  ;;  %2185 = vst.msk [vmem:[%s4286_s3 + $0x440] sm:$0xff] %vm2048_vm2, %v1988_v21  ;;  %v1989_v26 = vmax.f32 %v1617_v22, 0.0 }
 0x134   :  { %2088 = vst.msk [vmem:[%s4286_s3 + $0x138] sm:$0xff] %vm2048_vm2, %v1891_v23  ;;  %2188 = vst.msk [vmem:[%s4286_s3 + $0x458] sm:$0xff] %vm2048_vm2, %v1991_v24 }
 0x135   :  { %2086 = vst.msk [vmem:[%s4286_s3 + $0x128] sm:$0xff] %vm2048_vm2, %v1889_v25  ;;  %v2602_v27 = vpop.f32.mrb[40].mxu0  ;;  %2186 = vst.msk [vmem:[%s4286_s3 + $0x448] sm:$0xff] %vm2048_vm2, %v1989_v26  ;;  %v2702_v28 = vpop.f32.mrb[40].mxu1 }
 0x136   :  { %v1238_v29 = vadd.f32 %v2602_v27, %v3296_v39  ;;  %v1229_v30 = vpop.f32.mrb[41].mxu0  ;;  %v1638_v31 = vadd.f32 %v2702_v28, %v3296_v39  ;;  %v1629_v32 = vpop.f32.mrb[41].mxu1 }
 0x137   :  { %v1230_v33 = vadd.f32 %v3296_v39, %v1229_v30  ;;  %v2603_v34 = vpop.f32.mrb[42].mxu0  ;;  %v1630_v35 = vadd.f32 %v3296_v39, %v1629_v32  ;;  %v2703_v36 = vpop.f32.mrb[42].mxu1 }
 0x138   :  { %v1894_v37 = vmax.f32 %v1238_v29, 0.0  ;;  %v1241_v38 = vadd.f32 %v2603_v34, %v3296_v39  ;;  %v1232_v40 = vpop.f32.mrb[43].mxu0  ;;  %v1994_v41 = vmax.f32 %v1638_v31, 0.0  ;;  %v1641_v42 = vadd.f32 %v2703_v36, %v3296_v39  ;;  %v1632_v43 = vpop.f32.mrb[43].mxu1 }
 0x139   :  { %v1892_v44 = vmax.f32 %v1230_v33, 0.0  ;;  %v1233_v45 = vadd.f32 %v3296_v39, %v1232_v40  ;;  %v1992_v46 = vmax.f32 %v1630_v35, 0.0  ;;  %v1633_v47 = vadd.f32 %v3296_v39, %v1632_v43 }
 0x13a   :  { %2091 = vst.msk [vmem:[%s4286_s3 + $0x150] sm:$0xff] %vm2048_vm2, %v1894_v37  ;;  %v1895_v48 = vmax.f32 %v1241_v38, 0.0  ;;  %2191 = vst.msk [vmem:[%s4286_s3 + $0x470] sm:$0xff] %vm2048_vm2, %v1994_v41  ;;  %v1995_v49 = vmax.f32 %v1641_v42, 0.0 }
 0x13b   :  { %2089 = vst.msk [vmem:[%s4286_s3 + $0x140] sm:$0xff] %vm2048_vm2, %v1892_v44  ;;  %v1893_v50 = vmax.f32 %v1233_v45, 0.0  ;;  %2189 = vst.msk [vmem:[%s4286_s3 + $0x460] sm:$0xff] %vm2048_vm2, %v1992_v46  ;;  %v1993_v51 = vmax.f32 %v1633_v47, 0.0 }
 0x13c   :  { %2092 = vst.msk [vmem:[%s4286_s3 + $0x158] sm:$0xff] %vm2048_vm2, %v1895_v48  ;;  %2192 = vst.msk [vmem:[%s4286_s3 + $0x478] sm:$0xff] %vm2048_vm2, %v1995_v49 }
 0x13d   :  { %2090 = vst.msk [vmem:[%s4286_s3 + $0x148] sm:$0xff] %vm2048_vm2, %v1893_v50  ;;  %v2606_v52 = vpop.f32.mrb[44].mxu0  ;;  %2190 = vst.msk [vmem:[%s4286_s3 + $0x468] sm:$0xff] %vm2048_vm2, %v1993_v51  ;;  %v2706_v53 = vpop.f32.mrb[44].mxu1 }
 0x13e   :  { %v1254_v54 = vadd.f32 %v2606_v52, %v3296_v39  ;;  %v1245_v55 = vpop.f32.mrb[45].mxu0  ;;  %v1654_v56 = vadd.f32 %v2706_v53, %v3296_v39  ;;  %v1645_v57 = vpop.f32.mrb[45].mxu1 }
 0x13f   :  { %v1246_v58 = vadd.f32 %v3296_v39, %v1245_v55  ;;  %v2607_v59 = vpop.f32.mrb[46].mxu0  ;;  %v1646_v60 = vadd.f32 %v3296_v39, %v1645_v57  ;;  %v2707_v61 = vpop.f32.mrb[46].mxu1 }
 0x140   :  { %v1898_v62 = vmax.f32 %v1254_v54, 0.0  ;;  %v1257_v63 = vadd.f32 %v2607_v59, %v3296_v39  ;;  %v1248_v0 = vpop.f32.mrb[47].mxu0  ;;  %v1998_v1 = vmax.f32 %v1654_v56, 0.0  ;;  %v1657_v2 = vadd.f32 %v2707_v61, %v3296_v39  ;;  %v1648_v3 = vpop.f32.mrb[47].mxu1 }
 0x141   :  { %v1896_v4 = vmax.f32 %v1246_v58, 0.0  ;;  %v1249_v5 = vadd.f32 %v3296_v39, %v1248_v0  ;;  %v1996_v6 = vmax.f32 %v1646_v60, 0.0  ;;  %v1649_v7 = vadd.f32 %v3296_v39, %v1648_v3 }
 0x142   :  { %2095 = vst.msk [vmem:[%s4286_s3 + $0x170] sm:$0xff] %vm2048_vm2, %v1898_v62  ;;  %v1899_v8 = vmax.f32 %v1257_v63, 0.0  ;;  %2195 = vst.msk [vmem:[%s4286_s3 + $0x490] sm:$0xff] %vm2048_vm2, %v1998_v1  ;;  %v1999_v9 = vmax.f32 %v1657_v2, 0.0 }
 0x143   :  { %2093 = vst.msk [vmem:[%s4286_s3 + $0x160] sm:$0xff] %vm2048_vm2, %v1896_v4  ;;  %v1897_v10 = vmax.f32 %v1249_v5, 0.0  ;;  %2193 = vst.msk [vmem:[%s4286_s3 + $0x480] sm:$0xff] %vm2048_vm2, %v1996_v6  ;;  %v1997_v11 = vmax.f32 %v1649_v7, 0.0 }
 0x144   :  { %2096 = vst.msk [vmem:[%s4286_s3 + $0x178] sm:$0xff] %vm2048_vm2, %v1899_v8  ;;  %2196 = vst.msk [vmem:[%s4286_s3 + $0x498] sm:$0xff] %vm2048_vm2, %v1999_v9 }
 0x145   :  { %2094 = vst.msk [vmem:[%s4286_s3 + $0x168] sm:$0xff] %vm2048_vm2, %v1897_v10  ;;  %v2610_v12 = vpop.f32.mrb[48].mxu0  ;;  %2194 = vst.msk [vmem:[%s4286_s3 + $0x488] sm:$0xff] %vm2048_vm2, %v1997_v11  ;;  %v2710_v13 = vpop.f32.mrb[48].mxu1 }
 0x146   :  { %v1270_v14 = vadd.f32 %v2610_v12, %v3296_v39  ;;  %v1261_v15 = vpop.f32.mrb[49].mxu0  ;;  %v1670_v16 = vadd.f32 %v2710_v13, %v3296_v39  ;;  %v1661_v17 = vpop.f32.mrb[49].mxu1 }
 0x147   :  { %v1262_v18 = vadd.f32 %v3296_v39, %v1261_v15  ;;  %v2611_v19 = vpop.f32.mrb[50].mxu0  ;;  %v1662_v20 = vadd.f32 %v3296_v39, %v1661_v17  ;;  %v2711_v21 = vpop.f32.mrb[50].mxu1 }
 0x148   :  { %v1902_v22 = vmax.f32 %v1270_v14, 0.0  ;;  %v1273_v23 = vadd.f32 %v2611_v19, %v3296_v39  ;;  %v1264_v24 = vpop.f32.mrb[51].mxu0  ;;  %v2002_v25 = vmax.f32 %v1670_v16, 0.0  ;;  %v1673_v26 = vadd.f32 %v2711_v21, %v3296_v39  ;;  %v1664_v27 = vpop.f32.mrb[51].mxu1 }
 0x149   :  { %v1900_v28 = vmax.f32 %v1262_v18, 0.0  ;;  %v1265_v29 = vadd.f32 %v3296_v39, %v1264_v24  ;;  %v2000_v30 = vmax.f32 %v1662_v20, 0.0  ;;  %v1665_v31 = vadd.f32 %v3296_v39, %v1664_v27 }
 0x14a   :  { %2099 = vst.msk [vmem:[%s4286_s3 + $0x190] sm:$0xff] %vm2048_vm2, %v1902_v22  ;;  %v1903_v32 = vmax.f32 %v1273_v23, 0.0  ;;  %2199 = vst.msk [vmem:[%s4286_s3 + $0x4b0] sm:$0xff] %vm2048_vm2, %v2002_v25  ;;  %v2003_v33 = vmax.f32 %v1673_v26, 0.0 }
 0x14b   :  { %2097 = vst.msk [vmem:[%s4286_s3 + $0x180] sm:$0xff] %vm2048_vm2, %v1900_v28  ;;  %v1901_v34 = vmax.f32 %v1265_v29, 0.0  ;;  %2197 = vst.msk [vmem:[%s4286_s3 + $0x4a0] sm:$0xff] %vm2048_vm2, %v2000_v30  ;;  %v2001_v35 = vmax.f32 %v1665_v31, 0.0 }
 0x14c   :  { %2100 = vst.msk [vmem:[%s4286_s3 + $0x198] sm:$0xff] %vm2048_vm2, %v1903_v32  ;;  %2200 = vst.msk [vmem:[%s4286_s3 + $0x4b8] sm:$0xff] %vm2048_vm2, %v2003_v33 }
 0x14d   :  { %2098 = vst.msk [vmem:[%s4286_s3 + $0x188] sm:$0xff] %vm2048_vm2, %v1901_v34  ;;  %v2614_v36 = vpop.f32.mrb[52].mxu0  ;;  %2198 = vst.msk [vmem:[%s4286_s3 + $0x4a8] sm:$0xff] %vm2048_vm2, %v2001_v35  ;;  %v2714_v37 = vpop.f32.mrb[52].mxu1 }
 0x14e   :  { %v1286_v38 = vadd.f32 %v2614_v36, %v3296_v39  ;;  %v1277_v40 = vpop.f32.mrb[53].mxu0  ;;  %v1686_v41 = vadd.f32 %v2714_v37, %v3296_v39  ;;  %v1677_v42 = vpop.f32.mrb[53].mxu1 }
 0x14f   :  { %v1278_v43 = vadd.f32 %v3296_v39, %v1277_v40  ;;  %v2615_v44 = vpop.f32.mrb[54].mxu0  ;;  %v1678_v45 = vadd.f32 %v3296_v39, %v1677_v42  ;;  %v2715_v46 = vpop.f32.mrb[54].mxu1 }
 0x150   :  { %v1906_v47 = vmax.f32 %v1286_v38, 0.0  ;;  %v1289_v48 = vadd.f32 %v2615_v44, %v3296_v39  ;;  %v1280_v49 = vpop.f32.mrb[55].mxu0  ;;  %v2006_v50 = vmax.f32 %v1686_v41, 0.0  ;;  %v1689_v51 = vadd.f32 %v2715_v46, %v3296_v39  ;;  %v1680_v52 = vpop.f32.mrb[55].mxu1 }
 0x151   :  { %v1904_v53 = vmax.f32 %v1278_v43, 0.0  ;;  %v1281_v54 = vadd.f32 %v3296_v39, %v1280_v49  ;;  %v2004_v55 = vmax.f32 %v1678_v45, 0.0  ;;  %v1681_v56 = vadd.f32 %v3296_v39, %v1680_v52 }
 0x152   :  { %2103 = vst.msk [vmem:[%s4286_s3 + $0x1b0] sm:$0xff] %vm2048_vm2, %v1906_v47  ;;  %v1907_v57 = vmax.f32 %v1289_v48, 0.0  ;;  %2203 = vst.msk [vmem:[%s4286_s3 + $0x4d0] sm:$0xff] %vm2048_vm2, %v2006_v50  ;;  %v2007_v58 = vmax.f32 %v1689_v51, 0.0  ;;  %v3941_v47 = vld [vmem:[%s4285_s2] ss:$0 sm:$0xff] }
 0x153   :  { %2101 = vst.msk [vmem:[%s4286_s3 + $0x1a0] sm:$0xff] %vm2048_vm2, %v1904_v53  ;;  %v1905_v59 = vmax.f32 %v1281_v54, 0.0  ;;  %2201 = vst.msk [vmem:[%s4286_s3 + $0x4c0] sm:$0xff] %vm2048_vm2, %v2004_v55  ;;  %v2005_v60 = vmax.f32 %v1681_v56, 0.0 }
 0x154   :  { %2104 = vst.msk [vmem:[%s4286_s3 + $0x1b8] sm:$0xff] %vm2048_vm2, %v1907_v57  ;;  %2204 = vst.msk [vmem:[%s4286_s3 + $0x4d8] sm:$0xff] %vm2048_vm2, %v2007_v58 }
 0x155   :  { %2102 = vst.msk [vmem:[%s4286_s3 + $0x1a8] sm:$0xff] %vm2048_vm2, %v1905_v59  ;;  %v2618_v61 = vpop.f32.mrb[56].mxu0  ;;  %2202 = vst.msk [vmem:[%s4286_s3 + $0x4c8] sm:$0xff] %vm2048_vm2, %v2005_v60  ;;  %v2718_v62 = vpop.f32.mrb[56].mxu1 }
 0x156   :  { %v1302_v63 = vadd.f32 %v2618_v61, %v3296_v39  ;;  %v1293_v0 = vpop.f32.mrb[57].mxu0  ;;  %v1702_v1 = vadd.f32 %v2718_v62, %v3296_v39  ;;  %v1693_v2 = vpop.f32.mrb[57].mxu1 }
 0x157   :  { %v1294_v3 = vadd.f32 %v3296_v39, %v1293_v0  ;;  %v2619_v4 = vpop.f32.mrb[58].mxu0  ;;  %v1694_v5 = vadd.f32 %v3296_v39, %v1693_v2  ;;  %v2719_v6 = vpop.f32.mrb[58].mxu1 }
 0x158   :  { %v1910_v7 = vmax.f32 %v1302_v63, 0.0  ;;  %v1305_v8 = vadd.f32 %v2619_v4, %v3296_v39  ;;  %v1296_v9 = vpop.f32.mrb[59].mxu0  ;;  %v2010_v10 = vmax.f32 %v1702_v1, 0.0  ;;  %v1705_v11 = vadd.f32 %v2719_v6, %v3296_v39  ;;  %v1696_v12 = vpop.f32.mrb[59].mxu1 }
 0x159   :  { %v1908_v13 = vmax.f32 %v1294_v3, 0.0  ;;  %v1297_v14 = vadd.f32 %v3296_v39, %v1296_v9  ;;  %v2008_v15 = vmax.f32 %v1694_v5, 0.0  ;;  %v1697_v16 = vadd.f32 %v3296_v39, %v1696_v12 }
 0x15a   :  { %2107 = vst.msk [vmem:[%s4286_s3 + $0x1d0] sm:$0xff] %vm2048_vm2, %v1910_v7  ;;  %v1911_v17 = vmax.f32 %v1305_v8, 0.0  ;;  %2207 = vst.msk [vmem:[%s4286_s3 + $0x4f0] sm:$0xff] %vm2048_vm2, %v2010_v10  ;;  %v2011_v18 = vmax.f32 %v1705_v11, 0.0 }
 0x15b   :  { %2105 = vst.msk [vmem:[%s4286_s3 + $0x1c0] sm:$0xff] %vm2048_vm2, %v1908_v13  ;;  %v1909_v19 = vmax.f32 %v1297_v14, 0.0  ;;  %2205 = vst.msk [vmem:[%s4286_s3 + $0x4e0] sm:$0xff] %vm2048_vm2, %v2008_v15  ;;  %v2009_v20 = vmax.f32 %v1697_v16, 0.0 }
 0x15c   :  { %2108 = vst.msk [vmem:[%s4286_s3 + $0x1d8] sm:$0xff] %vm2048_vm2, %v1911_v17  ;;  %2208 = vst.msk [vmem:[%s4286_s3 + $0x4f8] sm:$0xff] %vm2048_vm2, %v2011_v18 }
 0x15d   :  { %2106 = vst.msk [vmem:[%s4286_s3 + $0x1c8] sm:$0xff] %vm2048_vm2, %v1909_v19  ;;  %v2622_v21 = vpop.f32.mrb[60].mxu0  ;;  %2206 = vst.msk [vmem:[%s4286_s3 + $0x4e8] sm:$0xff] %vm2048_vm2, %v2009_v20  ;;  %v2722_v22 = vpop.f32.mrb[60].mxu1 }
 0x15e   :  { %v1318_v23 = vadd.f32 %v2622_v21, %v3296_v39  ;;  %v1309_v24 = vpop.f32.mrb[61].mxu0  ;;  %v1718_v25 = vadd.f32 %v2722_v22, %v3296_v39  ;;  %v1709_v26 = vpop.f32.mrb[61].mxu1 }
 0x15f   :  { %v1310_v27 = vadd.f32 %v3296_v39, %v1309_v24  ;;  %v2623_v28 = vpop.f32.mrb[62].mxu0  ;;  %v1710_v29 = vadd.f32 %v3296_v39, %v1709_v26  ;;  %v2723_v30 = vpop.f32.mrb[62].mxu1 }
 0x160   :  { %v1914_v31 = vmax.f32 %v1318_v23, 0.0  ;;  %v1321_v32 = vadd.f32 %v2623_v28, %v3296_v39  ;;  %v1312_v33 = vpop.f32.mrb[63].mxu0  ;;  %v2014_v34 = vmax.f32 %v1718_v25, 0.0  ;;  %v1721_v35 = vadd.f32 %v2723_v30, %v3296_v39  ;;  %v1712_v36 = vpop.f32.mrb[63].mxu1 }
 0x161   :  { %v1912_v37 = vmax.f32 %v1310_v27, 0.0  ;;  %v1313_v38 = vadd.f32 %v3296_v39, %v1312_v33  ;;  %v2012_v40 = vmax.f32 %v1710_v29, 0.0  ;;  %v1713_v41 = vadd.f32 %v3296_v39, %v1712_v36 }
 0x162   :  { %2111 = vst.msk [vmem:[%s4286_s3 + $0x1f0] sm:$0xff] %vm2048_vm2, %v1914_v31  ;;  %v1915_v42 = vmax.f32 %v1321_v32, 0.0  ;;  %2211 = vst.msk [vmem:[%s4286_s3 + $0x510] sm:$0xff] %vm2048_vm2, %v2014_v34  ;;  %v2015_v43 = vmax.f32 %v1721_v35, 0.0 }
 0x163   :  { %2109 = vst.msk [vmem:[%s4286_s3 + $0x1e0] sm:$0xff] %vm2048_vm2, %v1912_v37  ;;  %v1913_v44 = vmax.f32 %v1313_v38, 0.0  ;;  %2209 = vst.msk [vmem:[%s4286_s3 + $0x500] sm:$0xff] %vm2048_vm2, %v2012_v40  ;;  %v2013_v39 = vmax.f32 %v1713_v41, 0.0 }
 0x164   :  { %2112 = vst.msk [vmem:[%s4286_s3 + $0x1f8] sm:$0xff] %vm2048_vm2, %v1915_v42  ;;  %2212 = vst.msk [vmem:[%s4286_s3 + $0x518] sm:$0xff] %vm2048_vm2, %v2015_v43 }
 0x165   :  { %2110 = vst.msk [vmem:[%s4286_s3 + $0x1e8] sm:$0xff] %vm2048_vm2, %v1913_v44  ;;  %v2626_v45 = vpop.f32.mrb[64].mxu0  ;;  %2210 = vst.msk [vmem:[%s4286_s3 + $0x508] sm:$0xff] %vm2048_vm2, %v2013_v39  ;;  %v2726_v46 = vpop.f32.mrb[64].mxu1 }
 0x166   :  { %v1334_v48 = vadd.f32 %v3941_v47, %v2626_v45  ;;  %v1325_v49 = vpop.f32.mrb[65].mxu0  ;;  %v1734_v50 = vadd.f32 %v3941_v47, %v2726_v46  ;;  %v1725_v51 = vpop.f32.mrb[65].mxu1 }
 0x167   :  { %v1326_v52 = vadd.f32 %v3941_v47, %v1325_v49  ;;  %v2627_v53 = vpop.f32.mrb[66].mxu0  ;;  %v1726_v54 = vadd.f32 %v3941_v47, %v1725_v51  ;;  %v2727_v55 = vpop.f32.mrb[66].mxu1 }
 0x168   :  { %v1918_v56 = vmax.f32 %v1334_v48, 0.0  ;;  %v1337_v57 = vadd.f32 %v3941_v47, %v2627_v53  ;;  %v1328_v58 = vpop.f32.mrb[67].mxu0  ;;  %v2018_v59 = vmax.f32 %v1734_v50, 0.0  ;;  %v1737_v60 = vadd.f32 %v3941_v47, %v2727_v55  ;;  %v1728_v61 = vpop.f32.mrb[67].mxu1 }
 0x169   :  { %v1916_v62 = vmax.f32 %v1326_v52, 0.0  ;;  %v1329_v63 = vadd.f32 %v3941_v47, %v1328_v58  ;;  %v2016_v0 = vmax.f32 %v1726_v54, 0.0  ;;  %v1729_v1 = vadd.f32 %v3941_v47, %v1728_v61 }
 0x16a   :  { %2115 = vst.msk [vmem:[%s4286_s3 + $0x210] sm:$0xff] %vm2048_vm2, %v1918_v56  ;;  %v1919_v2 = vmax.f32 %v1337_v57, 0.0  ;;  %2215 = vst.msk [vmem:[%s4286_s3 + $0x530] sm:$0xff] %vm2048_vm2, %v2018_v59  ;;  %v2019_v3 = vmax.f32 %v1737_v60, 0.0 }
 0x16b   :  { %2113 = vst.msk [vmem:[%s4286_s3 + $0x200] sm:$0xff] %vm2048_vm2, %v1916_v62  ;;  %v1917_v4 = vmax.f32 %v1329_v63, 0.0  ;;  %2213 = vst.msk [vmem:[%s4286_s3 + $0x520] sm:$0xff] %vm2048_vm2, %v2016_v0  ;;  %v2017_v5 = vmax.f32 %v1729_v1, 0.0 }
 0x16c   :  { %2116 = vst.msk [vmem:[%s4286_s3 + $0x218] sm:$0xff] %vm2048_vm2, %v1919_v2  ;;  %2216 = vst.msk [vmem:[%s4286_s3 + $0x538] sm:$0xff] %vm2048_vm2, %v2019_v3 }
 0x16d   :  { %2114 = vst.msk [vmem:[%s4286_s3 + $0x208] sm:$0xff] %vm2048_vm2, %v1917_v4  ;;  %v2630_v6 = vpop.f32.mrb[68].mxu0  ;;  %2214 = vst.msk [vmem:[%s4286_s3 + $0x528] sm:$0xff] %vm2048_vm2, %v2017_v5  ;;  %v2730_v7 = vpop.f32.mrb[68].mxu1 }
 0x16e   :  { %v1350_v8 = vadd.f32 %v3941_v47, %v2630_v6  ;;  %v1341_v9 = vpop.f32.mrb[69].mxu0  ;;  %v1750_v10 = vadd.f32 %v3941_v47, %v2730_v7  ;;  %v1741_v11 = vpop.f32.mrb[69].mxu1 }
 0x16f   :  { %v1342_v12 = vadd.f32 %v3941_v47, %v1341_v9  ;;  %v2631_v13 = vpop.f32.mrb[70].mxu0  ;;  %v1742_v14 = vadd.f32 %v3941_v47, %v1741_v11  ;;  %v2731_v15 = vpop.f32.mrb[70].mxu1 }
 0x170   :  { %v1922_v16 = vmax.f32 %v1350_v8, 0.0  ;;  %v1353_v17 = vadd.f32 %v3941_v47, %v2631_v13  ;;  %v1344_v18 = vpop.f32.mrb[71].mxu0  ;;  %v2022_v19 = vmax.f32 %v1750_v10, 0.0  ;;  %v1753_v20 = vadd.f32 %v3941_v47, %v2731_v15  ;;  %v1744_v21 = vpop.f32.mrb[71].mxu1 }
 0x171   :  { %v1920_v22 = vmax.f32 %v1342_v12, 0.0  ;;  %v1345_v23 = vadd.f32 %v3941_v47, %v1344_v18  ;;  %v2020_v24 = vmax.f32 %v1742_v14, 0.0  ;;  %v1745_v25 = vadd.f32 %v3941_v47, %v1744_v21 }
 0x172   :  { %2119 = vst.msk [vmem:[%s4286_s3 + $0x230] sm:$0xff] %vm2048_vm2, %v1922_v16  ;;  %v1923_v26 = vmax.f32 %v1353_v17, 0.0  ;;  %2219 = vst.msk [vmem:[%s4286_s3 + $0x550] sm:$0xff] %vm2048_vm2, %v2022_v19  ;;  %v2023_v27 = vmax.f32 %v1753_v20, 0.0 }
 0x173   :  { %2117 = vst.msk [vmem:[%s4286_s3 + $0x220] sm:$0xff] %vm2048_vm2, %v1920_v22  ;;  %v1921_v28 = vmax.f32 %v1345_v23, 0.0  ;;  %2217 = vst.msk [vmem:[%s4286_s3 + $0x540] sm:$0xff] %vm2048_vm2, %v2020_v24  ;;  %v2021_v29 = vmax.f32 %v1745_v25, 0.0 }
 0x174   :  { %2120 = vst.msk [vmem:[%s4286_s3 + $0x238] sm:$0xff] %vm2048_vm2, %v1923_v26  ;;  %2220 = vst.msk [vmem:[%s4286_s3 + $0x558] sm:$0xff] %vm2048_vm2, %v2023_v27 }
 0x175   :  { %2118 = vst.msk [vmem:[%s4286_s3 + $0x228] sm:$0xff] %vm2048_vm2, %v1921_v28  ;;  %v2634_v30 = vpop.f32.mrb[72].mxu0  ;;  %2218 = vst.msk [vmem:[%s4286_s3 + $0x548] sm:$0xff] %vm2048_vm2, %v2021_v29  ;;  %v2734_v31 = vpop.f32.mrb[72].mxu1 }
 0x176   :  { %v1366_v32 = vadd.f32 %v3941_v47, %v2634_v30  ;;  %v1357_v33 = vpop.f32.mrb[73].mxu0  ;;  %v1766_v34 = vadd.f32 %v3941_v47, %v2734_v31  ;;  %v1757_v35 = vpop.f32.mrb[73].mxu1 }
 0x177   :  { %v1358_v36 = vadd.f32 %v3941_v47, %v1357_v33  ;;  %v2635_v37 = vpop.f32.mrb[74].mxu0  ;;  %v1758_v38 = vadd.f32 %v3941_v47, %v1757_v35  ;;  %v2735_v40 = vpop.f32.mrb[74].mxu1 }
 0x178   :  { %v1926_v41 = vmax.f32 %v1366_v32, 0.0  ;;  %v1369_v42 = vadd.f32 %v3941_v47, %v2635_v37  ;;  %v1360_v43 = vpop.f32.mrb[75].mxu0  ;;  %v2026_v44 = vmax.f32 %v1766_v34, 0.0  ;;  %v1769_v39 = vadd.f32 %v3941_v47, %v2735_v40  ;;  %v1760_v45 = vpop.f32.mrb[75].mxu1 }
 0x179   :  { %v1924_v46 = vmax.f32 %v1358_v36, 0.0  ;;  %v1361_v48 = vadd.f32 %v3941_v47, %v1360_v43  ;;  %v2024_v49 = vmax.f32 %v1758_v38, 0.0  ;;  %v1761_v50 = vadd.f32 %v3941_v47, %v1760_v45 }
 0x17a   :  { %2123 = vst.msk [vmem:[%s4286_s3 + $0x250] sm:$0xff] %vm2048_vm2, %v1926_v41  ;;  %v1927_v51 = vmax.f32 %v1369_v42, 0.0  ;;  %2223 = vst.msk [vmem:[%s4286_s3 + $0x570] sm:$0xff] %vm2048_vm2, %v2026_v44  ;;  %v2027_v52 = vmax.f32 %v1769_v39, 0.0 }
 0x17b   :  { %2121 = vst.msk [vmem:[%s4286_s3 + $0x240] sm:$0xff] %vm2048_vm2, %v1924_v46  ;;  %v1925_v53 = vmax.f32 %v1361_v48, 0.0  ;;  %2221 = vst.msk [vmem:[%s4286_s3 + $0x560] sm:$0xff] %vm2048_vm2, %v2024_v49  ;;  %v2025_v54 = vmax.f32 %v1761_v50, 0.0 }
 0x17c   :  { %2124 = vst.msk [vmem:[%s4286_s3 + $0x258] sm:$0xff] %vm2048_vm2, %v1927_v51  ;;  %2224 = vst.msk [vmem:[%s4286_s3 + $0x578] sm:$0xff] %vm2048_vm2, %v2027_v52 }
 0x17d   :  { %2122 = vst.msk [vmem:[%s4286_s3 + $0x248] sm:$0xff] %vm2048_vm2, %v1925_v53  ;;  %v2638_v55 = vpop.f32.mrb[76].mxu0  ;;  %2222 = vst.msk [vmem:[%s4286_s3 + $0x568] sm:$0xff] %vm2048_vm2, %v2025_v54  ;;  %v2738_v56 = vpop.f32.mrb[76].mxu1 }
 0x17e   :  { %v1382_v57 = vadd.f32 %v3941_v47, %v2638_v55  ;;  %v1373_v58 = vpop.f32.mrb[77].mxu0  ;;  %v1782_v59 = vadd.f32 %v3941_v47, %v2738_v56  ;;  %v1773_v60 = vpop.f32.mrb[77].mxu1 }
 0x17f   :  { %v1374_v61 = vadd.f32 %v3941_v47, %v1373_v58  ;;  %v2639_v62 = vpop.f32.mrb[78].mxu0  ;;  %v1774_v63 = vadd.f32 %v3941_v47, %v1773_v60  ;;  %v2739_v0 = vpop.f32.mrb[78].mxu1 }
 0x180   :  { %v1930_v1 = vmax.f32 %v1382_v57, 0.0  ;;  %v1385_v2 = vadd.f32 %v3941_v47, %v2639_v62  ;;  %v1376_v3 = vpop.f32.mrb[79].mxu0  ;;  %v2030_v4 = vmax.f32 %v1782_v59, 0.0  ;;  %v1785_v5 = vadd.f32 %v3941_v47, %v2739_v0  ;;  %v1776_v6 = vpop.f32.mrb[79].mxu1 }
 0x181   :  { %v1928_v7 = vmax.f32 %v1374_v61, 0.0  ;;  %v1377_v8 = vadd.f32 %v3941_v47, %v1376_v3  ;;  %v2028_v9 = vmax.f32 %v1774_v63, 0.0  ;;  %v1777_v10 = vadd.f32 %v3941_v47, %v1776_v6 }
 0x182   :  { %2127 = vst.msk [vmem:[%s4286_s3 + $0x270] sm:$0xff] %vm2048_vm2, %v1930_v1  ;;  %v1931_v11 = vmax.f32 %v1385_v2, 0.0  ;;  %2227 = vst.msk [vmem:[%s4286_s3 + $0x590] sm:$0xff] %vm2048_vm2, %v2030_v4  ;;  %v2031_v12 = vmax.f32 %v1785_v5, 0.0 }
 0x183   :  { %2125 = vst.msk [vmem:[%s4286_s3 + $0x260] sm:$0xff] %vm2048_vm2, %v1928_v7  ;;  %v1929_v13 = vmax.f32 %v1377_v8, 0.0  ;;  %2225 = vst.msk [vmem:[%s4286_s3 + $0x580] sm:$0xff] %vm2048_vm2, %v2028_v9  ;;  %v2029_v14 = vmax.f32 %v1777_v10, 0.0 }
 0x184   :  { %2128 = vst.msk [vmem:[%s4286_s3 + $0x278] sm:$0xff] %vm2048_vm2, %v1931_v11  ;;  %2228 = vst.msk [vmem:[%s4286_s3 + $0x598] sm:$0xff] %vm2048_vm2, %v2031_v12 }
 0x185   :  { %2126 = vst.msk [vmem:[%s4286_s3 + $0x268] sm:$0xff] %vm2048_vm2, %v1929_v13  ;;  %v2642_v15 = vpop.f32.mrb[80].mxu0  ;;  %2226 = vst.msk [vmem:[%s4286_s3 + $0x588] sm:$0xff] %vm2048_vm2, %v2029_v14  ;;  %v2742_v16 = vpop.f32.mrb[80].mxu1 }
 0x186   :  { %v1398_v17 = vadd.f32 %v3941_v47, %v2642_v15  ;;  %v1389_v18 = vpop.f32.mrb[81].mxu0  ;;  %v1798_v19 = vadd.f32 %v3941_v47, %v2742_v16  ;;  %v1789_v20 = vpop.f32.mrb[81].mxu1 }
 0x187   :  { %v1390_v21 = vadd.f32 %v3941_v47, %v1389_v18  ;;  %v2643_v22 = vpop.f32.mrb[82].mxu0  ;;  %v1790_v23 = vadd.f32 %v3941_v47, %v1789_v20  ;;  %v2743_v24 = vpop.f32.mrb[82].mxu1 }
 0x188   :  { %v1934_v25 = vmax.f32 %v1398_v17, 0.0  ;;  %v1401_v26 = vadd.f32 %v3941_v47, %v2643_v22  ;;  %v1392_v27 = vpop.f32.mrb[83].mxu0  ;;  %v2034_v28 = vmax.f32 %v1798_v19, 0.0  ;;  %v1801_v29 = vadd.f32 %v3941_v47, %v2743_v24  ;;  %v1792_v30 = vpop.f32.mrb[83].mxu1 }
 0x189   :  { %v1932_v31 = vmax.f32 %v1390_v21, 0.0  ;;  %v1393_v32 = vadd.f32 %v3941_v47, %v1392_v27  ;;  %v2032_v33 = vmax.f32 %v1790_v23, 0.0  ;;  %v1793_v34 = vadd.f32 %v3941_v47, %v1792_v30 }
 0x18a   :  { %2131 = vst.msk [vmem:[%s4286_s3 + $0x290] sm:$0xff] %vm2048_vm2, %v1934_v25  ;;  %v1935_v35 = vmax.f32 %v1401_v26, 0.0  ;;  %2231 = vst.msk [vmem:[%s4286_s3 + $0x5b0] sm:$0xff] %vm2048_vm2, %v2034_v28  ;;  %v2035_v36 = vmax.f32 %v1801_v29, 0.0 }
 0x18b   :  { %2129 = vst.msk [vmem:[%s4286_s3 + $0x280] sm:$0xff] %vm2048_vm2, %v1932_v31  ;;  %v1933_v37 = vmax.f32 %v1393_v32, 0.0  ;;  %2229 = vst.msk [vmem:[%s4286_s3 + $0x5a0] sm:$0xff] %vm2048_vm2, %v2032_v33  ;;  %v2033_v38 = vmax.f32 %v1793_v34, 0.0 }
 0x18c   :  { %2132 = vst.msk [vmem:[%s4286_s3 + $0x298] sm:$0xff] %vm2048_vm2, %v1935_v35  ;;  %2232 = vst.msk [vmem:[%s4286_s3 + $0x5b8] sm:$0xff] %vm2048_vm2, %v2035_v36 }
 0x18d   :  { %2130 = vst.msk [vmem:[%s4286_s3 + $0x288] sm:$0xff] %vm2048_vm2, %v1933_v37  ;;  %v2646_v40 = vpop.f32.mrb[84].mxu0  ;;  %2230 = vst.msk [vmem:[%s4286_s3 + $0x5a8] sm:$0xff] %vm2048_vm2, %v2033_v38  ;;  %v2746_v41 = vpop.f32.mrb[84].mxu1 }
 0x18e   :  { %v1414_v42 = vadd.f32 %v3941_v47, %v2646_v40  ;;  %v1405_v43 = vpop.f32.mrb[85].mxu0  ;;  %v1814_v44 = vadd.f32 %v3941_v47, %v2746_v41  ;;  %v1805_v39 = vpop.f32.mrb[85].mxu1 }
 0x18f   :  { %v1406_v45 = vadd.f32 %v3941_v47, %v1405_v43  ;;  %v2647_v46 = vpop.f32.mrb[86].mxu0  ;;  %v1806_v48 = vadd.f32 %v3941_v47, %v1805_v39  ;;  %v2747_v49 = vpop.f32.mrb[86].mxu1 }
 0x190   :  { %v1938_v50 = vmax.f32 %v1414_v42, 0.0  ;;  %v1417_v51 = vadd.f32 %v3941_v47, %v2647_v46  ;;  %v1408_v52 = vpop.f32.mrb[87].mxu0  ;;  %v2038_v53 = vmax.f32 %v1814_v44, 0.0  ;;  %v1817_v54 = vadd.f32 %v3941_v47, %v2747_v49  ;;  %v1808_v55 = vpop.f32.mrb[87].mxu1 }
 0x191   :  { %v1936_v56 = vmax.f32 %v1406_v45, 0.0  ;;  %v1409_v57 = vadd.f32 %v3941_v47, %v1408_v52  ;;  %v2036_v58 = vmax.f32 %v1806_v48, 0.0  ;;  %v1809_v59 = vadd.f32 %v3941_v47, %v1808_v55 }
 0x192   :  { %2135 = vst.msk [vmem:[%s4286_s3 + $0x2b0] sm:$0xff] %vm2048_vm2, %v1938_v50  ;;  %v1939_v60 = vmax.f32 %v1417_v51, 0.0  ;;  %2235 = vst.msk [vmem:[%s4286_s3 + $0x5d0] sm:$0xff] %vm2048_vm2, %v2038_v53  ;;  %v2039_v61 = vmax.f32 %v1817_v54, 0.0 }
 0x193   :  { %2133 = vst.msk [vmem:[%s4286_s3 + $0x2a0] sm:$0xff] %vm2048_vm2, %v1936_v56  ;;  %v1937_v62 = vmax.f32 %v1409_v57, 0.0  ;;  %2233 = vst.msk [vmem:[%s4286_s3 + $0x5c0] sm:$0xff] %vm2048_vm2, %v2036_v58  ;;  %v2037_v63 = vmax.f32 %v1809_v59, 0.0 }
 0x194   :  { %2136 = vst.msk [vmem:[%s4286_s3 + $0x2b8] sm:$0xff] %vm2048_vm2, %v1939_v60  ;;  %2236 = vst.msk [vmem:[%s4286_s3 + $0x5d8] sm:$0xff] %vm2048_vm2, %v2039_v61 }
 0x195   :  { %2134 = vst.msk [vmem:[%s4286_s3 + $0x2a8] sm:$0xff] %vm2048_vm2, %v1937_v62  ;;  %v2650_v0 = vpop.f32.mrb[88].mxu0  ;;  %2234 = vst.msk [vmem:[%s4286_s3 + $0x5c8] sm:$0xff] %vm2048_vm2, %v2037_v63  ;;  %v2750_v1 = vpop.f32.mrb[88].mxu1 }
 0x196   :  { %v1430_v2 = vadd.f32 %v3941_v47, %v2650_v0  ;;  %v1421_v3 = vpop.f32.mrb[89].mxu0  ;;  %v1830_v4 = vadd.f32 %v3941_v47, %v2750_v1  ;;  %v1821_v5 = vpop.f32.mrb[89].mxu1 }
 0x197   :  { %v1422_v6 = vadd.f32 %v3941_v47, %v1421_v3  ;;  %v2651_v7 = vpop.f32.mrb[90].mxu0  ;;  %v1822_v8 = vadd.f32 %v3941_v47, %v1821_v5  ;;  %v2751_v9 = vpop.f32.mrb[90].mxu1 }
 0x198   :  { %v1942_v10 = vmax.f32 %v1430_v2, 0.0  ;;  %v1433_v11 = vadd.f32 %v3941_v47, %v2651_v7  ;;  %v1424_v12 = vpop.f32.mrb[91].mxu0  ;;  %v2042_v13 = vmax.f32 %v1830_v4, 0.0  ;;  %v1833_v14 = vadd.f32 %v3941_v47, %v2751_v9  ;;  %v1824_v15 = vpop.f32.mrb[91].mxu1 }
 0x199   :  { %v1940_v16 = vmax.f32 %v1422_v6, 0.0  ;;  %v1425_v17 = vadd.f32 %v3941_v47, %v1424_v12  ;;  %v2040_v18 = vmax.f32 %v1822_v8, 0.0  ;;  %v1825_v19 = vadd.f32 %v3941_v47, %v1824_v15 }
 0x19a   :  { %2139 = vst.msk [vmem:[%s4286_s3 + $0x2d0] sm:$0xff] %vm2048_vm2, %v1942_v10  ;;  %v1943_v20 = vmax.f32 %v1433_v11, 0.0  ;;  %2239 = vst.msk [vmem:[%s4286_s3 + $0x5f0] sm:$0xff] %vm2048_vm2, %v2042_v13  ;;  %v2043_v21 = vmax.f32 %v1833_v14, 0.0 }
 0x19b   :  { %2137 = vst.msk [vmem:[%s4286_s3 + $0x2c0] sm:$0xff] %vm2048_vm2, %v1940_v16  ;;  %v1941_v22 = vmax.f32 %v1425_v17, 0.0  ;;  %2237 = vst.msk [vmem:[%s4286_s3 + $0x5e0] sm:$0xff] %vm2048_vm2, %v2040_v18  ;;  %v2041_v23 = vmax.f32 %v1825_v19, 0.0 }
 0x19c   :  { %2140 = vst.msk [vmem:[%s4286_s3 + $0x2d8] sm:$0xff] %vm2048_vm2, %v1943_v20  ;;  %2240 = vst.msk [vmem:[%s4286_s3 + $0x5f8] sm:$0xff] %vm2048_vm2, %v2043_v21 }
 0x19d   :  { %2138 = vst.msk [vmem:[%s4286_s3 + $0x2c8] sm:$0xff] %vm2048_vm2, %v1941_v22  ;;  %v2654_v24 = vpop.f32.mrb[92].mxu0  ;;  %2238 = vst.msk [vmem:[%s4286_s3 + $0x5e8] sm:$0xff] %vm2048_vm2, %v2041_v23  ;;  %v2754_v25 = vpop.f32.mrb[92].mxu1 }
 0x19e   :  { %v1446_v26 = vadd.f32 %v3941_v47, %v2654_v24  ;;  %v1437_v27 = vpop.f32.mrb[93].mxu0  ;;  %v1846_v28 = vadd.f32 %v3941_v47, %v2754_v25  ;;  %v1837_v29 = vpop.f32.mrb[93].mxu1 }
 0x19f   :  { %v1438_v30 = vadd.f32 %v3941_v47, %v1437_v27  ;;  %v2655_v31 = vpop.f32.mrb[94].mxu0  ;;  %v1838_v32 = vadd.f32 %v3941_v47, %v1837_v29  ;;  %v2755_v33 = vpop.f32.mrb[94].mxu1 }
 0x1a0   :  { %v1946_v34 = vmax.f32 %v1446_v26, 0.0  ;;  %v1449_v35 = vadd.f32 %v3941_v47, %v2655_v31  ;;  %v1440_v36 = vpop.f32.mrb[95].mxu0  ;;  %v2046_v37 = vmax.f32 %v1846_v28, 0.0  ;;  %v1849_v38 = vadd.f32 %v3941_v47, %v2755_v33  ;;  %v1840_v40 = vpop.f32.mrb[95].mxu1 }
 0x1a1   :  { %v1944_v41 = vmax.f32 %v1438_v30, 0.0  ;;  %v1441_v42 = vadd.f32 %v3941_v47, %v1440_v36  ;;  %v2044_v43 = vmax.f32 %v1838_v32, 0.0  ;;  %v1841_v44 = vadd.f32 %v3941_v47, %v1840_v40 }
 0x1a2   :  { %2143 = vst.msk [vmem:[%s4286_s3 + $0x2f0] sm:$0xff] %vm2048_vm2, %v1946_v34  ;;  %v1947_v39 = vmax.f32 %v1449_v35, 0.0  ;;  %2243 = vst.msk [vmem:[%s4286_s3 + $0x610] sm:$0xff] %vm2048_vm2, %v2046_v37  ;;  %v2047_v45 = vmax.f32 %v1849_v38, 0.0 }
 0x1a3   :  { %2141 = vst.msk [vmem:[%s4286_s3 + $0x2e0] sm:$0xff] %vm2048_vm2, %v1944_v41  ;;  %v1945_v46 = vmax.f32 %v1441_v42, 0.0  ;;  %2241 = vst.msk [vmem:[%s4286_s3 + $0x600] sm:$0xff] %vm2048_vm2, %v2044_v43  ;;  %v2045_v48 = vmax.f32 %v1841_v44, 0.0 }
 0x1a4   :  { %2144 = vst.msk [vmem:[%s4286_s3 + $0x2f8] sm:$0xff] %vm2048_vm2, %v1947_v39  ;;  %2244 = vst.msk [vmem:[%s4286_s3 + $0x618] sm:$0xff] %vm2048_vm2, %v2047_v45 }
 0x1a5   :  { %2142 = vst.msk [vmem:[%s4286_s3 + $0x2e8] sm:$0xff] %vm2048_vm2, %v1945_v46  ;;  %v2658_v49 = vpop.f32.mrb[96].mxu0  ;;  %2242 = vst.msk [vmem:[%s4286_s3 + $0x608] sm:$0xff] %vm2048_vm2, %v2045_v48 }
 0x1a6   :  { %v1462_v50 = vadd.f32 %v3941_v47, %v2658_v49  ;;  %v1453_v51 = vpop.f32.mrb[97].mxu0 }
 0x1a7   :  { %v1454_v52 = vadd.f32 %v3941_v47, %v1453_v51  ;;  %v2659_v53 = vpop.f32.mrb[98].mxu0 }
 0x1a8   :  { %v1950_v54 = vmax.f32 %v1462_v50, 0.0  ;;  %v1465_v55 = vadd.f32 %v3941_v47, %v2659_v53  ;;  %v1456_v56 = vpop.f32.mrb[99].mxu0 }
 0x1a9   :  { %v1948_v57 = vmax.f32 %v1454_v52, 0.0  ;;  %v1457_v58 = vadd.f32 %v3941_v47, %v1456_v56 }
 0x1aa   :  { %2147 = vst.msk [vmem:[%s4286_s3 + $0x310] sm:$0xff] %vm2048_vm2, %v1950_v54  ;;  %v1951_v59 = vmax.f32 %v1465_v55, 0.0 }
 0x1ab   :  { %2145 = vst.msk [vmem:[%s4286_s3 + $0x300] sm:$0xff] %vm2048_vm2, %v1948_v57  ;;  %v1949_v60 = vmax.f32 %v1457_v58, 0.0 }
 0x1ac   :  { %2148 = vst.msk [vmem:[%s4286_s3 + $0x318] sm:$0xff] %vm2048_vm2, %v1951_v59 }
 0x1ad   :  { %2146 = vst.msk [vmem:[%s4286_s3 + $0x308] sm:$0xff] %vm2048_vm2, %v1949_v60 }

// kernel: c_lenet_pcnn_forward.4
= control target key start
LH: loop header
LB: loop body
LE: loop exit
PB: predicated region body
PF: predicated region fallthrough
CT: control target
= control target key end

     0   :  { %v1167_v0 = vmov 0   ;;  %vm513_vm0 = vcmask 130048   ;;  %vm850_vm1 = vcmask 261120   ;;  %s1565_s1 = inlined_call_operand.vmem [shape: bf16[400,32], index: 1, kind: input, shape index: {}]   ;;  %s1566_s0 = inlined_call_operand.vmem [shape: bf16[200,400], index: 0, kind: input, shape index: {}]   ;;  %s1567_s2 = inlined_call_operand.vmem [shape: f32[1,32], index: 2, kind: input, shape index: {}]   ;;  %s1568_s3 = inlined_call_operand.vmem [shape: f32[200,32], index: 3, kind: output, shape index: {}]  }
   0x1   :  { %689 = vmatprep.subr.bf16.mxu1 %v1167_v0  ;;  %v1066_v1 = vld [vmem:[%s1565_s1 + $0x40] sm:$0xff]   ;;  %v1069_v4 = vld [vmem:[%s1565_s1 + $0x48] sm:$0xff]   ;;  %v1072_v7 = vld [vmem:[%s1565_s1 + $0x50] sm:$0xff]  }
   0x2   :  { %v1067_v2 = vld [vmem:[%s1565_s1 + $0x80] sm:$0xff]   ;;  %971 = vmatprep.subr.bf16.mxu0 %v1066_v1  ;;  %v1070_v5 = vld [vmem:[%s1565_s1 + $0x88] sm:$0xff]   ;;  %v1073_v8 = vld [vmem:[%s1565_s1 + $0x90] sm:$0xff]  }
   0x3   :  { %v1068_v3 = vld [vmem:[%s1565_s1] sm:$0xff]   ;;  %690 = vmatpush1.bf16.msra.mxu1 %v1067_v2  ;;  %v1071_v6 = vld [vmem:[%s1565_s1 + $0x8] sm:$0xff]   ;;  %v1074_v9 = vld [vmem:[%s1565_s1 + $0x10] sm:$0xff]  }
   0x4   :  { %972 = vmatpush3.bf16.msra.mxu0 %v1068_v3  ;;  %691 = vmatprep.subr.bf16.mxu1 %v1167_v0  ;;  %v1075_v10 = vld [vmem:[%s1565_s1 + $0x58] sm:$0xff]   ;;  %v1078_v13 = vld [vmem:[%s1565_s1 + $0x60] sm:$0xff]   ;;  %v1081_v16 = vld [vmem:[%s1565_s1 + $0x68] sm:$0xff]  }
   0x5   :  { %973 = vmatprep.subr.bf16.mxu0 %v1069_v4  ;;  %v1076_v11 = vld [vmem:[%s1565_s1 + $0x98] sm:$0xff]   ;;  %v1079_v14 = vld [vmem:[%s1565_s1 + $0xa0] sm:$0xff]   ;;  %v1082_v17 = vld [vmem:[%s1565_s1 + $0xa8] sm:$0xff]  }
   0x6   :  { %v1077_v12 = vld [vmem:[%s1565_s1 + $0x18] sm:$0xff]   ;;  %v1080_v15 = vld [vmem:[%s1565_s1 + $0x20] sm:$0xff]   ;;  %v1083_v18 = vld [vmem:[%s1565_s1 + $0x28] sm:$0xff]  }
   0x7   :  { %692 = vmatpush1.bf16.msra.mxu1 %v1070_v5  ;;  %v1084_v19 = vld [vmem:[%s1565_s1 + $0x70] sm:$0xff]   ;;  %v1087_v22 = vld [vmem:[%s1565_s1 + $0x78] sm:$0xff]   ;;  %v1093_v28 = vld [vmem:[%s1565_s1 + $0xc0] sm:$0xff]  }
   0x8   :  { %974 = vmatpush3.bf16.msra.mxu0 %v1071_v6  ;;  %693 = vmatprep.subr.bf16.mxu1 %v1167_v0  ;;  %v1085_v20 = vld [vmem:[%s1565_s1 + $0xb0] sm:$0xff]   ;;  %v1088_v24 = vld [vmem:[%s1565_s1 + $0xb8] sm:$0xff]  }
   0x9   :  { %975 = vmatprep.subr.bf16.mxu0 %v1072_v7  ;;  %v1086_v21 = vld [vmem:[%s1565_s1 + $0x30] sm:$0xff]   ;;  %v1096_v25 = vld [vmem:[%s1566_s0 + $0xc] ss:$16 sps:$4 sm:$0xff]   ;;  %v1094_v30 = vld [vmem:[%s1566_s0 + $0x8] ss:$16 sps:$4 sm:$0xff]  }
   0xa   :  { %v1092_v23 = vld [vmem:[%s1566_s0 + $0x4] ss:$16 sps:$4 sm:$0xff]   ;;  %v1089_v26 = vld [vmem:[%s1565_s1 + $0x38] sm:$0xff]   ;;  %958 = vmatprep.mubr.msk.bf16.mxu1 %vm513_vm0, %v1096_v25  ;;  %v1090_v27 = vld [vmem:[%s1566_s0] ss:$16 sps:$4 sm:$0xff]  }
   0xb   :  { %694 = vmatpush1.bf16.msra.mxu1 %v1073_v8  ;;  %585 = vmatprep.mubr.bf16.mxu0 %v1092_v23  ;;  %v1097_v29 = vld [vmem:[%s1566_s0 + $0x24] ss:$16 sps:$4 sm:$0xff]   ;;  %v1100_v31 = vld [vmem:[%s1566_s0 + $0x2c] ss:$16 sps:$4 sm:$0xff]   ;;  %v1099_v32 = vld [vmem:[%s1566_s0 + $0x20] ss:$16 sps:$4 sm:$0xff]  }
   0xc   :  { %976 = vmatpush3.bf16.msra.mxu0 %v1074_v9  ;;  %695 = vmatprep.subr.bf16.mxu1 %v1167_v0  ;;  %v1103_v33 = vld [vmem:[%s1566_s0 + $0x44] ss:$16 sps:$4 sm:$0xff]   ;;  %v1102_v34 = vld [vmem:[%s1566_s0 + $0x28] ss:$16 sps:$4 sm:$0xff]   ;;  %v1106_v35 = vld [vmem:[%s1566_s0 + $0x4c] ss:$16 sps:$4 sm:$0xff]  }
   0xd   :  { %977 = vmatprep.subr.bf16.mxu0 %v1075_v10  ;;  %v1105_v36 = vld [vmem:[%s1566_s0 + $0x40] ss:$16 sps:$4 sm:$0xff]   ;;  %v1109_v37 = vld [vmem:[%s1566_s0 + $0x64] ss:$16 sps:$4 sm:$0xff]   ;;  %v1108_v38 = vld [vmem:[%s1566_s0 + $0x48] ss:$16 sps:$4 sm:$0xff]  }
   0xe   :  { %v1112_v39 = vld [vmem:[%s1566_s0 + $0x6c] ss:$16 sps:$4 sm:$0xff]   ;;  %v1111_v40 = vld [vmem:[%s1566_s0 + $0x60] ss:$16 sps:$4 sm:$0xff]   ;;  %v1115_v41 = vld [vmem:[%s1566_s0 + $0x84] ss:$16 sps:$4 sm:$0xff]  }
   0xf   :  { %696 = vmatpush1.bf16.msra.mxu1 %v1076_v11  ;;  %v1114_v42 = vld [vmem:[%s1566_s0 + $0x68] ss:$16 sps:$4 sm:$0xff]   ;;  %v1118_v43 = vld [vmem:[%s1566_s0 + $0x8c] ss:$16 sps:$4 sm:$0xff]   ;;  %v1117_v44 = vld [vmem:[%s1566_s0 + $0x80] ss:$16 sps:$4 sm:$0xff]  }
  0x10   :  { %978 = vmatpush3.bf16.msra.mxu0 %v1077_v12  ;;  %697 = vmatprep.subr.bf16.mxu1 %v1167_v0  ;;  %v1121_v45 = vld [vmem:[%s1566_s0 + $0xa4] ss:$16 sps:$4 sm:$0xff]   ;;  %v1120_v46 = vld [vmem:[%s1566_s0 + $0x88] ss:$16 sps:$4 sm:$0xff]   ;;  %v1124_v47 = vld [vmem:[%s1566_s0 + $0xac] ss:$16 sps:$4 sm:$0xff]  }
  0x11   :  { %979 = vmatprep.subr.bf16.mxu0 %v1078_v13  ;;  %v1123_v48 = vld [vmem:[%s1566_s0 + $0xa0] ss:$16 sps:$4 sm:$0xff]   ;;  %v1127_v49 = vld [vmem:[%s1566_s0 + $0xc4] ss:$16 sps:$4 sm:$0xff]   ;;  %v1126_v50 = vld [vmem:[%s1566_s0 + $0xa8] ss:$16 sps:$4 sm:$0xff]  }
  0x12   :  { %v1130_v51 = vld [vmem:[%s1566_s0 + $0xcc] ss:$16 sps:$4 sm:$0xff]   ;;  %v1129_v52 = vld [vmem:[%s1566_s0 + $0xc0] ss:$16 sps:$4 sm:$0xff]   ;;  %v1133_v53 = vld [vmem:[%s1566_s0 + $0xe4] ss:$16 sps:$4 sm:$0xff]  }
  0x13   :  { %698 = vmatpush1.bf16.msra.mxu1 %v1079_v14  ;;  %v1132_v54 = vld [vmem:[%s1566_s0 + $0xc8] ss:$16 sps:$4 sm:$0xff]   ;;  %v1136_v55 = vld [vmem:[%s1566_s0 + $0xec] ss:$16 sps:$4 sm:$0xff]   ;;  %v1135_v56 = vld [vmem:[%s1566_s0 + $0xe0] ss:$16 sps:$4 sm:$0xff]  }
  0x14   :  { %980 = vmatpush3.bf16.msra.mxu0 %v1080_v15  ;;  %699 = vmatprep.subr.bf16.mxu1 %v1167_v0  ;;  %v1139_v57 = vld [vmem:[%s1566_s0 + $0x104] ss:$16 sps:$4 sm:$0xff]   ;;  %v1138_v58 = vld [vmem:[%s1566_s0 + $0xe8] ss:$16 sps:$4 sm:$0xff]   ;;  %v1142_v59 = vld [vmem:[%s1566_s0 + $0x10c] ss:$16 sps:$4 sm:$0xff]  }
  0x15   :  { %981 = vmatprep.subr.bf16.mxu0 %v1081_v16  ;;  %v1141_v60 = vld [vmem:[%s1566_s0 + $0x100] ss:$16 sps:$4 sm:$0xff]   ;;  %v1145_v61 = vld [vmem:[%s1566_s0 + $0x124] ss:$16 sps:$4 sm:$0xff]   ;;  %v1144_v62 = vld [vmem:[%s1566_s0 + $0x108] ss:$16 sps:$4 sm:$0xff]  }
  0x16   :  { %v1148_v63 = vld [vmem:[%s1566_s0 + $0x12c] ss:$16 sps:$4 sm:$0xff]   ;;  %v1151_v1 = vld [vmem:[%s1566_s0 + $0x144] ss:$16 sps:$4 sm:$0xff]   ;;  %v1150_v2 = vld [vmem:[%s1566_s0 + $0x128] ss:$16 sps:$4 sm:$0xff]  }
  0x17   :  { %700 = vmatpush1.bf16.msra.mxu1 %v1082_v17  ;;  %v1154_v3 = vld [vmem:[%s1566_s0 + $0x14c] ss:$16 sps:$4 sm:$0xff]   ;;  %v1153_v4 = vld [vmem:[%s1566_s0 + $0x140] ss:$16 sps:$4 sm:$0xff]   ;;  %v1157_v5 = vld [vmem:[%s1566_s0 + $0x164] ss:$16 sps:$4 sm:$0xff]  }
  0x18   :  { %982 = vmatpush3.bf16.msra.mxu0 %v1083_v18  ;;  %701 = vmatprep.subr.bf16.mxu1 %v1167_v0  ;;  %v1156_v6 = vld [vmem:[%s1566_s0 + $0x148] ss:$16 sps:$4 sm:$0xff]   ;;  %v1160_v7 = vld [vmem:[%s1566_s0 + $0x16c] ss:$16 sps:$4 sm:$0xff]   ;;  %v63_v8 = vld [vmem:[%s1566_s0 + $0x180] sm:$0xff] }
  0x19   :  { %983 = vmatprep.subr.bf16.mxu0 %v1084_v19  ;;  %v1159_v9 = vld [vmem:[%s1566_s0 + $0x160] ss:$16 sps:$4 sm:$0xff]   ;;  %v930_v10 = vcombine.high %v63_v8, %v63_v8  ;;  %v64_v11 = vld [vmem:[%s1566_s0 + $0x188] sm:$0xff]  ;;  %v929_v14 = vcombine.low %v63_v8, %v63_v8 }
  0x1a   :  { %v1162_v12 = vld [vmem:[%s1566_s0 + $0x168] ss:$16 sps:$4 sm:$0xff]   ;;  %v932_v13 = vcombine.high %v64_v11, %v64_v11  ;;  %v931_v15 = vcombine.low %v64_v11, %v64_v11  ;;  %v1438_v18 = vld [vmem:[%s1567_s2] ss:$0 sm:$0xff] }
  0x1b   :  { %702 = vmatpush1.bf16.msra.mxu1 %v1085_v20 }
  0x1c   :  { %984 = vmatpush3.bf16.msra.mxu0 %v1086_v21  ;;  %703 = vmatprep.subr.bf16.mxu1 %v1167_v0 }
  0x1d   :  { %985 = vmatprep.subr.bf16.mxu0 %v1087_v22 }
  0x1f   :  { %704 = vmatpush1.bf16.msra.mxu1 %v1088_v24 }
  0x20   :  { %986 = vmatpush3.bf16.msra.mxu0 %v1089_v26  ;;  %705 = vmatprep.subr.bf16.mxu1 %v1167_v0  ;;  %v1147_v0 = vld [vmem:[%s1566_s0 + $0x120] ss:$16 sps:$4 sm:$0xff]  }
  0x23   :  { %586 = vmatmul.mubr.bf16.vlgmr.msra.gmra.mrb[0].mxu0 %v1090_v27  ;;  %706 = vmatpush1.bf16.msra.mxu1 %v1093_v28 }
  0x24   :  { %593 = vmatprep.mubr.bf16.mxu0 %v1097_v29 }
  0x26   :  { %722 = vmatmul.mubr.bf16.vlgmr.msra.gmra.mrb[0].mxu1 %v1094_v30 }
  0x27   :  { %959 = vmatprep.mubr.msk.bf16.mxu1 %vm513_vm0, %v1100_v31 }
  0x2b   :  { %594 = vmatmul.mubr.bf16.gmra.mrb[4].mxu0 %v1099_v32 }
  0x2c   :  { %601 = vmatprep.mubr.bf16.mxu0 %v1103_v33 }
  0x2e   :  { %730 = vmatmul.mubr.bf16.gmra.mrb[4].mxu1 %v1102_v34 }
  0x2f   :  { %960 = vmatprep.mubr.msk.bf16.mxu1 %vm513_vm0, %v1106_v35 }
  0x33   :  { %602 = vmatmul.mubr.bf16.gmra.mrb[8].mxu0 %v1105_v36 }
  0x34   :  { %609 = vmatprep.mubr.bf16.mxu0 %v1109_v37 }
  0x36   :  { %738 = vmatmul.mubr.bf16.gmra.mrb[8].mxu1 %v1108_v38 }
  0x37   :  { %961 = vmatprep.mubr.msk.bf16.mxu1 %vm513_vm0, %v1112_v39 }
  0x3b   :  { %610 = vmatmul.mubr.bf16.gmra.mrb[12].mxu0 %v1111_v40 }
  0x3c   :  { %617 = vmatprep.mubr.bf16.mxu0 %v1115_v41 }
  0x3e   :  { %746 = vmatmul.mubr.bf16.gmra.mrb[12].mxu1 %v1114_v42 }
  0x3f   :  { %962 = vmatprep.mubr.msk.bf16.mxu1 %vm513_vm0, %v1118_v43 }
  0x43   :  { %618 = vmatmul.mubr.bf16.gmra.mrb[16].mxu0 %v1117_v44 }
  0x44   :  { %625 = vmatprep.mubr.bf16.mxu0 %v1121_v45 }
  0x46   :  { %754 = vmatmul.mubr.bf16.gmra.mrb[16].mxu1 %v1120_v46 }
  0x47   :  { %963 = vmatprep.mubr.msk.bf16.mxu1 %vm513_vm0, %v1124_v47 }
  0x4b   :  { %626 = vmatmul.mubr.bf16.gmra.mrb[20].mxu0 %v1123_v48 }
  0x4c   :  { %633 = vmatprep.mubr.bf16.mxu0 %v1127_v49 }
  0x4e   :  { %762 = vmatmul.mubr.bf16.gmra.mrb[20].mxu1 %v1126_v50 }
  0x4f   :  { %964 = vmatprep.mubr.msk.bf16.mxu1 %vm513_vm0, %v1130_v51 }
  0x53   :  { %634 = vmatmul.mubr.bf16.gmra.mrb[24].mxu0 %v1129_v52 }
  0x54   :  { %641 = vmatprep.mubr.bf16.mxu0 %v1133_v53 }
  0x56   :  { %770 = vmatmul.mubr.bf16.gmra.mrb[24].mxu1 %v1132_v54 }
  0x57   :  { %965 = vmatprep.mubr.msk.bf16.mxu1 %vm513_vm0, %v1136_v55 }
  0x5b   :  { %642 = vmatmul.mubr.bf16.gmra.mrb[28].mxu0 %v1135_v56 }
  0x5c   :  { %649 = vmatprep.mubr.bf16.mxu0 %v1139_v57 }
  0x5e   :  { %778 = vmatmul.mubr.bf16.gmra.mrb[28].mxu1 %v1138_v58 }
  0x5f   :  { %966 = vmatprep.mubr.msk.bf16.mxu1 %vm513_vm0, %v1142_v59 }
  0x63   :  { %650 = vmatmul.mubr.bf16.gmra.mrb[32].mxu0 %v1141_v60 }
  0x64   :  { %657 = vmatprep.mubr.bf16.mxu0 %v1145_v61 }
  0x66   :  { %786 = vmatmul.mubr.bf16.gmra.mrb[32].mxu1 %v1144_v62 }
  0x67   :  { %967 = vmatprep.mubr.msk.bf16.mxu1 %vm513_vm0, %v1148_v63 }
  0x6b   :  { %658 = vmatmul.mubr.bf16.gmra.mrb[36].mxu0 %v1147_v0 }
  0x6c   :  { %665 = vmatprep.mubr.bf16.mxu0 %v1151_v1 }
  0x6e   :  { %794 = vmatmul.mubr.bf16.gmra.mrb[36].mxu1 %v1150_v2 }
  0x6f   :  { %968 = vmatprep.mubr.msk.bf16.mxu1 %vm513_vm0, %v1154_v3 }
  0x73   :  { %666 = vmatmul.mubr.bf16.gmra.mrb[40].mxu0 %v1153_v4 }
  0x74   :  { %673 = vmatprep.mubr.bf16.mxu0 %v1157_v5 }
  0x76   :  { %802 = vmatmul.mubr.bf16.gmra.mrb[40].mxu1 %v1156_v6 }
  0x77   :  { %969 = vmatprep.mubr.msk.bf16.mxu1 %vm513_vm0, %v1160_v7 }
  0x7b   :  { %674 = vmatmul.mubr.bf16.gmra.mrb[44].mxu0 %v1159_v9 }
  0x7c   :  { %681 = vmatprep.mubr.bf16.mxu0 %v930_v10 }
  0x7e   :  { %810 = vmatmul.mubr.bf16.gmra.mrb[44].mxu1 %v1162_v12 }
  0x7f   :  { %970 = vmatprep.mubr.msk.bf16.mxu1 %vm513_vm0, %v932_v13 }
  0x83   :  { %682 = vmatmul.mubr.bf16.gmra.mrb[48].mxu0 %v929_v14 }
  0x86   :  { %818 = vmatmul.mubr.bf16.gmra.mrb[48].mxu1 %v931_v15 }
  0xf6   :  { %v987_v16 = vpop.f32.mrb[0].mxu0 }
  0xf7   :  { %v988_v17 = vpop.f32.mrb[1].mxu0 }
  0xf8   :  { %v989_v19 = vadd.f32 %v988_v17, %v987_v16  ;;  %v990_v20 = vpop.f32.mrb[2].mxu0 }
  0xf9   :  { %v991_v21 = vpop.f32.mrb[3].mxu0  ;;  %v723_v22 = vpop.f32.mrb[0].mxu1 }
  0xfa   :  { %v992_v23 = vadd.f32 %v991_v21, %v990_v20  ;;  %v588_v24 = vadd.f32 %v989_v19, %v1438_v18  ;;  %v725_v25 = vpop.f32.mrb[1].mxu1 }
  0xfb   :  { %v726_v26 = vpop.f32.mrb[2].mxu1 }
  0xfc   :  { %v724_v27 = vadd.f32 %v723_v22, %v588_v24  ;;  %v591_v28 = vadd.f32 %v992_v23, %v1438_v18  ;;  %v728_v29 = vpop.f32.mrb[3].mxu1 }
  0xfe   :  { %v825_v30 = vmax.f32 %v724_v27, 0.0  ;;  %v727_v31 = vadd.f32 %v726_v26, %v591_v28  ;;  %v993_v32 = vpop.f32.mrb[4].mxu0 }
  0xff   :  { %v994_v33 = vpop.f32.mrb[5].mxu0 }
 0x100   :  { %851 = vst.msk [vmem:[%s1568_s3] sm:$0xff] %vm850_vm1, %v825_v30  ;;  %v826_v34 = vmax.f32 %v727_v31, 0.0  ;;  %v995_v35 = vadd.f32 %v994_v33, %v993_v32  ;;  %v996_v36 = vpop.f32.mrb[6].mxu0 }
 0x101   :  { %v997_v37 = vpop.f32.mrb[7].mxu0  ;;  %v731_v38 = vpop.f32.mrb[4].mxu1 }
 0x102   :  { %852 = vst.msk [vmem:[%s1568_s3 + $0x8] sm:$0xff] %vm850_vm1, %v826_v34  ;;  %v998_v39 = vadd.f32 %v997_v37, %v996_v36  ;;  %v596_v40 = vadd.f32 %v995_v35, %v1438_v18  ;;  %v733_v41 = vpop.f32.mrb[5].mxu1 }
 0x103   :  { %v734_v42 = vpop.f32.mrb[6].mxu1 }
 0x104   :  { %v732_v43 = vadd.f32 %v731_v38, %v596_v40  ;;  %v599_v44 = vadd.f32 %v998_v39, %v1438_v18  ;;  %v736_v45 = vpop.f32.mrb[7].mxu1 }
 0x106   :  { %v827_v46 = vmax.f32 %v732_v43, 0.0  ;;  %v735_v47 = vadd.f32 %v734_v42, %v599_v44  ;;  %v999_v48 = vpop.f32.mrb[8].mxu0 }
 0x107   :  { %v1000_v49 = vpop.f32.mrb[9].mxu0 }
 0x108   :  { %853 = vst.msk [vmem:[%s1568_s3 + $0x10] sm:$0xff] %vm850_vm1, %v827_v46  ;;  %v828_v50 = vmax.f32 %v735_v47, 0.0  ;;  %v1001_v51 = vadd.f32 %v1000_v49, %v999_v48  ;;  %v1002_v52 = vpop.f32.mrb[10].mxu0 }
 0x109   :  { %v1003_v53 = vpop.f32.mrb[11].mxu0  ;;  %v739_v54 = vpop.f32.mrb[8].mxu1 }
 0x10a   :  { %854 = vst.msk [vmem:[%s1568_s3 + $0x18] sm:$0xff] %vm850_vm1, %v828_v50  ;;  %v1004_v55 = vadd.f32 %v1003_v53, %v1002_v52  ;;  %v604_v56 = vadd.f32 %v1001_v51, %v1438_v18  ;;  %v741_v57 = vpop.f32.mrb[9].mxu1 }
 0x10b   :  { %v742_v58 = vpop.f32.mrb[10].mxu1 }
 0x10c   :  { %v740_v59 = vadd.f32 %v739_v54, %v604_v56  ;;  %v607_v60 = vadd.f32 %v1004_v55, %v1438_v18  ;;  %v744_v61 = vpop.f32.mrb[11].mxu1 }
 0x10e   :  { %v829_v62 = vmax.f32 %v740_v59, 0.0  ;;  %v743_v63 = vadd.f32 %v742_v58, %v607_v60  ;;  %v1005_v0 = vpop.f32.mrb[12].mxu0 }
 0x10f   :  { %v1006_v1 = vpop.f32.mrb[13].mxu0 }
 0x110   :  { %855 = vst.msk [vmem:[%s1568_s3 + $0x20] sm:$0xff] %vm850_vm1, %v829_v62  ;;  %v830_v2 = vmax.f32 %v743_v63, 0.0  ;;  %v1007_v3 = vadd.f32 %v1006_v1, %v1005_v0  ;;  %v1008_v4 = vpop.f32.mrb[14].mxu0 }
 0x111   :  { %v1009_v5 = vpop.f32.mrb[15].mxu0  ;;  %v747_v6 = vpop.f32.mrb[12].mxu1 }
 0x112   :  { %856 = vst.msk [vmem:[%s1568_s3 + $0x28] sm:$0xff] %vm850_vm1, %v830_v2  ;;  %v1010_v7 = vadd.f32 %v1009_v5, %v1008_v4  ;;  %v612_v8 = vadd.f32 %v1007_v3, %v1438_v18  ;;  %v749_v9 = vpop.f32.mrb[13].mxu1 }
 0x113   :  { %v750_v10 = vpop.f32.mrb[14].mxu1 }
 0x114   :  { %v748_v11 = vadd.f32 %v747_v6, %v612_v8  ;;  %v615_v12 = vadd.f32 %v1010_v7, %v1438_v18  ;;  %v752_v13 = vpop.f32.mrb[15].mxu1 }
 0x116   :  { %v831_v14 = vmax.f32 %v748_v11, 0.0  ;;  %v751_v15 = vadd.f32 %v750_v10, %v615_v12  ;;  %v1011_v16 = vpop.f32.mrb[16].mxu0 }
 0x117   :  { %v1012_v17 = vpop.f32.mrb[17].mxu0 }
 0x118   :  { %857 = vst.msk [vmem:[%s1568_s3 + $0x30] sm:$0xff] %vm850_vm1, %v831_v14  ;;  %v832_v19 = vmax.f32 %v751_v15, 0.0  ;;  %v1013_v20 = vadd.f32 %v1012_v17, %v1011_v16  ;;  %v1014_v21 = vpop.f32.mrb[18].mxu0 }
 0x119   :  { %v1015_v22 = vpop.f32.mrb[19].mxu0  ;;  %v755_v23 = vpop.f32.mrb[16].mxu1 }
 0x11a   :  { %858 = vst.msk [vmem:[%s1568_s3 + $0x38] sm:$0xff] %vm850_vm1, %v832_v19  ;;  %v1016_v24 = vadd.f32 %v1015_v22, %v1014_v21  ;;  %v620_v25 = vadd.f32 %v1013_v20, %v1438_v18  ;;  %v757_v26 = vpop.f32.mrb[17].mxu1 }
 0x11b   :  { %v758_v27 = vpop.f32.mrb[18].mxu1 }
 0x11c   :  { %v756_v28 = vadd.f32 %v755_v23, %v620_v25  ;;  %v623_v29 = vadd.f32 %v1016_v24, %v1438_v18  ;;  %v760_v30 = vpop.f32.mrb[19].mxu1 }
 0x11e   :  { %v833_v31 = vmax.f32 %v756_v28, 0.0  ;;  %v759_v32 = vadd.f32 %v758_v27, %v623_v29  ;;  %v1017_v33 = vpop.f32.mrb[20].mxu0 }
 0x11f   :  { %v1018_v34 = vpop.f32.mrb[21].mxu0 }
 0x120   :  { %859 = vst.msk [vmem:[%s1568_s3 + $0x40] sm:$0xff] %vm850_vm1, %v833_v31  ;;  %v834_v35 = vmax.f32 %v759_v32, 0.0  ;;  %v1019_v36 = vadd.f32 %v1018_v34, %v1017_v33  ;;  %v1020_v37 = vpop.f32.mrb[22].mxu0 }
 0x121   :  { %v1021_v38 = vpop.f32.mrb[23].mxu0  ;;  %v763_v39 = vpop.f32.mrb[20].mxu1 }
 0x122   :  { %860 = vst.msk [vmem:[%s1568_s3 + $0x48] sm:$0xff] %vm850_vm1, %v834_v35  ;;  %v1022_v40 = vadd.f32 %v1021_v38, %v1020_v37  ;;  %v628_v41 = vadd.f32 %v1019_v36, %v1438_v18  ;;  %v765_v42 = vpop.f32.mrb[21].mxu1 }
 0x123   :  { %v766_v43 = vpop.f32.mrb[22].mxu1 }
 0x124   :  { %v764_v44 = vadd.f32 %v763_v39, %v628_v41  ;;  %v631_v45 = vadd.f32 %v1022_v40, %v1438_v18  ;;  %v768_v46 = vpop.f32.mrb[23].mxu1 }
 0x126   :  { %v835_v47 = vmax.f32 %v764_v44, 0.0  ;;  %v767_v48 = vadd.f32 %v766_v43, %v631_v45  ;;  %v1023_v49 = vpop.f32.mrb[24].mxu0 }
 0x127   :  { %v1024_v50 = vpop.f32.mrb[25].mxu0 }
 0x128   :  { %861 = vst.msk [vmem:[%s1568_s3 + $0x50] sm:$0xff] %vm850_vm1, %v835_v47  ;;  %v836_v51 = vmax.f32 %v767_v48, 0.0  ;;  %v1025_v52 = vadd.f32 %v1024_v50, %v1023_v49  ;;  %v1026_v53 = vpop.f32.mrb[26].mxu0 }
 0x129   :  { %v1027_v54 = vpop.f32.mrb[27].mxu0  ;;  %v771_v55 = vpop.f32.mrb[24].mxu1 }
 0x12a   :  { %862 = vst.msk [vmem:[%s1568_s3 + $0x58] sm:$0xff] %vm850_vm1, %v836_v51  ;;  %v1028_v56 = vadd.f32 %v1027_v54, %v1026_v53  ;;  %v636_v57 = vadd.f32 %v1025_v52, %v1438_v18  ;;  %v773_v58 = vpop.f32.mrb[25].mxu1 }
 0x12b   :  { %v774_v59 = vpop.f32.mrb[26].mxu1 }
 0x12c   :  { %v772_v60 = vadd.f32 %v771_v55, %v636_v57  ;;  %v639_v61 = vadd.f32 %v1028_v56, %v1438_v18  ;;  %v776_v62 = vpop.f32.mrb[27].mxu1 }
 0x12e   :  { %v837_v63 = vmax.f32 %v772_v60, 0.0  ;;  %v775_v0 = vadd.f32 %v774_v59, %v639_v61  ;;  %v1029_v1 = vpop.f32.mrb[28].mxu0 }
 0x12f   :  { %v1030_v2 = vpop.f32.mrb[29].mxu0 }
 0x130   :  { %863 = vst.msk [vmem:[%s1568_s3 + $0x60] sm:$0xff] %vm850_vm1, %v837_v63  ;;  %v838_v3 = vmax.f32 %v775_v0, 0.0  ;;  %v1031_v4 = vadd.f32 %v1030_v2, %v1029_v1  ;;  %v1032_v5 = vpop.f32.mrb[30].mxu0 }
 0x131   :  { %v1033_v6 = vpop.f32.mrb[31].mxu0  ;;  %v779_v7 = vpop.f32.mrb[28].mxu1 }
 0x132   :  { %864 = vst.msk [vmem:[%s1568_s3 + $0x68] sm:$0xff] %vm850_vm1, %v838_v3  ;;  %v1034_v8 = vadd.f32 %v1033_v6, %v1032_v5  ;;  %v644_v9 = vadd.f32 %v1031_v4, %v1438_v18  ;;  %v781_v10 = vpop.f32.mrb[29].mxu1 }
 0x133   :  { %v782_v11 = vpop.f32.mrb[30].mxu1 }
 0x134   :  { %v780_v12 = vadd.f32 %v779_v7, %v644_v9  ;;  %v647_v13 = vadd.f32 %v1034_v8, %v1438_v18  ;;  %v784_v14 = vpop.f32.mrb[31].mxu1 }
 0x136   :  { %v839_v15 = vmax.f32 %v780_v12, 0.0  ;;  %v783_v16 = vadd.f32 %v782_v11, %v647_v13  ;;  %v1035_v17 = vpop.f32.mrb[32].mxu0 }
 0x137   :  { %v1036_v19 = vpop.f32.mrb[33].mxu0 }
 0x138   :  { %865 = vst.msk [vmem:[%s1568_s3 + $0x70] sm:$0xff] %vm850_vm1, %v839_v15  ;;  %v840_v20 = vmax.f32 %v783_v16, 0.0  ;;  %v1037_v21 = vadd.f32 %v1036_v19, %v1035_v17  ;;  %v1038_v22 = vpop.f32.mrb[34].mxu0 }
 0x139   :  { %v1039_v23 = vpop.f32.mrb[35].mxu0  ;;  %v787_v24 = vpop.f32.mrb[32].mxu1 }
 0x13a   :  { %866 = vst.msk [vmem:[%s1568_s3 + $0x78] sm:$0xff] %vm850_vm1, %v840_v20  ;;  %v1040_v25 = vadd.f32 %v1039_v23, %v1038_v22  ;;  %v652_v26 = vadd.f32 %v1037_v21, %v1438_v18  ;;  %v789_v27 = vpop.f32.mrb[33].mxu1 }
 0x13b   :  { %v790_v28 = vpop.f32.mrb[34].mxu1 }
 0x13c   :  { %v788_v29 = vadd.f32 %v787_v24, %v652_v26  ;;  %v655_v30 = vadd.f32 %v1040_v25, %v1438_v18  ;;  %v792_v31 = vpop.f32.mrb[35].mxu1 }
 0x13e   :  { %v841_v32 = vmax.f32 %v788_v29, 0.0  ;;  %v791_v33 = vadd.f32 %v790_v28, %v655_v30  ;;  %v1041_v34 = vpop.f32.mrb[36].mxu0 }
 0x13f   :  { %v1042_v35 = vpop.f32.mrb[37].mxu0 }
 0x140   :  { %867 = vst.msk [vmem:[%s1568_s3 + $0x80] sm:$0xff] %vm850_vm1, %v841_v32  ;;  %v842_v36 = vmax.f32 %v791_v33, 0.0  ;;  %v1043_v37 = vadd.f32 %v1042_v35, %v1041_v34  ;;  %v1044_v38 = vpop.f32.mrb[38].mxu0 }
 0x141   :  { %v1045_v39 = vpop.f32.mrb[39].mxu0  ;;  %v795_v40 = vpop.f32.mrb[36].mxu1 }
 0x142   :  { %868 = vst.msk [vmem:[%s1568_s3 + $0x88] sm:$0xff] %vm850_vm1, %v842_v36  ;;  %v1046_v41 = vadd.f32 %v1045_v39, %v1044_v38  ;;  %v660_v42 = vadd.f32 %v1043_v37, %v1438_v18  ;;  %v797_v43 = vpop.f32.mrb[37].mxu1 }
 0x143   :  { %v798_v44 = vpop.f32.mrb[38].mxu1 }
 0x144   :  { %v796_v45 = vadd.f32 %v795_v40, %v660_v42  ;;  %v663_v46 = vadd.f32 %v1046_v41, %v1438_v18  ;;  %v800_v47 = vpop.f32.mrb[39].mxu1 }
 0x146   :  { %v843_v48 = vmax.f32 %v796_v45, 0.0  ;;  %v799_v49 = vadd.f32 %v798_v44, %v663_v46  ;;  %v1047_v50 = vpop.f32.mrb[40].mxu0 }
 0x147   :  { %v1048_v51 = vpop.f32.mrb[41].mxu0 }
 0x148   :  { %869 = vst.msk [vmem:[%s1568_s3 + $0x90] sm:$0xff] %vm850_vm1, %v843_v48  ;;  %v844_v52 = vmax.f32 %v799_v49, 0.0  ;;  %v1049_v53 = vadd.f32 %v1048_v51, %v1047_v50  ;;  %v1050_v54 = vpop.f32.mrb[42].mxu0 }
 0x149   :  { %v1051_v55 = vpop.f32.mrb[43].mxu0  ;;  %v803_v56 = vpop.f32.mrb[40].mxu1 }
 0x14a   :  { %870 = vst.msk [vmem:[%s1568_s3 + $0x98] sm:$0xff] %vm850_vm1, %v844_v52  ;;  %v1052_v57 = vadd.f32 %v1051_v55, %v1050_v54  ;;  %v668_v58 = vadd.f32 %v1049_v53, %v1438_v18  ;;  %v805_v59 = vpop.f32.mrb[41].mxu1 }
 0x14b   :  { %v806_v60 = vpop.f32.mrb[42].mxu1 }
 0x14c   :  { %v804_v61 = vadd.f32 %v803_v56, %v668_v58  ;;  %v671_v62 = vadd.f32 %v1052_v57, %v1438_v18  ;;  %v808_v63 = vpop.f32.mrb[43].mxu1 }
 0x14e   :  { %v845_v0 = vmax.f32 %v804_v61, 0.0  ;;  %v807_v1 = vadd.f32 %v806_v60, %v671_v62  ;;  %v1053_v2 = vpop.f32.mrb[44].mxu0 }
 0x14f   :  { %v1054_v3 = vpop.f32.mrb[45].mxu0 }
 0x150   :  { %871 = vst.msk [vmem:[%s1568_s3 + $0xa0] sm:$0xff] %vm850_vm1, %v845_v0  ;;  %v846_v4 = vmax.f32 %v807_v1, 0.0  ;;  %v1055_v5 = vadd.f32 %v1054_v3, %v1053_v2  ;;  %v1056_v6 = vpop.f32.mrb[46].mxu0 }
 0x151   :  { %v1057_v7 = vpop.f32.mrb[47].mxu0  ;;  %v811_v8 = vpop.f32.mrb[44].mxu1 }
 0x152   :  { %872 = vst.msk [vmem:[%s1568_s3 + $0xa8] sm:$0xff] %vm850_vm1, %v846_v4  ;;  %v1058_v9 = vadd.f32 %v1057_v7, %v1056_v6  ;;  %v676_v10 = vadd.f32 %v1055_v5, %v1438_v18  ;;  %v813_v11 = vpop.f32.mrb[45].mxu1 }
 0x153   :  { %v814_v12 = vpop.f32.mrb[46].mxu1 }
 0x154   :  { %v812_v13 = vadd.f32 %v811_v8, %v676_v10  ;;  %v679_v14 = vadd.f32 %v1058_v9, %v1438_v18  ;;  %v816_v15 = vpop.f32.mrb[47].mxu1 }
 0x156   :  { %v847_v16 = vmax.f32 %v812_v13, 0.0  ;;  %v815_v17 = vadd.f32 %v814_v12, %v679_v14  ;;  %v1059_v19 = vpop.f32.mrb[48].mxu0 }
 0x157   :  { %v1060_v20 = vpop.f32.mrb[49].mxu0 }
 0x158   :  { %873 = vst.msk [vmem:[%s1568_s3 + $0xb0] sm:$0xff] %vm850_vm1, %v847_v16  ;;  %v848_v21 = vmax.f32 %v815_v17, 0.0  ;;  %v1061_v22 = vadd.f32 %v1060_v20, %v1059_v19  ;;  %v1062_v23 = vpop.f32.mrb[50].mxu0 }
 0x159   :  { %v1063_v24 = vpop.f32.mrb[51].mxu0  ;;  %v819_v25 = vpop.f32.mrb[48].mxu1 }
 0x15a   :  { %874 = vst.msk [vmem:[%s1568_s3 + $0xb8] sm:$0xff] %vm850_vm1, %v848_v21  ;;  %v684_v26 = vadd.f32 %v1061_v22, %v1438_v18  ;;  %v821_v27 = vpop.f32.mrb[49].mxu1 }
 0x15b   :  { %v822_v28 = vpop.f32.mrb[50].mxu1 }
 0x15c   :  { %v820_v29 = vadd.f32 %v819_v25, %v684_v26  ;;  %v823_v30 = vpop.f32.mrb[51].mxu1 }
 0x15e   :  { %v849_v31 = vmax.f32 %v820_v29, 0.0 }
 0x160   :  { %875 = vst.msk [vmem:[%s1568_s3 + $0xc0] sm:$0xff] %vm850_vm1, %v849_v31 }

// kernel: c_lenet_pcnn_forward.5
= control target key start
LH: loop header
LB: loop body
LE: loop exit
PB: predicated region body
PF: predicated region fallthrough
CT: control target
= control target key end

     0   :  { %v141_v29 = vlaneseq  ;;  %v3570_v33 = vmov 1966171168   ;;  %v3571_v40 = vmov 0.0   ;;  %vm3572_vm0 = vmmov 0   ;;  %s4474_s0 = inlined_call_operand.vmem [shape: bf16[2,800], index: 0, kind: input, shape index: {}]   ;;  %s4475_s1 = inlined_call_operand.vmem [shape: bf16[800,64], index: 1, kind: input, shape index: {}]   ;;  %s4476_s2 = inlined_call_operand.vmem [shape: f32[1,64], index: 2, kind: input, shape index: {}]   ;;  %s4477_s3 = inlined_call_operand.vmem [shape: bf16[64,2048], index: 3, kind: input, shape index: {}]   ;;  %s4478_s4 = inlined_call_operand.vmem [shape: f32[1,2048], index: 4, kind: input, shape index: {}]   ;;  %s4479_s5 = inlined_call_operand.vmem [shape: bf16[2048,10], index: 5, kind: input, shape index: {}]   ;;  %s4480_s6 = inlined_call_operand.vmem [shape: f32[1,10], index: 6, kind: input, shape index: {}]   ;;  %s4481_s7 = inlined_call_operand.hbm [shape: f32[2,10], index: 7, kind: output, shape index: {}]  }
   0x1   :  { %v3367_v0 = vld [vmem:[%s4475_s1 + $0x40] sm:$0xff]   ;;  %v3371_v4 = vld [vmem:[%s4475_s1 + $0x48] sm:$0xff]   ;;  %v3375_v8 = vld [vmem:[%s4475_s1 + $0x50] sm:$0xff]   ;;  %v139_v34 = vunpack.c.l.s4 %v3570_v33  ;;  %vm491_vm1 = vcmask 261120  }
   0x2   :  { %v3368_v1 = vld [vmem:[%s4475_s1] sm:$0xff]   ;;  %3109 = vmatprep.subr.bf16.mxu0 %v3367_v0  ;;  %v3372_v5 = vld [vmem:[%s4475_s1 + $0x8] sm:$0xff]   ;;  %v3376_v9 = vld [vmem:[%s4475_s1 + $0x10] sm:$0xff]   ;;  %v3711_v35 = vshrl.u32 %v141_v29, 7 }
   0x3   :  { %v3369_v2 = vld [vmem:[%s4475_s1 + $0xc0] sm:$0xff]   ;;  %3110 = vmatpush3.bf16.msra.mxu0 %v3368_v1  ;;  %v3373_v6 = vld [vmem:[%s4475_s1 + $0xc8] sm:$0xff]   ;;  %v3377_v10 = vld [vmem:[%s4475_s1 + $0xd0] sm:$0xff]   ;;  %v140_v39 = vunpack.c.0.s8 %v139_v34 }
   0x4   :  { %v3370_v3 = vld [vmem:[%s4475_s1 + $0x80] sm:$0xff]   ;;  %3131 = vmatprep.subr.bf16.mxu1 %v3369_v2  ;;  %3111 = vmatprep.subr.bf16.mxu0 %v3371_v4  ;;  %v3374_v7 = vld [vmem:[%s4475_s1 + $0x88] sm:$0xff]   ;;  %v3378_v11 = vld [vmem:[%s4475_s1 + $0x90] sm:$0xff]  }
   0x5   :  { %3132 = vmatpush3.bf16.msra.mxu1 %v3370_v3  ;;  %v3379_v12 = vld [vmem:[%s4475_s1 + $0x58] sm:$0xff]   ;;  %v3383_v16 = vld [vmem:[%s4475_s1 + $0x60] sm:$0xff]   ;;  %v3387_v20 = vld [vmem:[%s4475_s1 + $0x68] sm:$0xff]   ;;  %v143_v41 = vsub.s32 %v140_v39, %v3711_v35 }
   0x6   :  { %3133 = vmatprep.subr.bf16.mxu1 %v3373_v6  ;;  %v3380_v13 = vld [vmem:[%s4475_s1 + $0x18] sm:$0xff]   ;;  %v3384_v17 = vld [vmem:[%s4475_s1 + $0x20] sm:$0xff]   ;;  %v3388_v21 = vld [vmem:[%s4475_s1 + $0x28] sm:$0xff]  }
   0x7   :  { %3112 = vmatpush3.bf16.msra.mxu0 %v3372_v5  ;;  %v3381_v14 = vld [vmem:[%s4475_s1 + $0xd8] sm:$0xff]   ;;  %v3385_v18 = vld [vmem:[%s4475_s1 + $0xe0] sm:$0xff]   ;;  %v3389_v22 = vld [vmem:[%s4475_s1 + $0xe8] sm:$0xff]  }
   0x8   :  { %3113 = vmatprep.subr.bf16.mxu0 %v3375_v8  ;;  %v3382_v15 = vld [vmem:[%s4475_s1 + $0x98] sm:$0xff]   ;;  %v3386_v19 = vld [vmem:[%s4475_s1 + $0xa0] sm:$0xff]   ;;  %v3390_v23 = vld [vmem:[%s4475_s1 + $0xa8] sm:$0xff]  }
   0x9   :  { %3134 = vmatpush3.bf16.msra.mxu1 %v3374_v7  ;;  %v3391_v24 = vld [vmem:[%s4475_s1 + $0x70] sm:$0xff]   ;;  %v3395_v28 = vld [vmem:[%s4475_s1 + $0x78] sm:$0xff]   ;;  %v28_v32 = vld [vmem:[%s4474_s0] sm:$0x7f] }
   0xa   :  { %3135 = vmatprep.subr.bf16.mxu1 %v3377_v10  ;;  %v3392_v25 = vld [vmem:[%s4475_s1 + $0x30] sm:$0xff]   ;;  %v3396_v30 = vld [vmem:[%s4475_s1 + $0x38] sm:$0xff]   ;;  %v3400_v37 = vld [vmem:[%s4475_s1 + $0x140] sm:$0xff]   ;;  %v137_v38 = vcombine.high %v28_v32, %v28_v32  ;;  %v144_v42 = vrot.slane %v28_v32, %v143_v41 }
   0xb   :  { %3114 = vmatpush3.bf16.msra.mxu0 %v3376_v9  ;;  %v3393_v26 = vld [vmem:[%s4475_s1 + $0xf0] sm:$0xff]   ;;  %v3397_v31 = vld [vmem:[%s4475_s1 + $0xf8] sm:$0xff]   ;;  %v3401_v48 = vld [vmem:[%s4475_s1 + $0x100] sm:$0xff]  }
   0xc   :  { %3115 = vmatprep.subr.bf16.mxu0 %v3379_v12  ;;  %v3394_v27 = vld [vmem:[%s4475_s1 + $0xb0] sm:$0xff]   ;;  %v3399_v36 = vld [vmem:[%s4475_s1 + $0xb8] sm:$0xff]   ;;  %v151_v43 = vrot.slane %v137_v38, %v143_v41  ;;  %v152_v44 = vcombine.high %v144_v42, %v144_v42  ;;  %v160_v45 = vrot.slane %v144_v42, %v143_v41  ;;  %v3402_v50 = vld [vmem:[%s4475_s1 + $0x148] sm:$0xff]  }
   0xd   :  { %3136 = vmatpush3.bf16.msra.mxu1 %v3378_v11  ;;  %v3403_v53 = vld [vmem:[%s4475_s1 + $0x108] sm:$0xff]   ;;  %v3404_v54 = vld [vmem:[%s4475_s1 + $0x150] sm:$0xff]   ;;  %v3414_v55 = vld [vmem:[%s4475_s1 + $0x180] sm:$0xff]  }
   0xe   :  { %3137 = vmatprep.subr.bf16.mxu1 %v3381_v14  ;;  %v153_v46 = vcombine.high %v151_v43, %v151_v43  ;;  %v174_v47 = vrot.slane %v152_v44, %v143_v41  ;;  %v182_v49 = vcombine.high %v160_v45, %v160_v45  ;;  %v3405_v56 = vld [vmem:[%s4475_s1 + $0x110] sm:$0xff]   ;;  %v167_v57 = vrot.slane %v151_v43, %v143_v41  ;;  %v3406_v58 = vld [vmem:[%s4475_s1 + $0x158] sm:$0xff]   ;;  %v3417_v59 = vld [vmem:[%s4475_s1 + $0x188] sm:$0xff]  }
   0xf   :  { %3116 = vmatpush3.bf16.msra.mxu0 %v3380_v13  ;;  %v3407_v60 = vld [vmem:[%s4475_s1 + $0x118] sm:$0xff]   ;;  %v3408_v62 = vld [vmem:[%s4475_s1 + $0x160] sm:$0xff]   ;;  %v3410_v0 = vld [vmem:[%s4475_s1 + $0x168] sm:$0xff]  }
  0x10   :  { %3117 = vmatprep.subr.bf16.mxu0 %v3383_v16  ;;  %527 = vmatprep.mubr.bf16.mxu0 %v174_v47  ;;  %v184_v51 = vcombine.high %v174_v47, %v174_v47  ;;  %v181_v52 = vrot.slane %v153_v46, %v143_v41  ;;  %v183_v61 = vcombine.high %v167_v57, %v167_v57  ;;  %v3409_v63 = vld [vmem:[%s4475_s1 + $0x120] sm:$0xff]   ;;  %v3411_v1 = vld [vmem:[%s4475_s1 + $0x128] sm:$0xff]   ;;  %v3412_v2 = vld [vmem:[%s4475_s1 + $0x170] sm:$0xff]  }
  0x11   :  { %3138 = vmatpush3.bf16.msra.mxu1 %v3382_v15  ;;  %v3413_v3 = vld [vmem:[%s4475_s1 + $0x130] sm:$0xff]   ;;  %v3415_v4 = vld [vmem:[%s4475_s1 + $0x178] sm:$0xff]   ;;  %v657_v6 = vld [vmem:[%s4477_s3] sm:$0xff] }
  0x12   :  { %3139 = vmatprep.subr.bf16.mxu1 %v3385_v18  ;;  %567 = vmatprep.mubr.bf16.mxu1 %v184_v51  ;;  %v3416_v5 = vld [vmem:[%s4475_s1 + $0x138] sm:$0xff]   ;;  %v665_v7 = vld [vmem:[%s4477_s3 + $0x40] sm:$0xff]  ;;  %v659_v8 = vld [vmem:[%s4477_s3 + $0x10] sm:$0xff] }
  0x13   :  { %3118 = vmatpush3.bf16.msra.mxu0 %v3384_v17  ;;  %v2908_v9 = vcombine.low %v657_v6, %v665_v7  ;;  %v2909_v10 = vcombine.high %v657_v6, %v665_v7  ;;  %v667_v11 = vld [vmem:[%s4477_s3 + $0x50] sm:$0xff]  ;;  %v673_v12 = vld [vmem:[%s4477_s3 + $0x80] sm:$0xff] }
  0x14   :  { %3119 = vmatprep.subr.bf16.mxu0 %v3387_v20  ;;  %v681_v13 = vld [vmem:[%s4477_s3 + $0xc0] sm:$0xff]  ;;  %v2912_v14 = vcombine.low %v659_v8, %v667_v11  ;;  %v2913_v15 = vcombine.high %v659_v8, %v667_v11  ;;  %v675_v17 = vld [vmem:[%s4477_s3 + $0x90] sm:$0xff] }
  0x15   :  { %3140 = vmatpush3.bf16.msra.mxu1 %v3386_v19  ;;  %v2925_v16 = vcombine.high %v673_v12, %v681_v13  ;;  %v683_v18 = vld [vmem:[%s4477_s3 + $0xd0] sm:$0xff]  ;;  %v2924_v20 = vcombine.low %v673_v12, %v681_v13 }
  0x16   :  { %3141 = vmatprep.subr.bf16.mxu1 %v3389_v22  ;;  %v2929_v19 = vcombine.high %v675_v17, %v683_v18 }
  0x17   :  { %3120 = vmatpush3.bf16.msra.mxu0 %v3388_v21  ;;  %v2928_v21 = vcombine.low %v675_v17, %v683_v18 }
  0x18   :  { %3121 = vmatprep.subr.bf16.mxu0 %v3391_v24 }
  0x19   :  { %3142 = vmatpush3.bf16.msra.mxu1 %v3390_v23 }
  0x1a   :  { %3143 = vmatprep.subr.bf16.mxu1 %v3393_v26 }
  0x1b   :  { %3122 = vmatpush3.bf16.msra.mxu0 %v3392_v25 }
  0x1c   :  { %3123 = vmatprep.subr.bf16.mxu0 %v3395_v28 }
  0x1d   :  { %3144 = vmatpush3.bf16.msra.mxu1 %v3394_v27 }
  0x1e   :  { %3145 = vmatprep.subr.bf16.mxu1 %v3397_v31 }
  0x1f   :  { %3124 = vmatpush3.bf16.msra.mxu0 %v3396_v30 }
  0x20   :  { %3153 = vmatprep.subr.bf16.mxu0 %v3400_v37 }
  0x21   :  { %3146 = vmatpush3.bf16.msra.mxu1 %v3399_v36 }
  0x22   :  { %3354 = vmatprep.subr.bf16.mxu1 %v3571_v40  ;;  %528 = vmatmul.mubr.bf16.vlgmr.msra.gmra.mrb[0].mxu0 %v160_v45 }
  0x23   :  { %3154 = vmatpush3.bf16.msra.mxu0 %v3401_v48  ;;  %607 = vmatprep.mubr.bf16.mxu0 %v181_v52 }
  0x24   :  { %568 = vmatmul.mubr.bf16.vlgmr.msra.gmra.mrb[0].mxu1 %v182_v49  ;;  %3155 = vmatprep.subr.bf16.mxu0 %v3402_v50 }
  0x25   :  { %3358 = vmatprep.mubr.msk.bf16.mxu1 %vm3572_vm0, %v3571_v40  ;;  %3355 = vmatpush3.bf16.msra.mxu1 %v3414_v55 }
  0x26   :  { %3356 = vmatprep.subr.bf16.mxu1 %v3571_v40 }
  0x27   :  { %3156 = vmatpush3.bf16.msra.mxu0 %v3403_v53 }
  0x28   :  { %3157 = vmatprep.subr.bf16.mxu0 %v3404_v54 }
  0x29   :  { %3357 = vmatpush3.bf16.msra.mxu1 %v3417_v59 }
  0x2a   :  { %1129 = vmatprep.subr.bf16.mxu1 %v2909_v10 }
  0x2b   :  { %3158 = vmatpush3.bf16.msra.mxu0 %v3405_v56 }
  0x2c   :  { %3159 = vmatprep.subr.bf16.mxu0 %v3406_v58  ;;  %3359 = vmatmul.mubr.msk.bf16.vlgmr.msra.gmra.mrb[4].mxu1 %vm491_vm1, %v183_v61 }
  0x2d   :  { %1130 = vmatpush1.bf16.msra.mxu1 %v2908_v9 }
  0x2e   :  { %1131 = vmatprep.subr.bf16.mxu1 %v2925_v16 }
  0x2f   :  { %3160 = vmatpush3.bf16.msra.mxu0 %v3407_v60 }
  0x30   :  { %3161 = vmatprep.subr.bf16.mxu0 %v3408_v62 }
  0x33   :  { %3162 = vmatpush3.bf16.msra.mxu0 %v3409_v63 }
  0x34   :  { %3163 = vmatprep.subr.bf16.mxu0 %v3410_v0 }
  0x37   :  { %3164 = vmatpush3.bf16.msra.mxu0 %v3411_v1 }
  0x38   :  { %3165 = vmatprep.subr.bf16.mxu0 %v3412_v2 }
  0x3b   :  { %3166 = vmatpush3.bf16.msra.mxu0 %v3413_v3 }
  0x3c   :  { %3167 = vmatprep.subr.bf16.mxu0 %v3415_v4 }
  0x3f   :  { %3168 = vmatpush3.bf16.msra.mxu0 %v3416_v5 }
  0x40   :  { %1211 = vmatprep.subr.bf16.mxu0 %v2913_v15 }
  0x42   :  { %608 = vmatmul.mubr.bf16.vlgmr.msra.gmra.mrb[4].mxu0 %v167_v57 }
  0x43   :  { %1212 = vmatpush1.bf16.msra.mxu0 %v2912_v14 }
  0x44   :  { %12 = vsyncpa [#allocation3], 0  ;;  %1213 = vmatprep.subr.bf16.mxu0 %v2929_v19  ;;  %1132 = vmatpush1.bf16.msra.mxu1 %v2924_v20  ;;  %v689_v22 = vld [vmem:[%s4477_s3 + $0x100] sm:$0xff]  ;;  %v691_v24 = vld [vmem:[%s4477_s3 + $0x110] sm:$0xff]  ;;  %v3573_v47 = vmov 0   ;;  %vm1125_vm2 = vcmask 523264  }
  0x45   :  { %v697_v23 = vld [vmem:[%s4477_s3 + $0x140] sm:$0xff]  ;;  %v699_v26 = vld [vmem:[%s4477_s3 + $0x150] sm:$0xff]  ;;  %v658_v39 = vld [vmem:[%s4477_s3 + $0x8] sm:$0xff]  ;;  %1161 = vmatprep.mubr.bf16.mxu1 %v3573_v47  ;;  %1243 = vmatprep.mubr.bf16.mxu0 %v3573_v47  ;;  %vm2840_vm3 = vcmask 74752  }
  0x46   :  { %v2941_v25 = vcombine.high %v689_v22, %v697_v23  ;;  %v2940_v27 = vcombine.low %v689_v22, %v697_v23  ;;  %v2944_v28 = vcombine.low %v691_v24, %v699_v26  ;;  %v2945_v29 = vcombine.high %v691_v24, %v699_v26  ;;  %v705_v30 = vld [vmem:[%s4477_s3 + $0x180] sm:$0xff]  ;;  %v707_v32 = vld [vmem:[%s4477_s3 + $0x190] sm:$0xff]  ;;  %v666_v40 = vld [vmem:[%s4477_s3 + $0x48] sm:$0xff] }
  0x47   :  { %1214 = vmatpush1.bf16.msra.mxu0 %v2928_v21  ;;  %v713_v31 = vld [vmem:[%s4477_s3 + $0x1c0] sm:$0xff]  ;;  %v715_v34 = vld [vmem:[%s4477_s3 + $0x1d0] sm:$0xff]  ;;  %v2911_v42 = vcombine.high %v658_v39, %v666_v40  ;;  %v2910_v44 = vcombine.low %v658_v39, %v666_v40  ;;  %v674_v8 = vld [vmem:[%s4477_s3 + $0x88] sm:$0xff] }
  0x48   :  { %1133 = vmatprep.subr.bf16.mxu1 %v2941_v25  ;;  %1215 = vmatprep.subr.bf16.mxu0 %v2945_v29  ;;  %v2957_v33 = vcombine.high %v705_v30, %v713_v31  ;;  %v2956_v36 = vcombine.low %v705_v30, %v713_v31  ;;  %v2960_v37 = vcombine.low %v707_v32, %v715_v34  ;;  %v661_v41 = vld [vmem:[%s4477_s3 + $0x20] sm:$0xff]  ;;  %v682_v9 = vld [vmem:[%s4477_s3 + $0xc8] sm:$0xff] }
  0x49   :  { %1134 = vmatpush1.bf16.msra.mxu1 %v2940_v27  ;;  %v2961_v38 = vcombine.high %v707_v32, %v715_v34  ;;  %v669_v43 = vld [vmem:[%s4477_s3 + $0x60] sm:$0xff]  ;;  %v2927_v14 = vcombine.high %v674_v8, %v682_v9  ;;  %v690_v16 = vld [vmem:[%s4477_s3 + $0x108] sm:$0xff]  ;;  %v2926_v20 = vcombine.low %v674_v8, %v682_v9  ;;  %v660_v32 = vld [vmem:[%s4477_s3 + $0x18] sm:$0xff] }
  0x4a   :  { %1135 = vmatprep.subr.bf16.mxu1 %v2957_v33  ;;  %v2916_v45 = vcombine.low %v661_v41, %v669_v43  ;;  %v2917_v46 = vcombine.high %v661_v41, %v669_v43  ;;  %v2856_v49 = vld [vmem:[%s4476_s2] ss:$0 sm:$0xff]  ;;  %v698_v17 = vld [vmem:[%s4477_s3 + $0x148] sm:$0xff]  ;;  %v668_v33 = vld [vmem:[%s4477_s3 + $0x58] sm:$0xff] }
  0x4b   :  { %1216 = vmatpush1.bf16.msra.mxu0 %v2944_v28  ;;  %v677_v10 = vld [vmem:[%s4477_s3 + $0xa0] sm:$0xff]  ;;  %v2943_v22 = vcombine.high %v690_v16, %v698_v17  ;;  %v706_v24 = vld [vmem:[%s4477_s3 + $0x188] sm:$0xff]  ;;  %v2942_v28 = vcombine.low %v690_v16, %v698_v17  ;;  %v663_v34 = vld [vmem:[%s4477_s3 + $0x30] sm:$0xff]  ;;  %v2915_v39 = vcombine.high %v660_v32, %v668_v33 }
  0x4c   :  { %1217 = vmatprep.subr.bf16.mxu0 %v2961_v38  ;;  %v685_v11 = vld [vmem:[%s4477_s3 + $0xe0] sm:$0xff]  ;;  %v714_v25 = vld [vmem:[%s4477_s3 + $0x1c8] sm:$0xff]  ;;  %v676_v41 = vld [vmem:[%s4477_s3 + $0x98] sm:$0xff] }
  0x4d   :  { %1136 = vmatpush1.bf16.msra.mxu1 %v2956_v36  ;;  %v2933_v15 = vcombine.high %v677_v10, %v685_v11  ;;  %v693_v18 = vld [vmem:[%s4477_s3 + $0x120] sm:$0xff]  ;;  %v2932_v21 = vcombine.low %v677_v10, %v685_v11  ;;  %v2959_v30 = vcombine.high %v706_v24, %v714_v25  ;;  %v671_v36 = vld [vmem:[%s4477_s3 + $0x70] sm:$0xff]  ;;  %v678_v8 = vld [vmem:[%s4477_s3 + $0xa8] sm:$0xff] }
  0x4e   :  { %1170 = vmatprep.subr.bf16.mxu1 %v2911_v42  ;;  %v701_v19 = vld [vmem:[%s4477_s3 + $0x160] sm:$0xff]  ;;  %v2921_v40 = vcombine.high %v663_v34, %v671_v36  ;;  %v684_v42 = vld [vmem:[%s4477_s3 + $0xd8] sm:$0xff]  ;;  %v679_v43 = vld [vmem:[%s4477_s3 + $0xb0] sm:$0xff] }
  0x4f   :  { %1218 = vmatpush1.bf16.msra.mxu0 %v2960_v37  ;;  %v2949_v23 = vcombine.high %v693_v18, %v701_v19  ;;  %v709_v26 = vld [vmem:[%s4477_s3 + $0x1a0] sm:$0xff]  ;;  %v2948_v29 = vcombine.low %v693_v18, %v701_v19  ;;  %v2958_v37 = vcombine.low %v706_v24, %v714_v25  ;;  %v686_v9 = vld [vmem:[%s4477_s3 + $0xe8] sm:$0xff]  ;;  %v3423_v25 = vld [vmem:[%s4479_s5 + $0x10] sm:$0xff]  }
  0x50   :  { %1293 = vmatprep.subr.bf16.mxu0 %v2917_v46  ;;  %v717_v27 = vld [vmem:[%s4477_s3 + $0x1e0] sm:$0xff]  ;;  %v2920_v46 = vcombine.low %v663_v34, %v671_v36  ;;  %v2935_v11 = vcombine.high %v678_v8, %v686_v9  ;;  %v3420_v16 = vld [vmem:[%s4479_s5 + $0x48] sm:$0xff]   ;;  %v2934_v17 = vcombine.low %v678_v8, %v686_v9 }
  0x51   :  { %v2965_v31 = vcombine.high %v709_v26, %v717_v27  ;;  %v2964_v38 = vcombine.low %v709_v26, %v717_v27  ;;  %v3421_v19 = vld [vmem:[%s4479_s5 + $0x8] sm:$0xff]   ;;  %v664_v26 = vld [vmem:[%s4477_s3 + $0x38] sm:$0xff]  ;;  %v3427_v34 = vld [vmem:[%s4479_s5 + $0x60] sm:$0xff]  }
  0x52   :  { %v672_v27 = vld [vmem:[%s4477_s3 + $0x78] sm:$0xff]  ;;  %v4098_v8 = vld [vmem:[%s4478_s4 + $0x8] sm:$0xff] }
  0x53   :  { %v2922_v36 = vcombine.low %v664_v26, %v672_v27 }
  0xf5   :  { %v3125_v48 = vpop.f32.mrb[0].mxu0 }
  0xf6   :  { %v3126_v50 = vpop.f32.mrb[1].mxu0 }
  0xf7   :  { %v3127_v51 = vadd.f32 %v3126_v50, %v3125_v48  ;;  %v3128_v52 = vpop.f32.mrb[2].mxu0  ;;  %v3147_v53 = vpop.f32.mrb[0].mxu1  ;;  %v2931_v48 = vcombine.high %v676_v41, %v684_v42  ;;  %v692_v50 = vld [vmem:[%s4477_s3 + $0x118] sm:$0xff] }
  0xf8   :  { %v3129_v54 = vpop.f32.mrb[3].mxu0  ;;  %v3148_v55 = vpop.f32.mrb[1].mxu1  ;;  %v695_v52 = vld [vmem:[%s4477_s3 + $0x130] sm:$0xff] }
  0xf9   :  { %v530_v56 = vadd.f32 %v3127_v51, %v2856_v49  ;;  %v3149_v57 = vadd.f32 %v3148_v55, %v3147_v53  ;;  %v3150_v58 = vpop.f32.mrb[2].mxu1  ;;  %v700_v51 = vld [vmem:[%s4477_s3 + $0x158] sm:$0xff]  ;;  %v703_v53 = vld [vmem:[%s4477_s3 + $0x170] sm:$0xff]  ;;  %v2930_v54 = vcombine.low %v676_v41, %v684_v42  ;;  %v3431_v41 = vld [vmem:[%s4479_s5 + $0x68] sm:$0xff]  }
  0xfa   :  { %v3151_v59 = vpop.f32.mrb[3].mxu1  ;;  %v708_v58 = vld [vmem:[%s4477_s3 + $0x198] sm:$0xff] }
  0xfb   :  { %v570_v60 = vadd.f32 %v3149_v57, %v530_v56  ;;  %v2947_v56 = vcombine.high %v692_v50, %v700_v51  ;;  %v2953_v57 = vcombine.high %v695_v52, %v703_v53  ;;  %v716_v59 = vld [vmem:[%s4477_s3 + $0x1d8] sm:$0xff] }
  0xff   :  { %v649_v61 = vpop.f32.mrb[4].mxu1 }
 0x100   :  { %v3360_v62 = vpop.f32.mrb[5].mxu1 }
 0x101   :  { %v652_v63 = vpop.f32.mrb[6].mxu1  ;;  %v2946_v62 = vcombine.low %v692_v50, %v700_v51  ;;  %v3426_v50 = vld [vmem:[%s4479_s5 + $0xc0] sm:$0xff]  }
 0x102   :  { %v3361_v0 = vpop.f32.mrb[7].mxu1  ;;  %v2952_v63 = vcombine.low %v695_v52, %v703_v53  ;;  %v3428_v51 = vld [vmem:[%s4479_s5 + $0x80] sm:$0xff]   ;;  %v3430_v52 = vld [vmem:[%s4479_s5 + $0xc8] sm:$0xff]  }
 0x103   :  { %v2963_v0 = vcombine.high %v708_v58, %v716_v59  ;;  %v3432_v53 = vld [vmem:[%s4479_s5 + $0x88] sm:$0xff]  }
 0x115   :  { %v3169_v1 = vpop.f32.mrb[4].mxu0 }
 0x116   :  { %v3170_v2 = vpop.f32.mrb[5].mxu0 }
 0x117   :  { %v3171_v3 = vadd.f32 %v3170_v2, %v3169_v1  ;;  %v3172_v4 = vpop.f32.mrb[6].mxu0  ;;  %v662_v2 = vld [vmem:[%s4477_s3 + $0x28] sm:$0xff] }
 0x118   :  { %v3173_v5 = vpop.f32.mrb[7].mxu0  ;;  %v2962_v4 = vcombine.low %v708_v58, %v716_v59  ;;  %v3439_v58 = vld [vmem:[%s4479_s5 + $0x78] sm:$0xff]  }
 0x119   :  { %v610_v6 = vadd.f32 %v3171_v3, %v570_v60  ;;  %v711_v60 = vld [vmem:[%s4477_s3 + $0x1b0] sm:$0xff]  ;;  %v670_v3 = vld [vmem:[%s4477_s3 + $0x68] sm:$0xff]  ;;  %v3440_v59 = vld [vmem:[%s4479_s5 + $0x98] sm:$0xff]  }
 0x11a   :  { %v2918_v10 = vcombine.low %v662_v2, %v670_v3 }
 0x11b   :  { %v650_v7 = vadd.f32 %v649_v61, %v610_v6  ;;  %v719_v61 = vld [vmem:[%s4477_s3 + $0x1f0] sm:$0xff]  ;;  %v2919_v6 = vcombine.high %v662_v2, %v670_v3 }
 0x11c   :  { %v2969_v1 = vcombine.high %v711_v60, %v719_v61  ;;  %v2968_v5 = vcombine.low %v711_v60, %v719_v61  ;;  %v3441_v60 = vld [vmem:[%s4479_s5 + $0x38] sm:$0xff]   ;;  %v3442_v61 = vld [vmem:[%s4479_s5 + $0xe0] sm:$0xff]   ;;  %v3450_v2 = vld [vmem:[%s4479_s5 + $0xf0] sm:$0xff]  }
 0x11d   :  { %v655_v12 = vmax.f32 %v650_v7, 0.0  ;;  %v3418_v7 = vld [vmem:[%s4479_s5 + $0x40] sm:$0xff]   ;;  %v3451_v3 = vld [vmem:[%s4479_s5 + $0xb0] sm:$0xff]  }
 0x11f   :  { %v3848_v13 = vpack.c.bf16 %v655_v12, %v655_v12  ;;  %v3419_v12 = vld [vmem:[%s4479_s5] sm:$0xff]  }
 0x121   :  { %2972 = vmatmul.mubr.msk.bf16.vlgmr.msra.gmra.mrb[8].mxu1 %vm1125_vm2, %v3848_v13  ;;  %2974 = vmatmul.mubr.msk.bf16.vlgmr.msra.gmra.mrb[8].mxu0 %vm1125_vm2, %v3848_v13 }
 0x122   :  { %1171 = vmatpush1.bf16.msra.mxu1 %v2910_v44  ;;  %1294 = vmatpush1.bf16.msra.mxu0 %v2916_v45  ;;  %v687_v44 = vld [vmem:[%s4477_s3 + $0xf0] sm:$0xff]  ;;  %v2914_v45 = vcombine.low %v660_v32, %v668_v33  ;;  %v680_v32 = vld [vmem:[%s4477_s3 + $0xb8] sm:$0xff] }
 0x123   :  { %1172 = vmatprep.subr.bf16.mxu1 %v2927_v14  ;;  %1295 = vmatprep.subr.bf16.mxu0 %v2933_v15  ;;  %v2937_v49 = vcombine.high %v679_v43, %v687_v44  ;;  %v2936_v55 = vcombine.low %v679_v43, %v687_v44  ;;  %v694_v14 = vld [vmem:[%s4477_s3 + $0x128] sm:$0xff]  ;;  %v688_v33 = vld [vmem:[%s4477_s3 + $0xf8] sm:$0xff] }
 0x124   :  { %1202 = vmatprep.mubr.bf16.mxu1 %v3573_v47  ;;  %1325 = vmatprep.mubr.bf16.mxu0 %v3573_v47  ;;  %v702_v15 = vld [vmem:[%s4477_s3 + $0x168] sm:$0xff]  ;;  %v2938_v42 = vcombine.low %v680_v32, %v688_v33 }
 0x125   :  { %v2951_v18 = vcombine.high %v694_v14, %v702_v15  ;;  %v3433_v44 = vld [vmem:[%s4479_s5 + $0x28] sm:$0xff]  }
 0x126   :  { %1173 = vmatpush1.bf16.msra.mxu1 %v2926_v20  ;;  %1296 = vmatpush1.bf16.msra.mxu0 %v2932_v21  ;;  %v710_v20 = vld [vmem:[%s4477_s3 + $0x1a8] sm:$0xff] }
 0x127   :  { %1174 = vmatprep.subr.bf16.mxu1 %v2943_v22  ;;  %1297 = vmatprep.subr.bf16.mxu0 %v2949_v23  ;;  %v718_v21 = vld [vmem:[%s4477_s3 + $0x1e8] sm:$0xff]  ;;  %v3422_v22 = vld [vmem:[%s4479_s5 + $0x50] sm:$0xff]   ;;  %v2950_v23 = vcombine.low %v694_v14, %v702_v15  ;;  %v747_v14 = vsub.s32 5, %v3711_v35 }
 0x128   :  { %v2967_v24 = vcombine.high %v710_v20, %v718_v21 }
 0x12a   :  { %1175 = vmatpush1.bf16.msra.mxu1 %v2942_v28  ;;  %1298 = vmatpush1.bf16.msra.mxu0 %v2948_v29  ;;  %v3424_v28 = vld [vmem:[%s4479_s5 + $0x58] sm:$0xff]   ;;  %v2966_v29 = vcombine.low %v710_v20, %v718_v21 }
 0x12b   :  { %1176 = vmatprep.subr.bf16.mxu1 %v2959_v30  ;;  %1299 = vmatprep.subr.bf16.mxu0 %v2965_v31  ;;  %v2923_v30 = vcombine.high %v664_v26, %v672_v27  ;;  %v3425_v31 = vld [vmem:[%s4479_s5 + $0x18] sm:$0xff]  }
 0x12e   :  { %1177 = vmatpush1.bf16.msra.mxu1 %v2958_v37  ;;  %1300 = vmatpush1.bf16.msra.mxu0 %v2964_v38  ;;  %v2939_v37 = vcombine.high %v680_v32, %v688_v33  ;;  %v3429_v38 = vld [vmem:[%s4479_s5 + $0x20] sm:$0xff]  }
 0x12f   :  { %1252 = vmatprep.subr.bf16.mxu1 %v2915_v39  ;;  %1375 = vmatprep.subr.bf16.mxu0 %v2921_v40  ;;  %v696_v39 = vld [vmem:[%s4477_s3 + $0x138] sm:$0xff]  ;;  %v3445_v33 = vld [vmem:[%s4479_s5 + $0x100] sm:$0xff]  }
 0x130   :  { %v704_v40 = vld [vmem:[%s4477_s3 + $0x178] sm:$0xff] }
 0x131   :  { %2973 = vmatmul.mubr.msk.bf16.vlgmr.msra.gmra.mrb[12].mxu1 %vm1125_vm2, %v3848_v13  ;;  %2976 = vmatmul.mubr.msk.bf16.vlgmr.msra.gmra.mrb[12].mxu0 %vm1125_vm2, %v3848_v13  ;;  %v2955_v43 = vcombine.high %v696_v39, %v704_v40 }
 0x132   :  { %1253 = vmatpush1.bf16.msra.mxu1 %v2914_v45  ;;  %1376 = vmatpush1.bf16.msra.mxu0 %v2920_v46  ;;  %v712_v45 = vld [vmem:[%s4477_s3 + $0x1b8] sm:$0xff] }
 0x133   :  { %1254 = vmatprep.subr.bf16.mxu1 %v2931_v48  ;;  %1377 = vmatprep.subr.bf16.mxu0 %v2937_v49  ;;  %v720_v46 = vld [vmem:[%s4477_s3 + $0x1f8] sm:$0xff]  ;;  %v2954_v48 = vcombine.low %v696_v39, %v704_v40  ;;  %v3449_v39 = vld [vmem:[%s4479_s5 + $0x108] sm:$0xff]   ;;  %v739_v40 = vsub.s32 3, %v3711_v35 }
 0x134   :  { %1284 = vmatprep.mubr.bf16.mxu1 %v3573_v47  ;;  %1407 = vmatprep.mubr.bf16.mxu0 %v3573_v47  ;;  %v2970_v49 = vcombine.low %v712_v45, %v720_v46 }
 0x136   :  { %1255 = vmatpush1.bf16.msra.mxu1 %v2930_v54  ;;  %1378 = vmatpush1.bf16.msra.mxu0 %v2936_v55  ;;  %v3434_v54 = vld [vmem:[%s4479_s5 + $0xd0] sm:$0xff]  }
 0x137   :  { %1256 = vmatprep.subr.bf16.mxu1 %v2947_v56  ;;  %1379 = vmatprep.subr.bf16.mxu0 %v2953_v57  ;;  %v3435_v55 = vld [vmem:[%s4479_s5 + $0x70] sm:$0xff]   ;;  %v3438_v57 = vld [vmem:[%s4479_s5 + $0xd8] sm:$0xff]  }
 0x138   :  { %v3437_v56 = vld [vmem:[%s4479_s5 + $0x30] sm:$0xff]  }
 0x13a   :  { %1257 = vmatpush1.bf16.msra.mxu1 %v2946_v62  ;;  %1380 = vmatpush1.bf16.msra.mxu0 %v2952_v63  ;;  %v3443_v62 = vld [vmem:[%s4479_s5 + $0xa0] sm:$0xff]  }
 0x13b   :  { %1258 = vmatprep.subr.bf16.mxu1 %v2963_v0  ;;  %1381 = vmatprep.subr.bf16.mxu0 %v2969_v1  ;;  %v3444_v63 = vld [vmem:[%s4479_s5 + $0x140] sm:$0xff]   ;;  %v3446_v0 = vld [vmem:[%s4479_s5 + $0xe8] sm:$0xff]  }
 0x13c   :  { %v3447_v1 = vld [vmem:[%s4479_s5 + $0xa8] sm:$0xff]  }
 0x13e   :  { %1259 = vmatpush1.bf16.msra.mxu1 %v2962_v4  ;;  %1382 = vmatpush1.bf16.msra.mxu0 %v2968_v5  ;;  %v3454_v4 = vld [vmem:[%s4479_s5 + $0xf8] sm:$0xff]  }
 0x13f   :  { %1334 = vmatprep.subr.bf16.mxu1 %v2919_v6  ;;  %3178 = vmatprep.subr.bf16.mxu0 %v3418_v7  ;;  %v3455_v5 = vld [vmem:[%s4479_s5 + $0xb8] sm:$0xff]   ;;  %v3458_v6 = vld [vmem:[%s4479_s5 + $0x1c0] sm:$0xff]   ;;  %v751_v7 = vsub.s32 6, %v3711_v35 }
 0x141   :  { %2975 = vmatmul.mubr.msk.bf16.vlgmr.msra.gmra.mrb[16].mxu1 %vm1125_vm2, %v3848_v13  ;;  %2978 = vmatmul.mubr.msk.bf16.vlgmr.msra.gmra.mrb[16].mxu0 %vm1125_vm2, %v3848_v13  ;;  %v4103_v9 = vrot.slane %v4098_v8, %v751_v7 }
 0x142   :  { %1335 = vmatpush1.bf16.msra.mxu1 %v2918_v10  ;;  %1366 = vmatprep.mubr.bf16.mxu1 %v3573_v47  ;;  %v727_v10 = vsub.s32 0, %v3711_v35 }
 0x143   :  { %1336 = vmatprep.subr.bf16.mxu1 %v2935_v11  ;;  %3179 = vmatpush3.bf16.msra.mxu0 %v3419_v12  ;;  %v4109_v11 = vld [vmem:[%s4478_s4] sm:$0xff]  ;;  %v731_v12 = vsub.s32 1, %v3711_v35 }
 0x144   :  { %3180 = vmatprep.subr.bf16.mxu0 %v3420_v16  ;;  %v728_v15 = vrot.slane %v4109_v11, %v727_v10 }
 0x145   :  { %v732_v16 = vrot.slane %v4109_v11, %v731_v12 }
 0x146   :  { %1337 = vmatpush1.bf16.msra.mxu1 %v2934_v17  ;;  %v748_v17 = vrot.slane %v4109_v11, %v747_v14 }
 0x147   :  { %1338 = vmatprep.subr.bf16.mxu1 %v2951_v18  ;;  %3181 = vmatpush3.bf16.msra.mxu0 %v3421_v19 }
 0x148   :  { %3182 = vmatprep.subr.bf16.mxu0 %v3422_v22 }
 0x14a   :  { %1339 = vmatpush1.bf16.msra.mxu1 %v2950_v23 }
 0x14b   :  { %1340 = vmatprep.subr.bf16.mxu1 %v2967_v24  ;;  %3183 = vmatpush3.bf16.msra.mxu0 %v3423_v25 }
 0x14c   :  { %3184 = vmatprep.subr.bf16.mxu0 %v3424_v28 }
 0x14e   :  { %1341 = vmatpush1.bf16.msra.mxu1 %v2966_v29 }
 0x14f   :  { %1416 = vmatprep.subr.bf16.mxu1 %v2923_v30  ;;  %3185 = vmatpush3.bf16.msra.mxu0 %v3425_v31 }
 0x150   :  { %3186 = vmatprep.subr.bf16.mxu0 %v3427_v34 }
 0x151   :  { %2977 = vmatmul.mubr.msk.bf16.vlgmr.msra.gmra.mrb[20].mxu1 %vm1125_vm2, %v3848_v13 }
 0x152   :  { %1417 = vmatpush1.bf16.msra.mxu1 %v2922_v36  ;;  %1448 = vmatprep.mubr.bf16.mxu1 %v3573_v47  ;;  %v2971_v47 = vcombine.high %v712_v45, %v720_v46  ;;  %v3448_v36 = vld [vmem:[%s4479_s5 + $0x148] sm:$0xff]   ;;  %v3456_v45 = vld [vmem:[%s4479_s5 + $0x158] sm:$0xff]  }
 0x153   :  { %1418 = vmatprep.subr.bf16.mxu1 %v2939_v37  ;;  %3187 = vmatpush3.bf16.msra.mxu0 %v3429_v38  ;;  %v735_v38 = vsub.s32 2, %v3711_v35 }
 0x154   :  { %3188 = vmatprep.subr.bf16.mxu0 %v3431_v41  ;;  %v3452_v41 = vld [vmem:[%s4479_s5 + $0x150] sm:$0xff]  }
 0x156   :  { %1419 = vmatpush1.bf16.msra.mxu1 %v2938_v42  ;;  %v736_v42 = vrot.slane %v4109_v11, %v735_v38 }
 0x157   :  { %1420 = vmatprep.subr.bf16.mxu1 %v2955_v43  ;;  %3189 = vmatpush3.bf16.msra.mxu0 %v3433_v44  ;;  %v740_v43 = vrot.slane %v4109_v11, %v739_v40  ;;  %v3453_v44 = vld [vmem:[%s4479_s5 + $0x110] sm:$0xff]  }
 0x158   :  { %3190 = vmatprep.subr.bf16.mxu0 %v3435_v55 }
 0x15a   :  { %1421 = vmatpush1.bf16.msra.mxu1 %v2954_v48 }
 0x15b   :  { %1422 = vmatprep.subr.bf16.mxu1 %v2971_v47  ;;  %3191 = vmatpush3.bf16.msra.mxu0 %v3437_v56 }
 0x15c   :  { %3192 = vmatprep.subr.bf16.mxu0 %v3439_v58 }
 0x15e   :  { %1423 = vmatpush1.bf16.msra.mxu1 %v2970_v49 }
 0x15f   :  { %3200 = vmatprep.subr.bf16.mxu1 %v3426_v50  ;;  %3193 = vmatpush3.bf16.msra.mxu0 %v3441_v60  ;;  %v3460_v60 = vld [vmem:[%s4479_s5 + $0x180] sm:$0xff]  }
 0x160   :  { %3222 = vmatprep.subr.bf16.mxu0 %v3444_v63 }
 0x161   :  { %2979 = vmatmul.mubr.msk.bf16.vlgmr.msra.gmra.mrb[24].mxu1 %vm1125_vm2, %v3848_v13  ;;  %v3436_v13 = vld [vmem:[%s4479_s5 + $0x90] sm:$0xff]  }
 0x162   :  { %3201 = vmatpush3.bf16.msra.mxu1 %v3428_v51 }
 0x163   :  { %3202 = vmatprep.subr.bf16.mxu1 %v3430_v52 }
 0x166   :  { %3203 = vmatpush3.bf16.msra.mxu1 %v3432_v53 }
 0x167   :  { %3204 = vmatprep.subr.bf16.mxu1 %v3434_v54  ;;  %v3457_v54 = vld [vmem:[%s4479_s5 + $0x118] sm:$0xff]  }
 0x16a   :  { %3205 = vmatpush3.bf16.msra.mxu1 %v3436_v13 }
 0x16b   :  { %3206 = vmatprep.subr.bf16.mxu1 %v3438_v57  ;;  %v3459_v57 = vld [vmem:[%s4479_s5 + $0x160] sm:$0xff]  }
 0x16e   :  { %3207 = vmatpush3.bf16.msra.mxu1 %v3440_v59 }
 0x16f   :  { %3208 = vmatprep.subr.bf16.mxu1 %v3442_v61  ;;  %v3461_v61 = vld [vmem:[%s4479_s5 + $0x120] sm:$0xff]  }
 0x172   :  { %3209 = vmatpush3.bf16.msra.mxu1 %v3443_v62  ;;  %v743_v62 = vsub.s32 4, %v3711_v35 }
 0x173   :  { %3210 = vmatprep.subr.bf16.mxu1 %v3446_v0  ;;  %v3462_v0 = vld [vmem:[%s4479_s5 + $0x1c8] sm:$0xff]  }
 0x176   :  { %3211 = vmatpush3.bf16.msra.mxu1 %v3447_v1  ;;  %v3463_v1 = vld [vmem:[%s4479_s5 + $0x168] sm:$0xff]  }
 0x177   :  { %3212 = vmatprep.subr.bf16.mxu1 %v3450_v2  ;;  %v3464_v2 = vld [vmem:[%s4479_s5 + $0x188] sm:$0xff]  }
 0x17a   :  { %3213 = vmatpush3.bf16.msra.mxu1 %v3451_v3  ;;  %v3465_v3 = vld [vmem:[%s4479_s5 + $0x128] sm:$0xff]  }
 0x17b   :  { %3214 = vmatprep.subr.bf16.mxu1 %v3454_v4  ;;  %v755_v4 = vsub.s32 7, %v3711_v35  ;;  %v3518_v35 = vld [vmem:[%s4479_s5 + $0x2f8] sm:$0xff]  }
 0x17e   :  { %3215 = vmatpush3.bf16.msra.mxu1 %v3455_v5  ;;  %v744_v5 = vrot.slane %v4109_v11, %v743_v62 }
 0x17f   :  { %3244 = vmatprep.subr.bf16.mxu1 %v3458_v6  ;;  %v3466_v6 = vld [vmem:[%s4479_s5 + $0x1d0] sm:$0xff]  }
 0x1f4   :  { %v1163_v18 = vpop.f32.mrb[8].mxu1  ;;  %v4122_v19 = vpop.f32.mrb[8].mxu0 }
 0x1f5   :  { %v1164_v20 = vadd.f32 %v1163_v18, %v728_v15  ;;  %v1165_v21 = vpop.f32.mrb[9].mxu1  ;;  %v1247_v22 = vpop.f32.mrb[9].mxu0  ;;  %v3467_v15 = vld [vmem:[%s4479_s5 + $0x170] sm:$0xff]   ;;  %v756_v18 = vrot.slane %v4109_v11, %v755_v4 }
 0x1f6   :  { %v1166_v23 = vadd.f32 %v1165_v21, %v732_v16  ;;  %v1248_v24 = vadd.f32 %v1247_v22, %v748_v17  ;;  %v1167_v25 = vpop.f32.mrb[10].mxu1  ;;  %v1249_v26 = vpop.f32.mrb[10].mxu0  ;;  %v764_v16 = vrot.slane %v4098_v8, %v731_v12  ;;  %v776_v17 = vrot.slane %v4098_v8, %v743_v62  ;;  %v3468_v21 = vld [vmem:[%s4479_s5 + $0x190] sm:$0xff]  }
 0x1f7   :  { %v1457_v27 = vmax.f32 %v1164_v20, 0.0  ;;  %v1168_v28 = vpop.f32.mrb[11].mxu1  ;;  %v1250_v29 = vpop.f32.mrb[11].mxu0  ;;  %v780_v20 = vrot.slane %v4098_v8, %v747_v14  ;;  %v3469_v12 = vld [vmem:[%s4479_s5 + $0x130] sm:$0xff]   ;;  %v1246_v22 = vadd.f32 %v4122_v19, %v744_v5  ;;  %v3471_v14 = vld [vmem:[%s4479_s5 + $0x178] sm:$0xff]  }
 0x1f8   :  { %v1458_v30 = vmax.f32 %v1166_v23, 0.0  ;;  %v1462_v31 = vmax.f32 %v1248_v24, 0.0  ;;  %v3470_v23 = vld [vmem:[%s4479_s5 + $0x1d8] sm:$0xff]  }
 0x1f9   :  { %v1473_v34 = vpack.c.bf16 %v1457_v27, %v1457_v27 }
 0x1fa   :  { %v1474_v32 = vpack.c.bf16 %v1458_v30, %v1458_v30  ;;  %v1478_v37 = vpack.c.bf16 %v1462_v31, %v1462_v31 }
 0x1fc   :  { %2552 = vmatprep.mubr.bf16.mxu0 %v1474_v32 }
 0x1fd   :  { %2553 = vmatmul.mubr.bf16.vlgmr.msra.gmra.mrb[20].mxu0 %v1473_v34  ;;  %v3473_v34 = vld [vmem:[%s4479_s5 + $0x138] sm:$0xff]  }
 0x1fe   :  { %3223 = vmatpush3.bf16.msra.mxu0 %v3445_v33  ;;  %2632 = vmatprep.mubr.bf16.mxu0 %v1478_v37  ;;  %v3472_v33 = vld [vmem:[%s4479_s5 + $0x198] sm:$0xff]  }
 0x1ff   :  { %3224 = vmatprep.subr.bf16.mxu0 %v3448_v36  ;;  %v1461_v36 = vmax.f32 %v1246_v22, 0.0  ;;  %v3495_v22 = vld [vmem:[%s4479_s5 + $0x268] sm:$0xff]  }
 0x202   :  { %3225 = vmatpush3.bf16.msra.mxu0 %v3449_v39 }
 0x203   :  { %3226 = vmatprep.subr.bf16.mxu0 %v3452_v41  ;;  %v3474_v41 = vld [vmem:[%s4479_s5 + $0x1e0] sm:$0xff]  }
 0x204   :  { %v1204_v46 = vpop.f32.mrb[12].mxu1  ;;  %v4150_v48 = vpop.f32.mrb[12].mxu0 }
 0x205   :  { %v1205_v47 = vadd.f32 %v1204_v46, %v736_v42  ;;  %v1206_v49 = vpop.f32.mrb[13].mxu1  ;;  %v1329_v50 = vpop.f32.mrb[13].mxu0  ;;  %v3476_v42 = vld [vmem:[%s4479_s5 + $0x240] sm:$0xff]  }
 0x206   :  { %v1207_v51 = vadd.f32 %v1206_v49, %v740_v43  ;;  %v1208_v52 = vpop.f32.mrb[14].mxu1  ;;  %v1331_v53 = vpop.f32.mrb[14].mxu0  ;;  %3227 = vmatpush3.bf16.msra.mxu0 %v3453_v44  ;;  %v1330_v26 = vadd.f32 %v1329_v50, %v764_v16  ;;  %v3475_v46 = vld [vmem:[%s4479_s5 + $0x1a0] sm:$0xff]   ;;  %v1477_v49 = vpack.c.bf16 %v1461_v36, %v1461_v36  ;;  %v3478_v50 = vld [vmem:[%s4479_s5 + $0x1e8] sm:$0xff]  }
 0x207   :  { %v1459_v55 = vmax.f32 %v1205_v47, 0.0  ;;  %v1209_v13 = vpop.f32.mrb[15].mxu1  ;;  %v1332_v56 = vpop.f32.mrb[15].mxu0  ;;  %3228 = vmatprep.subr.bf16.mxu0 %v3456_v45  ;;  %v3477_v47 = vld [vmem:[%s4479_s5 + $0x200] sm:$0xff]   ;;  %v3479_v53 = vld [vmem:[%s4479_s5 + $0x1a8] sm:$0xff]  }
 0x208   :  { %v1460_v58 = vmax.f32 %v1207_v51, 0.0  ;;  %v1466_v44 = vmax.f32 %v1330_v26, 0.0  ;;  %v3480_v51 = vld [vmem:[%s4479_s5 + $0x248] sm:$0xff]   ;;  %v3482_v13 = vld [vmem:[%s4479_s5 + $0x1f0] sm:$0xff]  }
 0x209   :  { %v1475_v63 = vpack.c.bf16 %v1459_v55, %v1459_v55  ;;  %v752_v55 = vrot.slane %v4109_v11, %v751_v7  ;;  %v3484_v56 = vld [vmem:[%s4479_s5 + $0x250] sm:$0xff]   ;;  %v772_v7 = vrot.slane %v4098_v8, %v739_v40 }
 0x20a   :  { %v1476_v59 = vpack.c.bf16 %v1460_v58, %v1460_v58  ;;  %3229 = vmatpush3.bf16.msra.mxu0 %v3457_v54  ;;  %v1482_v52 = vpack.c.bf16 %v1466_v44, %v1466_v44  ;;  %v3481_v54 = vld [vmem:[%s4479_s5 + $0x208] sm:$0xff]   ;;  %v3483_v11 = vld [vmem:[%s4479_s5 + $0x1b0] sm:$0xff]   ;;  %v3507_v44 = vld [vmem:[%s4479_s5 + $0x2a0] sm:$0xff]  }
 0x20b   :  { %3230 = vmatprep.subr.bf16.mxu0 %v3459_v57  ;;  %v768_v57 = vrot.slane %v4098_v8, %v735_v38  ;;  %v3485_v58 = vld [vmem:[%s4479_s5 + $0x210] sm:$0xff]   ;;  %v3486_v38 = vld [vmem:[%s4479_s5 + $0x1f8] sm:$0xff]  }
 0x20c   :  { %2592 = vmatprep.mubr.bf16.mxu1 %v1476_v59  ;;  %v3499_v26 = vld [vmem:[%s4479_s5 + $0x270] sm:$0xff]  }
 0x20d   :  { %2593 = vmatmul.mubr.bf16.vlgmr.msra.gmra.mrb[28].mxu1 %v1475_v63 }
 0x20e   :  { %3245 = vmatpush3.bf16.msra.mxu1 %v3460_v60  ;;  %3231 = vmatpush3.bf16.msra.mxu0 %v3461_v61  ;;  %v3488_v60 = vld [vmem:[%s4479_s5 + $0x258] sm:$0xff]  }
 0x20f   :  { %3246 = vmatprep.subr.bf16.mxu1 %v3462_v0  ;;  %3232 = vmatprep.subr.bf16.mxu0 %v3463_v1  ;;  %v3487_v1 = vld [vmem:[%s4479_s5 + $0x1b8] sm:$0xff]  }
 0x212   :  { %3247 = vmatpush3.bf16.msra.mxu1 %v3464_v2  ;;  %3233 = vmatpush3.bf16.msra.mxu0 %v3465_v3  ;;  %v3489_v2 = vld [vmem:[%s4479_s5 + $0x218] sm:$0xff]  }
 0x213   :  { %3248 = vmatprep.subr.bf16.mxu1 %v3466_v6  ;;  %3234 = vmatprep.subr.bf16.mxu0 %v3467_v15  ;;  %v3490_v6 = vld [vmem:[%s4479_s5 + $0x2c0] sm:$0xff]  }
 0x214   :  { %v1286_v24 = vpop.f32.mrb[16].mxu1  ;;  %v1409_v25 = vpop.f32.mrb[16].mxu0  ;;  %v3491_v15 = vld [vmem:[%s4479_s5 + $0x260] sm:$0xff]  }
 0x215   :  { %v4208_v27 = vadd.f32 %v1409_v25, %v776_v17  ;;  %v1288_v28 = vpop.f32.mrb[17].mxu1  ;;  %v1411_v29 = vpop.f32.mrb[17].mxu0  ;;  %v1287_v59 = vadd.f32 %v1286_v24, %v752_v55  ;;  %v3498_v24 = vld [vmem:[%s4479_s5 + $0x2d0] sm:$0xff]   ;;  %v760_v25 = vrot.slane %v4098_v8, %v727_v10  ;;  %v3502_v10 = vld [vmem:[%s4479_s5 + $0x2d8] sm:$0xff]  }
 0x216   :  { %v1289_v30 = vadd.f32 %v1288_v28, %v756_v18  ;;  %v4210_v31 = vadd.f32 %v1411_v29, %v780_v20  ;;  %3249 = vmatpush3.bf16.msra.mxu1 %v3468_v21  ;;  %v1290_v19 = vpop.f32.mrb[18].mxu1  ;;  %v1413_v32 = vpop.f32.mrb[18].mxu0  ;;  %3235 = vmatpush3.bf16.msra.mxu0 %v3469_v12  ;;  %v3492_v18 = vld [vmem:[%s4479_s5 + $0x280] sm:$0xff]   ;;  %v3494_v12 = vld [vmem:[%s4479_s5 + $0x2c8] sm:$0xff]   ;;  %v3500_v28 = vld [vmem:[%s4479_s5 + $0x290] sm:$0xff]  }
 0x217   :  { %v1291_v37 = vpop.f32.mrb[19].mxu1  ;;  %v1414_v39 = vpop.f32.mrb[19].mxu0  ;;  %3250 = vmatprep.subr.bf16.mxu1 %v3470_v23  ;;  %3236 = vmatprep.subr.bf16.mxu0 %v3471_v14  ;;  %v1463_v3 = vmax.f32 %v1287_v59, 0.0  ;;  %v3493_v21 = vld [vmem:[%s4479_s5 + $0x220] sm:$0xff]   ;;  %v3496_v23 = vld [vmem:[%s4479_s5 + $0x288] sm:$0xff]   ;;  %v3501_v29 = vld [vmem:[%s4479_s5 + $0x230] sm:$0xff]  }
 0x218   :  { %v1464_v43 = vmax.f32 %v1289_v30, 0.0  ;;  %v3497_v14 = vld [vmem:[%s4479_s5 + $0x228] sm:$0xff]   ;;  %v1328_v30 = vadd.f32 %v4150_v48, %v760_v25  ;;  %v3503_v32 = vld [vmem:[%s4479_s5 + $0x278] sm:$0xff]   ;;  %v3515_v55 = vld [vmem:[%s4479_s5 + $0x2b0] sm:$0xff]  }
 0x219   :  { %v1479_v20 = vpack.c.bf16 %v1463_v3, %v1463_v3  ;;  %v3504_v37 = vld [vmem:[%s4479_s5 + $0x298] sm:$0xff]   ;;  %v3523_v59 = vld [vmem:[%s4479_s5 + $0x360] sm:$0xff]   ;;  %v3531_v3 = vld [vmem:[%s4479_s5 + $0x370] sm:$0xff]  }
 0x21a   :  { %v1480_v45 = vpack.c.bf16 %v1464_v43, %v1464_v43  ;;  %3251 = vmatpush3.bf16.msra.mxu1 %v3472_v33  ;;  %3237 = vmatpush3.bf16.msra.mxu0 %v3473_v34  ;;  %v3505_v48 = vld [vmem:[%s4479_s5 + $0x238] sm:$0xff]   ;;  %v1470_v43 = vmax.f32 %v4210_v31, 0.0  ;;  %v3512_v31 = vld [vmem:[%s4479_s5 + $0x348] sm:$0xff]  }
 0x21b   :  { %3252 = vmatprep.subr.bf16.mxu1 %v3474_v41  ;;  %3266 = vmatprep.subr.bf16.mxu0 %v3476_v42  ;;  %v3506_v41 = vld [vmem:[%s4479_s5 + $0x2e0] sm:$0xff]   ;;  %v3544_v25 = vld [vmem:[%s4479_s5 + $0x3f8] sm:$0xff]  }
 0x21c   :  { %2672 = vmatprep.mubr.bf16.mxu1 %v1480_v45  ;;  %v3508_v42 = vld [vmem:[%s4479_s5 + $0x340] sm:$0xff]  }
 0x21d   :  { %2633 = vmatmul.mubr.bf16.vlgmr.msra.gmra.mrb[24].mxu0 %v1477_v49  ;;  %v3509_v45 = vld [vmem:[%s4479_s5 + $0x300] sm:$0xff]   ;;  %v1486_v49 = vpack.c.bf16 %v1470_v43, %v1470_v43 }
 0x21e   :  { %3253 = vmatpush3.bf16.msra.mxu1 %v3475_v46  ;;  %3267 = vmatpush3.bf16.msra.mxu0 %v3477_v47  ;;  %v3510_v47 = vld [vmem:[%s4479_s5 + $0x2e8] sm:$0xff]  }
 0x21f   :  { %2712 = vmatprep.mubr.bf16.mxu0 %v1482_v52  ;;  %3254 = vmatprep.subr.bf16.mxu1 %v3478_v50  ;;  %v3511_v50 = vld [vmem:[%s4479_s5 + $0x2a8] sm:$0xff]   ;;  %v3514_v52 = vld [vmem:[%s4479_s5 + $0x2f0] sm:$0xff]  }
 0x220   :  { %3268 = vmatprep.subr.bf16.mxu0 %v3480_v51  ;;  %v3513_v51 = vld [vmem:[%s4479_s5 + $0x308] sm:$0xff]  }
 0x222   :  { %3255 = vmatpush3.bf16.msra.mxu1 %v3479_v53  ;;  %3269 = vmatpush3.bf16.msra.mxu0 %v3481_v54  ;;  %v788_v53 = vrot.slane %v4098_v8, %v755_v4  ;;  %v3516_v54 = vld [vmem:[%s4479_s5 + $0x350] sm:$0xff]   ;;  %v3520_v4 = vld [vmem:[%s4479_s5 + $0x358] sm:$0xff]  }
 0x223   :  { %3256 = vmatprep.subr.bf16.mxu1 %v3482_v13  ;;  %3270 = vmatprep.subr.bf16.mxu0 %v3484_v56  ;;  %v3517_v13 = vld [vmem:[%s4479_s5 + $0x310] sm:$0xff]   ;;  %v3519_v56 = vld [vmem:[%s4479_s5 + $0x2b8] sm:$0xff]  }
 0x224   :  { %v1368_v40 = vpop.f32.mrb[20].mxu1 }
 0x225   :  { %v4269_v61 = vadd.f32 %v1368_v40, %v768_v57  ;;  %v1370_v62 = vpop.f32.mrb[21].mxu1  ;;  %v3525_v40 = vld [vmem:[%s4479_s5 + $0x320] sm:$0xff]  }
 0x226   :  { %v1371_v63 = vadd.f32 %v1370_v62, %v772_v7  ;;  %3257 = vmatpush3.bf16.msra.mxu1 %v3483_v11  ;;  %v1372_v0 = vpop.f32.mrb[22].mxu1  ;;  %3271 = vmatpush3.bf16.msra.mxu0 %v3485_v58  ;;  %v3521_v7 = vld [vmem:[%s4479_s5 + $0x318] sm:$0xff]   ;;  %v3522_v11 = vld [vmem:[%s4479_s5 + $0x3c0] sm:$0xff]  }
 0x227   :  { %v1373_v5 = vpop.f32.mrb[23].mxu1  ;;  %3258 = vmatprep.subr.bf16.mxu1 %v3486_v38  ;;  %3272 = vmatprep.subr.bf16.mxu0 %v3488_v60  ;;  %v1467_v57 = vmax.f32 %v4269_v61, 0.0  ;;  %v3524_v38 = vld [vmem:[%s4479_s5 + $0x380] sm:$0xff]   ;;  %v3526_v61 = vld [vmem:[%s4479_s5 + $0x3c8] sm:$0xff]  }
 0x228   :  { %v1468_v16 = vmax.f32 %v1371_v63, 0.0  ;;  %v3527_v63 = vld [vmem:[%s4479_s5 + $0x368] sm:$0xff]   ;;  %v3532_v5 = vld [vmem:[%s4479_s5 + $0x390] sm:$0xff]  }
 0x229   :  { %v1483_v60 = vpack.c.bf16 %v1467_v57, %v1467_v57  ;;  %v3528_v0 = vld [vmem:[%s4479_s5 + $0x388] sm:$0xff]  }
 0x22a   :  { %v1484_v17 = vpack.c.bf16 %v1468_v16, %v1468_v16  ;;  %3259 = vmatpush3.bf16.msra.mxu1 %v3487_v1  ;;  %3273 = vmatpush3.bf16.msra.mxu0 %v3489_v2  ;;  %v3529_v1 = vld [vmem:[%s4479_s5 + $0x328] sm:$0xff]   ;;  %v3530_v2 = vld [vmem:[%s4479_s5 + $0x3d0] sm:$0xff]   ;;  %v3535_v16 = vld [vmem:[%s4479_s5 + $0x378] sm:$0xff]  }
 0x22b   :  { %3288 = vmatprep.subr.bf16.mxu1 %v3490_v6  ;;  %3274 = vmatprep.subr.bf16.mxu0 %v3491_v15  ;;  %v3533_v6 = vld [vmem:[%s4479_s5 + $0x330] sm:$0xff]   ;;  %v3534_v15 = vld [vmem:[%s4479_s5 + $0x3d8] sm:$0xff]  }
 0x22d   :  { %2673 = vmatmul.mubr.bf16.vlgmr.msra.gmra.mrb[32].mxu1 %v1479_v20  ;;  %v3538_v20 = vld [vmem:[%s4479_s5 + $0x3e0] sm:$0xff]  }
 0x22e   :  { %3289 = vmatpush3.bf16.msra.mxu1 %v3492_v18  ;;  %2752 = vmatprep.mubr.bf16.mxu1 %v1484_v17  ;;  %v3536_v17 = vld [vmem:[%s4479_s5 + $0x398] sm:$0xff]  }
 0x22f   :  { %3275 = vmatpush3.bf16.msra.mxu0 %v3493_v21  ;;  %3290 = vmatprep.subr.bf16.mxu1 %v3494_v12  ;;  %v3537_v18 = vld [vmem:[%s4479_s5 + $0x338] sm:$0xff]   ;;  %v1469_v21 = vmax.f32 %v4208_v27, 0.0  ;;  %v3539_v12 = vld [vmem:[%s4479_s5 + $0x3a0] sm:$0xff]   ;;  %v3542_v27 = vld [vmem:[%s4479_s5 + $0x3f0] sm:$0xff]  }
 0x230   :  { %3276 = vmatprep.subr.bf16.mxu0 %v3495_v22  ;;  %v3540_v22 = vld [vmem:[%s4479_s5 + $0x3e8] sm:$0xff]  }
 0x232   :  { %3291 = vmatpush3.bf16.msra.mxu1 %v3496_v23  ;;  %v1485_v23 = vpack.c.bf16 %v1469_v21, %v1469_v21 }
 0x233   :  { %3277 = vmatpush3.bf16.msra.mxu0 %v3497_v14  ;;  %3292 = vmatprep.subr.bf16.mxu1 %v3498_v24  ;;  %v3541_v14 = vld [vmem:[%s4479_s5 + $0x3a8] sm:$0xff]   ;;  %v3543_v24 = vld [vmem:[%s4479_s5 + $0x3b0] sm:$0xff]  }
 0x234   :  { %v1450_v19 = vpop.f32.mrb[24].mxu1  ;;  %3278 = vmatprep.subr.bf16.mxu0 %v3499_v26  ;;  %v3545_v26 = vld [vmem:[%s4479_s5 + $0x3b8] sm:$0xff]   ;;  %s3574_s5 = smov [#allocation2]  }
 0x235   :  { %v4324_v33 = vadd.f32 %v1450_v19, %v4103_v9  ;;  %v1452_v34 = vpop.f32.mrb[25].mxu1  ;;  %v1465_v9 = vmax.f32 %v1328_v30, 0.0 }
 0x236   :  { %3293 = vmatpush3.bf16.msra.mxu1 %v3500_v28  ;;  %v1454_v36 = vpop.f32.mrb[26].mxu1  ;;  %v1453_v8 = vadd.f32 %v1452_v34, %v788_v53 }
 0x237   :  { %3279 = vmatpush3.bf16.msra.mxu0 %v3501_v29  ;;  %v1455_v39 = vpop.f32.mrb[27].mxu1  ;;  %3294 = vmatprep.subr.bf16.mxu1 %v3502_v10  ;;  %v1481_v46 = vpack.c.bf16 %v1465_v9, %v1465_v9  ;;  %v1471_v28 = vmax.f32 %v4324_v33, 0.0  ;;  %v2980_v36 = vld [vmem:[%s4480_s6] ss:$0 sm:$0xff]  ;;  %s2848_s6 = sshll.u32 %s3574_s5, 4  ;;  %s2849_s6 = int_to_ptr.vmem [resolvable:$true] %s2848_s6 }
 0x238   :  { %3280 = vmatprep.subr.bf16.mxu0 %v3503_v32  ;;  %v1472_v58 = vmax.f32 %v1453_v8, 0.0  ;;  %s3546_s21 = scalar_lea.vmem %s2849_s6, 32  ;;  %p3551_p1 = scmp.lt.s32.totalorder %s2849_s6, %s2849_s6 }
 0x239   :  { %v1487_v29 = vpack.c.bf16 %v1471_v28, %v1471_v28  ;;  %p3547_p0 = scmp.ne.s32.totalorder %s2849_s6, %s3546_s21  ;;  %p3552_p2 = scmp.lt.s32.totalorder %s3546_s21, %s3546_s21 }
 0x23a   :  { %3295 = vmatpush3.bf16.msra.mxu1 %v3504_v37  ;;  %v1488_v62 = vpack.c.bf16 %v1472_v58, %v1472_v58 }
 0x23b   :  { %3281 = vmatpush3.bf16.msra.mxu0 %v3505_v48  ;;  %3296 = vmatprep.subr.bf16.mxu1 %v3506_v41  ;;  %p3553_p3 = por %p3552_p2, %p3551_p1 }
 0x23c   :  { %3310 = vmatprep.subr.bf16.mxu0 %v3508_v42 }
 0x23d   :  { %p3554_p4 = pnand %p3553_p3, %p3547_p0 }
 0x23e   :  { %2713 = vmatmul.mubr.bf16.vlgmr.msra.gmra.mrb[28].mxu0 %v1481_v46  ;;  %3297 = vmatpush3.bf16.msra.mxu1 %v3507_v44 }
 0x23f   :  { %3311 = vmatpush3.bf16.msra.mxu0 %v3509_v45  ;;  %2792 = vmatprep.mubr.bf16.mxu0 %v1486_v49 }
 0x240   :  { %3298 = vmatprep.subr.bf16.mxu1 %v3510_v47  ;;  %3312 = vmatprep.subr.bf16.mxu0 %v3512_v31 }
 0x242   :  { %3299 = vmatpush3.bf16.msra.mxu1 %v3511_v50 }
 0x243   :  { %3313 = vmatpush3.bf16.msra.mxu0 %v3513_v51  ;;  %3300 = vmatprep.subr.bf16.mxu1 %v3514_v52 }
 0x244   :  { %3314 = vmatprep.subr.bf16.mxu0 %v3516_v54 }
 0x246   :  { %3301 = vmatpush3.bf16.msra.mxu1 %v3515_v55 }
 0x247   :  { %3315 = vmatpush3.bf16.msra.mxu0 %v3517_v13  ;;  %3302 = vmatprep.subr.bf16.mxu1 %v3518_v35 }
 0x248   :  { %3316 = vmatprep.subr.bf16.mxu0 %v3520_v4 }
 0x24a   :  { %3303 = vmatpush3.bf16.msra.mxu1 %v3519_v56 }
 0x24b   :  { %3317 = vmatpush3.bf16.msra.mxu0 %v3521_v7  ;;  %3332 = vmatprep.subr.bf16.mxu1 %v3522_v11 }
 0x24c   :  { %3318 = vmatprep.subr.bf16.mxu0 %v3523_v59 }
 0x24d   :  { %2753 = vmatmul.mubr.bf16.vlgmr.msra.gmra.mrb[36].mxu1 %v1483_v60 }
 0x24e   :  { %3333 = vmatpush3.bf16.msra.mxu1 %v3524_v38  ;;  %2832 = vmatprep.mubr.bf16.mxu1 %v1488_v62 }
 0x24f   :  { %3319 = vmatpush3.bf16.msra.mxu0 %v3525_v40  ;;  %3334 = vmatprep.subr.bf16.mxu1 %v3526_v61 }
 0x250   :  { %3320 = vmatprep.subr.bf16.mxu0 %v3527_v63 }
 0x252   :  { %3335 = vmatpush3.bf16.msra.mxu1 %v3528_v0 }
 0x253   :  { %3321 = vmatpush3.bf16.msra.mxu0 %v3529_v1  ;;  %3336 = vmatprep.subr.bf16.mxu1 %v3530_v2 }
 0x254   :  { %3322 = vmatprep.subr.bf16.mxu0 %v3531_v3 }
 0x256   :  { %3337 = vmatpush3.bf16.msra.mxu1 %v3532_v5 }
 0x257   :  { %3323 = vmatpush3.bf16.msra.mxu0 %v3533_v6  ;;  %3338 = vmatprep.subr.bf16.mxu1 %v3534_v15 }
 0x258   :  { %3324 = vmatprep.subr.bf16.mxu0 %v3535_v16 }
 0x25a   :  { %3339 = vmatpush3.bf16.msra.mxu1 %v3536_v17 }
 0x25b   :  { %3325 = vmatpush3.bf16.msra.mxu0 %v3537_v18  ;;  %3340 = vmatprep.subr.bf16.mxu1 %v3538_v20 }
 0x25e   :  { %2793 = vmatmul.mubr.bf16.vlgmr.msra.gmra.mrb[32].mxu0 %v1485_v23  ;;  %3341 = vmatpush3.bf16.msra.mxu1 %v3539_v12 }
 0x25f   :  { %3342 = vmatprep.subr.bf16.mxu1 %v3540_v22 }
 0x262   :  { %3343 = vmatpush3.bf16.msra.mxu1 %v3541_v14 }
 0x263   :  { %3344 = vmatprep.subr.bf16.mxu1 %v3542_v27 }
 0x266   :  { %3345 = vmatpush3.bf16.msra.mxu1 %v3543_v24 }
 0x267   :  { %3346 = vmatprep.subr.bf16.mxu1 %v3544_v25 }
 0x26a   :  { %3347 = vmatpush3.bf16.msra.mxu1 %v3545_v26 }
 0x26d   :  { %2833 = vmatmul.mubr.bf16.vlgmr.msra.gmra.mrb[40].mxu1 %v1487_v29 }
 0x2d0   :  { %v3194_v10 = vpop.f32.mrb[20].mxu0 }
 0x2d1   :  { %v3195_v30 = vpop.f32.mrb[21].mxu0 }
 0x2d2   :  { %v3196_v19 = vadd.f32 %v3195_v30, %v3194_v10  ;;  %v3197_v32 = vpop.f32.mrb[22].mxu0 }
 0x2d3   :  { %v3198_v34 = vpop.f32.mrb[23].mxu0 }
 0x2d4   :  { %v2555_v48 = vadd.f32 %v3196_v19, %v2980_v36 }
 0x2e0   :  { %v3216_v37 = vpop.f32.mrb[28].mxu1 }
 0x2e1   :  { %v3217_v39 = vpop.f32.mrb[29].mxu1 }
 0x2e2   :  { %v3218_v41 = vadd.f32 %v3217_v39, %v3216_v37  ;;  %v3219_v9 = vpop.f32.mrb[30].mxu1 }
 0x2e3   :  { %v3220_v42 = vpop.f32.mrb[31].mxu1 }
 0x2e4   :  { %v2595_v33 = vadd.f32 %v3218_v41, %v2555_v48 }
 0x2f0   :  { %v3238_v43 = vpop.f32.mrb[24].mxu0 }
 0x2f1   :  { %v3239_v44 = vpop.f32.mrb[25].mxu0 }
 0x2f2   :  { %v3240_v45 = vadd.f32 %v3239_v44, %v3238_v43  ;;  %v3241_v46 = vpop.f32.mrb[26].mxu0 }
 0x2f3   :  { %v3242_v47 = vpop.f32.mrb[27].mxu0 }
 0x2f4   :  { %v2635_v31 = vadd.f32 %v3240_v45, %v2595_v33 }
 0x300   :  { %v3260_v49 = vpop.f32.mrb[32].mxu1 }
 0x301   :  { %v3261_v50 = vpop.f32.mrb[33].mxu1 }
 0x302   :  { %v3262_v51 = vadd.f32 %v3261_v50, %v3260_v49  ;;  %v3263_v52 = vpop.f32.mrb[34].mxu1 }
 0x303   :  { %v3264_v53 = vpop.f32.mrb[35].mxu1 }
 0x304   :  { %v2675_v54 = vadd.f32 %v3262_v51, %v2635_v31 }
 0x311   :  { %v3282_v55 = vpop.f32.mrb[28].mxu0 }
 0x312   :  { %v3283_v13 = vpop.f32.mrb[29].mxu0 }
 0x313   :  { %v3284_v35 = vadd.f32 %v3283_v13, %v3282_v55  ;;  %v3285_v8 = vpop.f32.mrb[30].mxu0 }
 0x314   :  { %v3286_v4 = vpop.f32.mrb[31].mxu0 }
 0x315   :  { %v2715_v56 = vadd.f32 %v3284_v35, %v2675_v54 }
 0x320   :  { %v3304_v57 = vpop.f32.mrb[36].mxu1 }
 0x321   :  { %v3305_v7 = vpop.f32.mrb[37].mxu1 }
 0x322   :  { %v3306_v11 = vadd.f32 %v3305_v7, %v3304_v57  ;;  %v3307_v58 = vpop.f32.mrb[38].mxu1 }
 0x323   :  { %v3308_v59 = vpop.f32.mrb[39].mxu1 }
 0x324   :  { %v2755_v38 = vadd.f32 %v3306_v11, %v2715_v56 }
 0x331   :  { %v3326_v60 = vpop.f32.mrb[32].mxu0 }
 0x332   :  { %v3327_v40 = vpop.f32.mrb[33].mxu0 }
 0x333   :  { %v3328_v61 = vadd.f32 %v3327_v40, %v3326_v60  ;;  %v3329_v62 = vpop.f32.mrb[34].mxu0 }
 0x334   :  { %v3330_v63 = vpop.f32.mrb[35].mxu0 }
 0x335   :  { %v2795_v0 = vadd.f32 %v3328_v61, %v2755_v38 }
 0x340   :  { %v3348_v1 = vpop.f32.mrb[40].mxu1 }
 0x341   :  { %v3349_v2 = vpop.f32.mrb[41].mxu1 }
 0x342   :  { %v3350_v3 = vadd.f32 %v3349_v2, %v3348_v1  ;;  %v3351_v5 = vpop.f32.mrb[42].mxu1 }
 0x343   :  { %v3352_v6 = vpop.f32.mrb[43].mxu1 }
 0x344   :  { %v2835_v15 = vadd.f32 %v3350_v3, %v2795_v0 }
 0x346   :  { %2841 = vst.msk [vmem:[#allocation2] sm:$0x3] %vm2840_vm3, %v2835_v15 }
 0x347   :  { %3557 = shalt.err (!%p3554_p4)
}
 0x348   :  { %s3558_s23 = scalar_lea.hbm %s4481_s7, 32 }
 0x349   :  { %p3559_p5 = scmp.ne.s32.totalorder %s4481_s7, %s3558_s23  ;;  %p3562_p6 = scmp.lt.u32.totalorder %s3558_s23, %s4481_s7 }
 0x34b   :  { %p3564_p7 = pnand %p3562_p6, %p3559_p5 }
 0x34d   :  { %3567 = shalt.err (!%p3564_p7)
}
 0x34e   :  { %2851 = dma.vmem_to_hbm [thread:$0]  %s2849_s6, 32, %s4481_s7, [#allocation3]  }
 0x34f   :  { %3568 = dma.done.wait [#allocation3], 32  }
 0x350   :  { %3569 = vsyncadd [#allocation3], 4294967264 }
 0x351   :  { %2855 = vsyncpa [#allocation3], 1 }

</bundles_post_ra>
